<compile_context>
chip_gen: v5e
topology: v5e:2x2
jax: 0.10.0
libtpu: 0.0.40
codegen_flags: <defaults>
</compile_context>

<pallas_src>
import jax
import jax.numpy as jnp
from jax.experimental import pallas as pl
from jax.experimental.pallas import tpu as pltpu

EMBED_DIM = 1024
FRAME = 16
NUM_CLASSES = 7
CLASS_PAD = 128           # lane-dense padded class dimension
EPS = 1e-5                # nn.LayerNorm default


def classifier_kernel(x_ref, w1_ref, b1_ref, w2_ref, b2_ref, o_ref):
    # x_ref : (TB, FRAME, D) raw frames (f32) -- frame-mean fused in-kernel
    # w1_ref: (D, D)   fc1 weight (in, out)                   (bf16, 1-buffered)
    # b1_ref: (1, D)   fc1 bias                               (f32,  1-buffered)
    # w2_ref: (D, CP)  fc2 weight, gamma-folded, 0-padded CP  (bf16, 1-buffered)
    # b2_ref: (1, CP)  fc2 bias with beta @ W2 folded, padded (f32,  1-buffered)
    # o_ref : (TB, CP) output tile                            (f32)

    # Fused frame-mean pooling (mean commutes through the affine fc1).
    xp = (jnp.sum(x_ref[...], axis=1) * (1.0 / FRAME)).astype(w1_ref.dtype)

    # fc1 on pooled rows (MXU, f32 accumulation)
    m = jnp.dot(xp, w1_ref[...], preferred_element_type=jnp.float32)
    m = m + b1_ref[...]                                       # (TB, D) f32

    # One-pass LayerNorm stats over the embed dim: var = E[m^2] - mu^2.
    mu = jnp.mean(m, axis=-1, keepdims=True)
    ms = jnp.mean(m * m, axis=-1, keepdims=True)
    var = jnp.maximum(ms - mu * mu, 0.0)                      # clamp cancellation
    mn = (m - mu) * jax.lax.rsqrt(var + EPS)                  # (TB, D) f32

    # fc2 (gamma/beta already folded into w2/b2)
    out = jnp.dot(mn.astype(w2_ref.dtype), w2_ref[...],
                  preferred_element_type=jnp.float32)
    o_ref[...] = (out + b2_ref[...]).astype(o_ref.dtype)      # (TB, CP)


def _round_up(v, m):
    return ((v + m - 1) // m) * m


def classifier_forward(x, w1, b1, w2, b2, gamma, beta,
                       compute_dtype=jnp.bfloat16):
    # torch: x.contiguous().view(-1, 16, 1024)
    x3 = x.reshape(-1, FRAME, EMBED_DIM).astype(jnp.float32)  # (B, F, D)
    B = x3.shape[0]

    # Batch tile: multiple of 8 (sublane), capped at 128 (fused f32 x tile is
    # <= 8 MiB/buffer); once B >= 16, force >= 2 grid steps so the "parallel"
    # axis can be sharded across both v7x TensorCores.
    if B >= 16:
        TB = min(128, _round_up(-(-B // 2), 8))
    else:
        TB = max(8, _round_up(B, 8))
    B_pad = _round_up(B, TB)
    if B_pad != B:
        x3 = jnp.pad(x3, ((0, B_pad - B), (0, 0), (0, 0)))

    # Fold LayerNorm affine into fc2:  (n * g + be) @ W2 + b2
    #   = n @ (g[:,None] * W2) + (be @ W2 + b2)
    w2f = gamma[:, None] * w2                                  # (D, C) f32
    b2f = beta @ w2 + b2                                       # (C,)   f32
    w2p = jnp.zeros((EMBED_DIM, CLASS_PAD), jnp.float32).at[:, :NUM_CLASSES].set(w2f)
    b2p = jnp.zeros((1, CLASS_PAD), jnp.float32).at[0, :NUM_CLASSES].set(b2f)

    # bf16 matmul operands; biases / LN stay f32.
    w1_c = w1.astype(compute_dtype)
    w2_c = w2p.astype(compute_dtype)
    b1_c = b1.reshape(1, EMBED_DIM).astype(jnp.float32)

    grid = (B_pad // TB,)

    flops = (2 * B_pad * EMBED_DIM * EMBED_DIM          # fc1
             + 2 * B_pad * EMBED_DIM * CLASS_PAD        # fc2 (padded)
             + B_pad * FRAME * EMBED_DIM)               # fused pooling adds
    bytes_accessed = (B_pad * FRAME * EMBED_DIM * 4     # raw x (f32)
                      + EMBED_DIM * EMBED_DIM * 2       # W1 bf16
                      + EMBED_DIM * CLASS_PAD * 2       # W2' bf16
                      + EMBED_DIM * 4 + CLASS_PAD * 4   # biases
                      + B_pad * CLASS_PAD * 4)          # output

    out = pl.pallas_call(
        classifier_kernel,
        out_shape=jax.ShapeDtypeStruct((B_pad, CLASS_PAD), jnp.float32),
        grid=grid,
        in_specs=[
            # raw frames tile, double-buffered by default (pipelined DMA)
            pl.BlockSpec((TB, FRAME, EMBED_DIM), lambda i: (i, 0, 0)),
            # grid-invariant operands: single buffer (constant index_map)
            pl.BlockSpec((EMBED_DIM, EMBED_DIM), lambda i: (0, 0),
                         pipeline_mode=pl.Buffered(1)),
            pl.BlockSpec((1, EMBED_DIM), lambda i: (0, 0),
                         pipeline_mode=pl.Buffered(1)),
            pl.BlockSpec((EMBED_DIM, CLASS_PAD), lambda i: (0, 0),
                         pipeline_mode=pl.Buffered(1)),
            pl.BlockSpec((1, CLASS_PAD), lambda i: (0, 0),
                         pipeline_mode=pl.Buffered(1)),
        ],
        out_specs=pl.BlockSpec((TB, CLASS_PAD), lambda i: (i, 0)),
        compiler_params=pltpu.CompilerParams(
            dimension_semantics=("parallel",),
            # fused f32 x tile (up to 2 x 8 MiB) + ~2.3 MiB weights: raise the
            # scoped limit above v5e's 16 MiB default; still well under v7x's
            # 64 MiB physical VMEM.
            vmem_limit_bytes=40 * 1024 * 1024,
        ),
        cost_estimate=pl.CostEstimate(
            flops=flops, bytes_accessed=bytes_accessed,
            transcendentals=B_pad),                     # rsqrt per row
    )(x3, w1_c, b1_c, w2_c, b2p)

    return out[:B, :NUM_CLASSES].astype(x.dtype)


def reference_forward(x, w1, b1, w2, b2, gamma, beta):
    x = x.reshape(-1, FRAME, EMBED_DIM)
    h = jnp.einsum("bfd,de->bfe", x, w1) + b1
    m = h.mean(axis=1)
    mu = m.mean(axis=-1, keepdims=True)
    var = ((m - mu) ** 2).mean(axis=-1, keepdims=True)
    mn = (m - mu) / jnp.sqrt(var + EPS) * gamma + beta
    return mn @ w2 + b2


if __name__ == "__main__":
    key = jax.random.PRNGKey(0)
    kx, k1, k2, k3, k4 = jax.random.split(key, 5)

    B = 2  # batch of video clips, each with FRAME=16 tokens of EMBED_DIM=1024
    x = jax.random.normal(kx, (B, FRAME, EMBED_DIM), dtype=jnp.float32)

    # deterministic synthetic parameters (shapes from the module __init__)
    w1 = jax.random.normal(k1, (EMBED_DIM, EMBED_DIM), dtype=jnp.float32) * 0.02
    b1 = jax.random.normal(k2, (EMBED_DIM,), dtype=jnp.float32) * 0.02
    w2 = jax.random.normal(k3, (EMBED_DIM, NUM_CLASSES), dtype=jnp.float32) * 0.02
    b2 = jax.random.normal(k4, (NUM_CLASSES,), dtype=jnp.float32) * 0.02
    gamma = jnp.ones((EMBED_DIM,), dtype=jnp.float32)   # LayerNorm weight init
    beta = jnp.zeros((EMBED_DIM,), dtype=jnp.float32)   # LayerNorm bias init

    out = classifier_forward(x, w1, b1, w2, b2, gamma, beta)
    out = jax.block_until_ready(out)

    ref = reference_forward(x, w1, b1, w2, b2, gamma, beta)
    assert out.shape == (B, NUM_CLASSES)
    # bf16 matmul operands with f32 accumulation -> relaxed tolerance vs f32 ref
    assert jnp.allclose(out, ref, atol=5e-2, rtol=5e-2), (out, ref)

    print("KERNEL_OK")
</pallas_src>

<mosaic_0001>
module attributes {stable_mosaic.version = 11 : i64} {
  func.func @classifier_kernel(%arg0: i32, %arg1: memref<8x16x1024xf32, #tpu.memory_space<vmem>>, %arg2: memref<1024x1024xbf16, #tpu.memory_space<vmem>>, %arg3: memref<1x1024xf32, #tpu.memory_space<vmem>>, %arg4: memref<1024x128xbf16, #tpu.memory_space<vmem>>, %arg5: memref<1x128xf32, #tpu.memory_space<vmem>>, %arg6: memref<8x128xf32, #tpu.memory_space<vmem>>) attributes {dimension_semantics = [#tpu.dimension_semantics<parallel>], iteration_bounds = array<i64: 1>, scalar_prefetch = 0 : i64, scratch_operands = 0 : i64, tpu.core_type = #tpu.core_type<tc>, window_params = [{transform_indices = @transform_0, window_bounds = array<i64: 8, 16, 1024>}, {pipeline_mode = #tpu.pipeline_mode<synchronous>, transform_indices = @transform_1, window_bounds = array<i64: 1024, 1024>}, {pipeline_mode = #tpu.pipeline_mode<synchronous>, transform_indices = @transform_2, window_bounds = array<i64: 1, 1024>}, {pipeline_mode = #tpu.pipeline_mode<synchronous>, transform_indices = @transform_3, window_bounds = array<i64: 1024, 128>}, {pipeline_mode = #tpu.pipeline_mode<synchronous>, transform_indices = @transform_4, window_bounds = array<i64: 1, 128>}, {transform_indices = @transform_5, window_bounds = array<i64: 8, 128>}]} {
    %c0 = arith.constant 0 : index
    %c0_0 = arith.constant 0 : index
    %c0_1 = arith.constant 0 : index
    %0 = vector.load %arg1[%c0, %c0_0, %c0_1] : memref<8x16x1024xf32, #tpu.memory_space<vmem>>, vector<8x16x1024xf32>
    %cst = arith.constant dense<0.000000e+00> : vector<8x1024xf32>
    %1 = vector.multi_reduction <add>, %0, %cst [1] : vector<8x16x1024xf32> to vector<8x1024xf32>
    %cst_2 = arith.constant 6.250000e-02 : f32
    %2 = vector.broadcast %cst_2 : f32 to vector<8x1024xf32>
    %3 = arith.mulf %1, %2 : vector<8x1024xf32>
    %4 = arith.truncf %3 : vector<8x1024xf32> to vector<8x1024xbf16>
    %c0_3 = arith.constant 0 : index
    %c0_4 = arith.constant 0 : index
    %5 = vector.load %arg2[%c0_3, %c0_4] : memref<1024x1024xbf16, #tpu.memory_space<vmem>>, vector<1024x1024xbf16>
    %cst_5 = arith.constant dense<0.000000e+00> : vector<8x1024xf32>
    %6 = tpu.matmul %4, %5, %cst_5 {dimension_numbers = #tpu.dot_dimension_numbers<[1], [0], [0], [1], [0, 0, 1, 1], [], []>} : vector<8x1024xbf16>, vector<1024x1024xbf16>, vector<8x1024xf32> -> vector<8x1024xf32>
    %c0_6 = arith.constant 0 : index
    %c0_7 = arith.constant 0 : index
    %7 = vector.load %arg3[%c0_6, %c0_7] : memref<1x1024xf32, #tpu.memory_space<vmem>>, vector<1x1024xf32>
    %8 = vector.broadcast %7 : vector<1x1024xf32> to vector<8x1024xf32>
    %9 = arith.addf %6, %8 : vector<8x1024xf32>
    %cst_8 = arith.constant dense<0.000000e+00> : vector<8xf32>
    %10 = vector.multi_reduction <add>, %9, %cst_8 [1] : vector<8x1024xf32> to vector<8xf32>
    %11 = vector.shape_cast %10 : vector<8xf32> to vector<8x1xf32>
    %cst_9 = arith.constant 1.024000e+03 : f32
    %12 = vector.broadcast %cst_9 : f32 to vector<8x1xf32>
    %13 = arith.divf %11, %12 : vector<8x1xf32>
    %14 = arith.mulf %9, %9 : vector<8x1024xf32>
    %cst_10 = arith.constant dense<0.000000e+00> : vector<8xf32>
    %15 = vector.multi_reduction <add>, %14, %cst_10 [1] : vector<8x1024xf32> to vector<8xf32>
    %16 = vector.shape_cast %15 : vector<8xf32> to vector<8x1xf32>
    %cst_11 = arith.constant 1.024000e+03 : f32
    %17 = vector.broadcast %cst_11 : f32 to vector<8x1xf32>
    %18 = arith.divf %16, %17 : vector<8x1xf32>
    %19 = arith.mulf %13, %13 : vector<8x1xf32>
    %20 = arith.subf %18, %19 : vector<8x1xf32>
    %cst_12 = arith.constant 0.000000e+00 : f32
    %21 = vector.broadcast %cst_12 : f32 to vector<8x1xf32>
    %22 = arith.maximumf %20, %21 : vector<8x1xf32>
    %23 = vector.broadcast %13 : vector<8x1xf32> to vector<8x1024xf32>
    %24 = arith.subf %9, %23 : vector<8x1024xf32>
    %cst_13 = arith.constant 9.99999974E-6 : f32
    %25 = vector.broadcast %cst_13 : f32 to vector<8x1xf32>
    %26 = arith.addf %22, %25 : vector<8x1xf32>
    %27 = math.rsqrt %26 : vector<8x1xf32>
    %28 = vector.broadcast %27 : vector<8x1xf32> to vector<8x1024xf32>
    %29 = arith.mulf %24, %28 : vector<8x1024xf32>
    %30 = arith.truncf %29 : vector<8x1024xf32> to vector<8x1024xbf16>
    %c0_14 = arith.constant 0 : index
    %c0_15 = arith.constant 0 : index
    %31 = vector.load %arg4[%c0_14, %c0_15] : memref<1024x128xbf16, #tpu.memory_space<vmem>>, vector<1024x128xbf16>
    %cst_16 = arith.constant dense<0.000000e+00> : vector<8x128xf32>
    %32 = tpu.matmul %30, %31, %cst_16 {dimension_numbers = #tpu.dot_dimension_numbers<[1], [0], [0], [1], [0, 0, 1, 1], [], []>} : vector<8x1024xbf16>, vector<1024x128xbf16>, vector<8x128xf32> -> vector<8x128xf32>
    %c0_17 = arith.constant 0 : index
    %c0_18 = arith.constant 0 : index
    %33 = vector.load %arg5[%c0_17, %c0_18] : memref<1x128xf32, #tpu.memory_space<vmem>>, vector<1x128xf32>
    %34 = vector.broadcast %33 : vector<1x128xf32> to vector<8x128xf32>
    %35 = arith.addf %32, %34 : vector<8x128xf32>
    %c0_19 = arith.constant 0 : index
    %c0_20 = arith.constant 0 : index
    %36 = vector.load %arg6[%c0_19, %c0_20] : memref<8x128xf32, #tpu.memory_space<vmem>>, vector<8x128xf32>
    tpu.vector_store %arg6[%c0_19, %c0_20], %35 {strides = array<i32>} : memref<8x128xf32, #tpu.memory_space<vmem>>, vector<8x128xf32>,
    return
  }
  func.func @transform_0(%arg0: i32) -> (i32, i32, i32) {
    %c0_i32 = arith.constant 0 : i32
    %c0_i32_0 = arith.constant 0 : i32
    %c0_i32_1 = arith.constant 0 : i32
    return %arg0, %c0_i32, %c0_i32_0 : i32, i32, i32
  }
  func.func @transform_1(%arg0: i32) -> (i32, i32) {
    %c0_i32 = arith.constant 0 : i32
    %c0_i32_0 = arith.constant 0 : i32
    %c0_i32_1 = arith.constant 0 : i32
    return %c0_i32, %c0_i32_0 : i32, i32
  }
  func.func @transform_2(%arg0: i32) -> (i32, i32) {
    %c0_i32 = arith.constant 0 : i32
    %c0_i32_0 = arith.constant 0 : i32
    %c0_i32_1 = arith.constant 0 : i32
    return %c0_i32, %c0_i32_0 : i32, i32
  }
  func.func @transform_3(%arg0: i32) -> (i32, i32) {
    %c0_i32 = arith.constant 0 : i32
    %c0_i32_0 = arith.constant 0 : i32
    %c0_i32_1 = arith.constant 0 : i32
    return %c0_i32, %c0_i32_0 : i32, i32
  }
  func.func @transform_4(%arg0: i32) -> (i32, i32) {
    %c0_i32 = arith.constant 0 : i32
    %c0_i32_0 = arith.constant 0 : i32
    %c0_i32_1 = arith.constant 0 : i32
    return %c0_i32, %c0_i32_0 : i32, i32
  }
  func.func @transform_5(%arg0: i32) -> (i32, i32) {
    %c0_i32 = arith.constant 0 : i32
    %c0_i32_0 = arith.constant 0 : i32
    return %arg0, %c0_i32 : i32, i32
  }
}

</mosaic_0001>

<bundles_post_ra>
// kernel: tpu_custom_call.1
= control target key start
LH: loop header
LB: loop body
LE: loop exit
PB: predicated region body
PF: predicated region fallthrough
CT: control target
= control target key end

     0   :  { %10 = vsyncpa [#allocation3], 0  ;;  %s9133_s0 = inlined_call_operand.hbm [shape: f32[8,16,1024], index: 0, kind: input, shape index: {}]   ;;  %s9134_s1 = inlined_call_operand.hbm [shape: bf16[1024,1024], index: 1, kind: input, shape index: {}]   ;;  %s9135_s2 = inlined_call_operand.hbm [shape: f32[1,1024], index: 2, kind: input, shape index: {}]   ;;  %s9136_s3 = inlined_call_operand.hbm [shape: bf16[1024,128], index: 3, kind: input, shape index: {}]   ;;  %s9137_s4 = inlined_call_operand.hbm [shape: f32[1,128], index: 4, kind: input, shape index: {}]   ;;  %s9138_s5 = inlined_call_operand.hbm [shape: f32[8,128], index: 5, kind: output, shape index: {}]  }
   0x1   :  { %11 = vsyncpa [#allocation6], 0 }
   0x2   :  { %12 = vsyncpa [#allocation9], 0  ;;  %s31_s20 = sshll.u32 %s9134_s1, 4  ;;  %s32_s20 = int_to_ptr.hbm [resolvable:$true] %s31_s20 }
   0x3   :  { %13 = vsyncpa [#allocation4], 0  ;;  %s8692_s21 = smov [#allocation5]   ;;  %s8693_s23 = smov 512  }
   0x4   :  { %s33_s22 = sshll.u32 %s8692_s21, 4  ;;  %s8694_s24 = smov 32   ;;  %s34_s22 = int_to_ptr.vmem [resolvable:$true] %s33_s22 }
   0x5   :  { %39 = dma.hbm_to_vmem [thread:$0]  %s32_s20, 65536, %s34_s22, [#allocation6], %s8693_s23, %s8693_s23, %s8694_s24  }
   0x6   :  { %s55_s27 = sshll.u32 %s9136_s3, 4  ;;  %s8695_s28 = smov [#allocation8]   ;;  %s56_s27 = int_to_ptr.hbm [resolvable:$true] %s55_s27 }
   0x7   :  { %s57_s29 = sshll.u32 %s8695_s28, 4  ;;  %s8696_s30 = smov 64   ;;  %s58_s29 = int_to_ptr.vmem [resolvable:$true] %s57_s29 }
   0x8   :  { %s8697_s6 = smov 4   ;;  %s18_s8 = sshll.u32 %s9133_s0, 4  ;;  %s19_s8 = int_to_ptr.hbm [resolvable:$true] %s18_s8 }
   0x9   :  { %63 = dma.hbm_to_vmem [thread:$0]  %s56_s27, 8192, %s58_s29, [#allocation9], %s8696_s30, %s8696_s30, %s8697_s6  }
   0xa   :  { %s8698_s9 = smov [#allocation2]   ;;  %s8699_s11 = smov 1024  }
   0xb   :  { %s20_s10 = sshll.u32 %s8698_s9, 4  ;;  %s45_s3 = sshll.u32 %s9135_s2, 4  ;;  %s21_s10 = int_to_ptr.vmem [resolvable:$true] %s20_s10  ;;  %s46_s3 = int_to_ptr.hbm [resolvable:$true] %s45_s3 }
   0xc   :  { %26 = dma.hbm_to_vmem [thread:$0]  %s19_s8, 16384, %s21_s10, [#allocation3], %s8699_s11, %s8699_s11, %s8696_s30  }
   0xd   :  { %s8700_s14 = smov [#allocation7]   ;;  %s69_s18 = sshll.u32 %s9137_s4, 4  ;;  %s70_s18 = int_to_ptr.hbm [resolvable:$true] %s69_s18 }
   0xe   :  { %s47_s15 = sshll.u32 %s8700_s14, 4  ;;  %s8701_s0 = smov [#allocation10]   ;;  %s48_s15 = int_to_ptr.vmem [resolvable:$true] %s47_s15 }
   0xf   :  { %50 = dma.hbm_to_vmem [thread:$0]  %s46_s3, 128, %s48_s15, [#allocation6]  }
  0x10   :  { %s71_s19 = sshll.u32 %s8701_s0, 4  ;;  %s72_s19 = int_to_ptr.vmem [resolvable:$true] %s71_s19 }
  0x11   :  { %74 = dma.hbm_to_vmem [thread:$0]  %s70_s18, 16, %s72_s19, [#allocation9]  }
  0x12   :  { %8684 = dma.done.wait [#allocation3], 16384  }
  0x13   :  { %8685 = vsyncadd [#allocation3], 4294950912 }
  0x14   :  { %8686 = dma.done.wait [#allocation6], 65664  }
  0x15   :  { %8687 = vsyncadd [#allocation6], 4294901632 }
  0x16   :  { %8688 = dma.done.wait [#allocation9], 8208  }
  0x17   :  { %8689 = vsyncadd [#allocation9], 4294959088  ;;  %v5867_v0 = vld [vmem:[#allocation5 + $0x1c0] sm:$0xf]  ;;  %vm1457_vm0 = vcmask 1041409   ;;  %vm1459_vm1 = vcmask 1042434  }
  0x18   :  { %v8005_v1 = vld [vmem:[#allocation5 + $0x1dc] sm:$0xf0]  ;;  %vm1461_vm2 = vcmask 1043459   ;;  %vm1463_vm3 = vcmask 1044484   ;;  %vm1465_vm4 = vcmask 1045509   ;;  %vm1467_vm5 = vcmask 1046534  }
  0x19   :  { %v6123_v2 = vld [vmem:[#allocation5 + $0x3c0] sm:$0xf]  ;;  %v5868_v3 = vor.u32 %v8005_v1, %v5867_v0  ;;  %vm1469_vm6 = vcmask 1047559   ;;  %s8703_s2 = smov [#allocation11]   ;;  %s5629_s22 = sshll.u32 %s9138_s5, 4  ;;  %s5630_s22 = int_to_ptr.hbm [resolvable:$true] %s5629_s22 }
  0x1a   :  { %v8069_v4 = vld [vmem:[#allocation5 + $0x3dc] sm:$0xf0]  ;;  %s5627_s4 = sshll.u32 %s8703_s2, 4  ;;  %s5628_s4 = int_to_ptr.vmem [resolvable:$true] %s5627_s4 }
  0x1b   :  { %v6379_v5 = vld [vmem:[#allocation5 + $0x5c0] sm:$0xf]  ;;  %v6124_v7 = vor.u32 %v8069_v4, %v6123_v2  ;;  %4096 = vmatpush.bf16.msra.mxu0 %v5868_v3 }
  0x1c   :  { %v8133_v6 = vld [vmem:[#allocation5 + $0x5dc] sm:$0xf0] }
  0x1d   :  { %v6380_v8 = vor.u32 %v8133_v6, %v6379_v5  ;;  %v6635_v9 = vld [vmem:[#allocation5 + $0x7c0] sm:$0xf]  ;;  %4109 = vmatpush.bf16.msra.mxu1 %v6124_v7 }
  0x1e   :  { %v8197_v10 = vld [vmem:[#allocation5 + $0x7dc] sm:$0xf0] }
  0x1f   :  { %v5835_v11 = vld [vmem:[#allocation5 + $0x180] sm:$0xf]  ;;  %v6636_v12 = vor.u32 %v8197_v10, %v6635_v9  ;;  %4122 = vmatpush.bf16.msra.mxu2 %v6380_v8 }
  0x20   :  { %v7997_v13 = vld [vmem:[#allocation5 + $0x19c] sm:$0xf0] }
  0x21   :  { %v6091_v14 = vld [vmem:[#allocation5 + $0x380] sm:$0xf]  ;;  %v5836_v16 = vor.u32 %v7997_v13, %v5835_v11  ;;  %4135 = vmatpush.bf16.msra.mxu3 %v6636_v12 }
  0x22   :  { %v8061_v15 = vld [vmem:[#allocation5 + $0x39c] sm:$0xf0] }
  0x23   :  { %v6092_v17 = vor.u32 %v8061_v15, %v6091_v14  ;;  %v6347_v18 = vld [vmem:[#allocation5 + $0x580] sm:$0xf]  ;;  %4097 = vmatpush.bf16.msra.mxu0 %v5836_v16 }
  0x24   :  { %v8125_v19 = vld [vmem:[#allocation5 + $0x59c] sm:$0xf0] }
  0x25   :  { %v6603_v20 = vld [vmem:[#allocation5 + $0x780] sm:$0xf]  ;;  %v6348_v21 = vor.u32 %v8125_v19, %v6347_v18  ;;  %4110 = vmatpush.bf16.msra.mxu1 %v6092_v17 }
  0x26   :  { %v8189_v22 = vld [vmem:[#allocation5 + $0x79c] sm:$0xf0] }
  0x27   :  { %v5803_v23 = vld [vmem:[#allocation5 + $0x140] sm:$0xf]  ;;  %v6604_v25 = vor.u32 %v8189_v22, %v6603_v20  ;;  %4123 = vmatpush.bf16.msra.mxu2 %v6348_v21 }
  0x28   :  { %v7989_v24 = vld [vmem:[#allocation5 + $0x15c] sm:$0xf0] }
  0x29   :  { %v6059_v26 = vld [vmem:[#allocation5 + $0x340] sm:$0xf]  ;;  %v5804_v29 = vor.u32 %v7989_v24, %v5803_v23  ;;  %4136 = vmatpush.bf16.msra.mxu3 %v6604_v25 }
  0x2a   :  { %v8053_v27 = vld [vmem:[#allocation5 + $0x35c] sm:$0xf0] }
  0x2b   :  { %v6315_v28 = vld [vmem:[#allocation5 + $0x540] sm:$0xf]  ;;  %v6060_v33 = vor.u32 %v8053_v27, %v6059_v26  ;;  %4098 = vmatpush.bf16.msra.mxu0 %v5804_v29 }
  0x2c   :  { %v8117_v30 = vld [vmem:[#allocation5 + $0x55c] sm:$0xf0] }
  0x2d   :  { %v6571_v31 = vld [vmem:[#allocation5 + $0x740] sm:$0xf]  ;;  %v6316_v34 = vor.u32 %v8117_v30, %v6315_v28  ;;  %4111 = vmatpush.bf16.msra.mxu1 %v6060_v33 }
  0x2e   :  { %v8181_v32 = vld [vmem:[#allocation5 + $0x75c] sm:$0xf0] }
  0x2f   :  { %v5771_v35 = vld [vmem:[#allocation5 + $0x100] sm:$0xf]  ;;  %v6572_v38 = vor.u32 %v8181_v32, %v6571_v31  ;;  %4124 = vmatpush.bf16.msra.mxu2 %v6316_v34 }
  0x30   :  { %v7981_v36 = vld [vmem:[#allocation5 + $0x11c] sm:$0xf0] }
  0x31   :  { %v6027_v37 = vld [vmem:[#allocation5 + $0x300] sm:$0xf]  ;;  %v5772_v44 = vor.u32 %v7981_v36, %v5771_v35  ;;  %4137 = vmatpush.bf16.msra.mxu3 %v6572_v38 }
  0x32   :  { %v8045_v39 = vld [vmem:[#allocation5 + $0x31c] sm:$0xf0] }
  0x33   :  { %v6283_v40 = vld [vmem:[#allocation5 + $0x500] sm:$0xf]  ;;  %v6028_v45 = vor.u32 %v8045_v39, %v6027_v37  ;;  %4099 = vmatpush.bf16.msra.mxu0 %v5772_v44 }
  0x34   :  { %v8109_v41 = vld [vmem:[#allocation5 + $0x51c] sm:$0xf0] }
  0x35   :  { %v6539_v42 = vld [vmem:[#allocation5 + $0x700] sm:$0xf]  ;;  %v6284_v46 = vor.u32 %v8109_v41, %v6283_v40  ;;  %4112 = vmatpush.bf16.msra.mxu1 %v6028_v45 }
  0x36   :  { %v8173_v43 = vld [vmem:[#allocation5 + $0x71c] sm:$0xf0] }
  0x37   :  { %v5739_v47 = vld [vmem:[#allocation5 + $0xc0] sm:$0xf]  ;;  %v6540_v50 = vor.u32 %v8173_v43, %v6539_v42  ;;  %4125 = vmatpush.bf16.msra.mxu2 %v6284_v46 }
  0x38   :  { %v7973_v48 = vld [vmem:[#allocation5 + $0xdc] sm:$0xf0] }
  0x39   :  { %v5995_v49 = vld [vmem:[#allocation5 + $0x2c0] sm:$0xf]  ;;  %v5740_v56 = vor.u32 %v7973_v48, %v5739_v47  ;;  %4138 = vmatpush.bf16.msra.mxu3 %v6540_v50 }
  0x3a   :  { %v8037_v51 = vld [vmem:[#allocation5 + $0x2dc] sm:$0xf0] }
  0x3b   :  { %v6251_v52 = vld [vmem:[#allocation5 + $0x4c0] sm:$0xf]  ;;  %v5996_v57 = vor.u32 %v8037_v51, %v5995_v49  ;;  %4100 = vmatpush.bf16.msra.mxu0 %v5740_v56 }
  0x3c   :  { %v8101_v53 = vld [vmem:[#allocation5 + $0x4dc] sm:$0xf0] }
  0x3d   :  { %v6507_v54 = vld [vmem:[#allocation5 + $0x6c0] sm:$0xf]  ;;  %v6252_v58 = vor.u32 %v8101_v53, %v6251_v52  ;;  %4113 = vmatpush.bf16.msra.mxu1 %v5996_v57 }
  0x3e   :  { %v8165_v55 = vld [vmem:[#allocation5 + $0x6dc] sm:$0xf0] }
  0x3f   :  { %v5707_v59 = vld [vmem:[#allocation5 + $0x80] sm:$0xf]  ;;  %v6508_v62 = vor.u32 %v8165_v55, %v6507_v54  ;;  %4126 = vmatpush.bf16.msra.mxu2 %v6252_v58 }
  0x40   :  { %v7965_v60 = vld [vmem:[#allocation5 + $0x9c] sm:$0xf0] }
  0x41   :  { %v5963_v61 = vld [vmem:[#allocation5 + $0x280] sm:$0xf]  ;;  %v5708_v4 = vor.u32 %v7965_v60, %v5707_v59  ;;  %4139 = vmatpush.bf16.msra.mxu3 %v6508_v62 }
  0x42   :  { %v8029_v63 = vld [vmem:[#allocation5 + $0x29c] sm:$0xf0] }
  0x43   :  { %v6219_v0 = vld [vmem:[#allocation5 + $0x480] sm:$0xf]  ;;  %v5964_v5 = vor.u32 %v8029_v63, %v5963_v61  ;;  %4101 = vmatpush.bf16.msra.mxu0 %v5708_v4 }
  0x44   :  { %v8093_v1 = vld [vmem:[#allocation5 + $0x49c] sm:$0xf0] }
  0x45   :  { %v6475_v2 = vld [vmem:[#allocation5 + $0x680] sm:$0xf]  ;;  %v6220_v6 = vor.u32 %v8093_v1, %v6219_v0  ;;  %4114 = vmatpush.bf16.msra.mxu1 %v5964_v5 }
  0x46   :  { %v8157_v3 = vld [vmem:[#allocation5 + $0x69c] sm:$0xf0] }
  0x47   :  { %v5675_v7 = vld [vmem:[#allocation5 + $0x40] sm:$0xf]  ;;  %v6476_v10 = vor.u32 %v8157_v3, %v6475_v2  ;;  %4127 = vmatpush.bf16.msra.mxu2 %v6220_v6 }
  0x48   :  { %v7957_v8 = vld [vmem:[#allocation5 + $0x5c] sm:$0xf0] }
  0x49   :  { %v5931_v9 = vld [vmem:[#allocation5 + $0x240] sm:$0xf]  ;;  %v5676_v16 = vor.u32 %v7957_v8, %v5675_v7  ;;  %4140 = vmatpush.bf16.msra.mxu3 %v6476_v10 }
  0x4a   :  { %v8021_v11 = vld [vmem:[#allocation5 + $0x25c] sm:$0xf0] }
  0x4b   :  { %v6187_v12 = vld [vmem:[#allocation5 + $0x440] sm:$0xf]  ;;  %v5932_v20 = vor.u32 %v8021_v11, %v5931_v9  ;;  %4102 = vmatpush.bf16.msra.mxu0 %v5676_v16 }
  0x4c   :  { %v8085_v13 = vld [vmem:[#allocation5 + $0x45c] sm:$0xf0] }
  0x4d   :  { %v6443_v14 = vld [vmem:[#allocation5 + $0x640] sm:$0xf]  ;;  %v6188_v21 = vor.u32 %v8085_v13, %v6187_v12  ;;  %4115 = vmatpush.bf16.msra.mxu1 %v5932_v20 }
  0x4e   :  { %v8149_v15 = vld [vmem:[#allocation5 + $0x65c] sm:$0xf0] }
  0x4f   :  { %v5643_v17 = vld [vmem:[#allocation5] sm:$0xf]  ;;  %v6444_v25 = vor.u32 %v8149_v15, %v6443_v14  ;;  %4128 = vmatpush.bf16.msra.mxu2 %v6188_v21 }
  0x50   :  { %v7949_v18 = vld [vmem:[#allocation5 + $0x1c] sm:$0xf0] }
  0x51   :  { %v5899_v19 = vld [vmem:[#allocation5 + $0x200] sm:$0xf]  ;;  %v5644_v32 = vor.u32 %v7949_v18, %v5643_v17  ;;  %4141 = vmatpush.bf16.msra.mxu3 %v6444_v25 }
  0x52   :  { %v8013_v22 = vld [vmem:[#allocation5 + $0x21c] sm:$0xf0] }
  0x53   :  { %v6155_v23 = vld [vmem:[#allocation5 + $0x400] sm:$0xf]  ;;  %v5900_v36 = vor.u32 %v8013_v22, %v5899_v19  ;;  %4103 = vmatpush.bf16.msra.mxu0 %v5644_v32  ;;  %v97_v32 = vld [vmem:[#allocation2 + $0x10] sm:$0xff] }
  0x54   :  { %v8077_v24 = vld [vmem:[#allocation5 + $0x41c] sm:$0xf0] }
  0x55   :  { %v6411_v26 = vld [vmem:[#allocation5 + $0x600] sm:$0xf]  ;;  %v6156_v37 = vor.u32 %v8077_v24, %v6155_v23  ;;  %4116 = vmatpush.bf16.msra.mxu1 %v5900_v36  ;;  %v113_v36 = vld [vmem:[#allocation2 + $0x90] sm:$0xff] }
  0x56   :  { %v8141_v27 = vld [vmem:[#allocation5 + $0x61c] sm:$0xf0] }
  0x57   :  { %v6891_v28 = vld [vmem:[#allocation5 + $0x9c0] sm:$0xf]  ;;  %v6412_v41 = vor.u32 %v8141_v27, %v6411_v26  ;;  %4129 = vmatpush.bf16.msra.mxu2 %v6156_v37  ;;  %v121_v37 = vld [vmem:[#allocation2 + $0xd0] sm:$0xff] }
  0x58   :  { %v8261_v29 = vld [vmem:[#allocation5 + $0x9dc] sm:$0xf0] }
  0x59   :  { %v7147_v30 = vld [vmem:[#allocation5 + $0xbc0] sm:$0xf]  ;;  %v6892_v42 = vor.u32 %v8261_v29, %v6891_v28  ;;  %4142 = vmatpush.bf16.msra.mxu3 %v6412_v41 }
  0x5a   :  { %v8325_v31 = vld [vmem:[#allocation5 + $0xbdc] sm:$0xf0] }
  0x5b   :  { %v7403_v33 = vld [vmem:[#allocation5 + $0xdc0] sm:$0xf]  ;;  %v7148_v46 = vor.u32 %v8325_v31, %v7147_v30  ;;  %4148 = vmatpush.bf16.msrb.mxu0 %v6892_v42 }
  0x5c   :  { %v8389_v34 = vld [vmem:[#allocation5 + $0xddc] sm:$0xf0] }
  0x5d   :  { %v7659_v35 = vld [vmem:[#allocation5 + $0xfc0] sm:$0xf]  ;;  %v7404_v47 = vor.u32 %v8389_v34, %v7403_v33  ;;  %4161 = vmatpush.bf16.msrb.mxu1 %v7148_v46  ;;  %v105_v33 = vld [vmem:[#allocation2 + $0x50] sm:$0xff]  ;;  %v293_v46 = vadd.f32 %v121_v37, %v113_v36 }
  0x5e   :  { %v8453_v38 = vld [vmem:[#allocation5 + $0xfdc] sm:$0xf0] }
  0x5f   :  { %v6859_v39 = vld [vmem:[#allocation5 + $0x980] sm:$0xf]  ;;  %v7660_v51 = vor.u32 %v8453_v38, %v7659_v35  ;;  %4174 = vmatpush.bf16.msrb.mxu2 %v7404_v47  ;;  %v129_v38 = vld [vmem:[#allocation2 + $0x110] sm:$0xff] }
  0x60   :  { %v8253_v40 = vld [vmem:[#allocation5 + $0x99c] sm:$0xf0] }
  0x61   :  { %v8749_v43 = vld [vmem:[#allocation5 + $0xb80] sm:$0xf]  ;;  %v6860_v4 = vor.u32 %v8253_v40, %v6859_v39  ;;  %4187 = vmatpush.bf16.msrb.mxu3 %v7660_v51  ;;  %v237_v39 = vadd.f32 %v105_v33, %v97_v32 }
  0x62   :  { %v8751_v44 = vld [vmem:[#allocation5 + $0xb9c] sm:$0xf0] }
  0x63   :  { %v8753_v45 = vld [vmem:[#allocation5 + $0xd80] sm:$0xf]  ;;  %v7116_v9 = vor.u32 %v8751_v44, %v8749_v43  ;;  %4149 = vmatpush.bf16.msrb.mxu0 %v6860_v4  ;;  %v137_v43 = vld [vmem:[#allocation2 + $0x150] sm:$0xff]  ;;  %v238_v51 = vrot.slane %v237_v39, 4 }
  0x64   :  { %v8381_v48 = vld [vmem:[#allocation5 + $0xd9c] sm:$0xf0]  ;;  %v145_v44 = vld [vmem:[#allocation2 + $0x190] sm:$0xff] }
  0x65   :  { %v8755_v49 = vld [vmem:[#allocation5 + $0xf80] sm:$0xf]  ;;  %v7372_v10 = vor.u32 %v8381_v48, %v8753_v45  ;;  %4162 = vmatpush.bf16.msrb.mxu1 %v7116_v9  ;;  %v153_v45 = vld [vmem:[#allocation2 + $0x1d0] sm:$0xff] }
  0x66   :  { %v8757_v50 = vld [vmem:[#allocation5 + $0xf9c] sm:$0xf0]  ;;  %v161_v48 = vld [vmem:[#allocation2 + $0x210] sm:$0xff] }
  0x67   :  { %v8759_v52 = vld [vmem:[#allocation5 + $0x940] sm:$0xf]  ;;  %v7628_v16 = vor.u32 %v8757_v50, %v8755_v49  ;;  %4175 = vmatpush.bf16.msrb.mxu2 %v7372_v10  ;;  %v169_v49 = vld [vmem:[#allocation2 + $0x250] sm:$0xff] }
  0x68   :  { %v8761_v53 = vld [vmem:[#allocation5 + $0x95c] sm:$0xf0]  ;;  %v177_v50 = vld [vmem:[#allocation2 + $0x290] sm:$0xff] }
  0x69   :  { %v8763_v54 = vld [vmem:[#allocation5 + $0xb40] sm:$0xf]  ;;  %v6828_v20 = vor.u32 %v8761_v53, %v8759_v52  ;;  %4188 = vmatpush.bf16.msrb.mxu3 %v7628_v16  ;;  %v349_v52 = vadd.f32 %v137_v43, %v129_v38  ;;  %v405_v53 = vadd.f32 %v153_v45, %v145_v44 }
  0x6a   :  { %v8765_v55 = vld [vmem:[#allocation5 + $0xb5c] sm:$0xf0] }
  0x6b   :  { %v8767_v56 = vld [vmem:[#allocation5 + $0xd40] sm:$0xf]  ;;  %v7084_v21 = vor.u32 %v8765_v55, %v8763_v54  ;;  %4150 = vmatpush.bf16.msrb.mxu0 %v6828_v20 }
  0x6c   :  { %v8769_v57 = vld [vmem:[#allocation5 + $0xd5c] sm:$0xf0] }
  0x6d   :  { %v8771_v58 = vld [vmem:[#allocation5 + $0xf40] sm:$0xf]  ;;  %v7340_v22 = vor.u32 %v8769_v57, %v8767_v56  ;;  %v185_v56 = vld [vmem:[#allocation2 + $0x2d0] sm:$0xff]  ;;  %4163 = vmatpush.bf16.msrb.mxu1 %v7084_v21 }
  0x6e   :  { %v8773_v59 = vld [vmem:[#allocation5 + $0xf5c] sm:$0xf0]  ;;  %v193_v57 = vld [vmem:[#allocation2 + $0x310] sm:$0xff]  ;;  %v517_v4 = vadd.f32 %v185_v56, %v177_v50 }
  0x6f   :  { %v8775_v60 = vld [vmem:[#allocation5 + $0x900] sm:$0xf]  ;;  %v7596_v23 = vor.u32 %v8773_v59, %v8771_v58  ;;  %v201_v58 = vld [vmem:[#allocation2 + $0x350] sm:$0xff]  ;;  %v294_v59 = vrot.slane %v293_v46, 4  ;;  %4176 = vmatpush.bf16.msrb.mxu2 %v7340_v22 }
  0x70   :  { %v8777_v61 = vld [vmem:[#allocation5 + $0x91c] sm:$0xf0]  ;;  %v573_v16 = vadd.f32 %v201_v58, %v193_v57  ;;  %v518_v37 = vrot.slane %v517_v4, 4 }
  0x71   :  { %v8779_v62 = vld [vmem:[#allocation5 + $0xb00] sm:$0xf]  ;;  %v6796_v27 = vor.u32 %v8777_v61, %v8775_v60  ;;  %v461_v60 = vadd.f32 %v169_v49, %v161_v48  ;;  %v209_v61 = vld [vmem:[#allocation2 + $0x390] sm:$0xff]  ;;  %4189 = vmatpush.bf16.msrb.mxu3 %v7596_v23  ;;  %v295_v9 = vadd.f32 %v294_v59, %v293_v46 }
  0x72   :  { %v8781_v63 = vld [vmem:[#allocation5 + $0xb1c] sm:$0xf0]  ;;  %v574_v21 = vrot.slane %v573_v16, 4  ;;  %v519_v48 = vadd.f32 %v518_v37, %v517_v4 }
  0x73   :  { %v8783_v0 = vld [vmem:[#allocation5 + $0xd00] sm:$0xf]  ;;  %v7052_v28 = vor.u32 %v8781_v63, %v8779_v62  ;;  %v217_v62 = vld [vmem:[#allocation2 + $0x3d0] sm:$0xff]  ;;  %v239_v63 = vadd.f32 %v238_v51, %v237_v39  ;;  %v462_v10 = vrot.slane %v461_v60, 4  ;;  %4151 = vmatpush.bf16.msrb.mxu0 %v6796_v27  ;;  %v296_v38 = vrot.slane %v295_v9, 2 }
  0x74   :  { %v8785_v1 = vld [vmem:[#allocation5 + $0xd1c] sm:$0xf0]  ;;  %v629_v20 = vadd.f32 %v217_v62, %v209_v61  ;;  %v575_v49 = vadd.f32 %v574_v21, %v573_v16 }
  0x75   :  { %v8787_v2 = vld [vmem:[#allocation5 + $0xf00] sm:$0xf]  ;;  %v7308_v29 = vor.u32 %v8785_v1, %v8783_v0  ;;  %v350_v0 = vrot.slane %v349_v52, 4  ;;  %v406_v1 = vrot.slane %v405_v53, 4  ;;  %v240_v32 = vrot.slane %v239_v63, 2  ;;  %4164 = vmatpush.bf16.msrb.mxu1 %v7052_v28 }
  0x76   :  { %v8789_v3 = vld [vmem:[#allocation5 + $0xf1c] sm:$0xf0]  ;;  %v463_v43 = vadd.f32 %v462_v10, %v461_v60  ;;  %v630_v22 = vrot.slane %v629_v20, 4  ;;  %v297_v23 = vadd.f32 %v296_v38, %v295_v9  ;;  %v576_v56 = vrot.slane %v575_v49, 2 }
  0x77   :  { %v8791_v5 = vld [vmem:[#allocation5 + $0x8c0] sm:$0xf]  ;;  %v7564_v30 = vor.u32 %v8789_v3, %v8787_v2  ;;  %v351_v33 = vadd.f32 %v350_v0, %v349_v52  ;;  %v407_v36 = vadd.f32 %v406_v1, %v405_v53  ;;  %4177 = vmatpush.bf16.msrb.mxu2 %v7308_v29  ;;  %v241_v39 = vadd.f32 %v240_v32, %v239_v63 }
  0x78   :  { %v8793_v6 = vld [vmem:[#allocation5 + $0x8dc] sm:$0xf0]  ;;  %v464_v46 = vrot.slane %v463_v43, 2  ;;  %v631_v50 = vadd.f32 %v630_v22, %v629_v20  ;;  %v520_v53 = vrot.slane %v519_v48, 2  ;;  %v298_v28 = vrot.slane %v297_v23, 1 }
  0x79   :  { %v8795_v7 = vld [vmem:[#allocation5 + $0xac0] sm:$0xf]  ;;  %v6764_v34 = vor.u32 %v8793_v6, %v8791_v5  ;;  %v352_v44 = vrot.slane %v351_v33, 2  ;;  %v408_v45 = vrot.slane %v407_v36, 2  ;;  %4190 = vmatpush.bf16.msrb.mxu3 %v7564_v30  ;;  %v242_v51 = vrot.slane %v241_v39, 1 }
  0x7a   :  { %v8797_v8 = vld [vmem:[#allocation5 + $0xadc] sm:$0xf0]  ;;  %v465_v29 = vadd.f32 %v464_v46, %v463_v43  ;;  %v632_v57 = vrot.slane %v631_v50, 2  ;;  %v521_v58 = vadd.f32 %v520_v53, %v519_v48  ;;  %v299_v5 = vadd.f32 %v298_v28, %v297_v23 }
  0x7b   :  { %v8802_v11 = vld [vmem:[#allocation5 + $0xcc0] sm:$0xf]  ;;  %v7020_v35 = vor.u32 %v8797_v8, %v8795_v7  ;;  %v353_v27 = vadd.f32 %v352_v44, %v351_v33  ;;  %v409_v52 = vadd.f32 %v408_v45, %v407_v36  ;;  %4152 = vmatpush.bf16.msrb.mxu0 %v6764_v34  ;;  %v243_v2 = vadd.f32 %v242_v51, %v241_v39 }
  0x7c   :  { %v8804_v12 = vld [vmem:[#allocation5 + $0xcdc] sm:$0xf0]  ;;  %v466_v6 = vrot.slane %v465_v29, 1  ;;  %v577_v34 = vadd.f32 %v576_v56, %v575_v49  ;;  %v633_v59 = vadd.f32 %v632_v57, %v631_v50  ;;  %v681_v61 = vmul.f32 0.0625, %v299_v5 }
  0x7d   :  { %v8806_v13 = vld [vmem:[#allocation5 + $0xec0] sm:$0xf]  ;;  %v7276_v40 = vor.u32 %v8804_v12, %v8802_v11  ;;  %4165 = vmatpush.bf16.msrb.mxu1 %v7020_v35  ;;  %v354_v3 = vrot.slane %v353_v27, 1  ;;  %v410_v30 = vrot.slane %v409_v52, 1  ;;  %v522_v35 = vrot.slane %v521_v58, 1 }
  0x7e   :  { %v8808_v14 = vld [vmem:[#allocation5 + $0xedc] sm:$0xf0]  ;;  %v673_v60 = vmul.f32 0.0625, %v243_v2  ;;  %v467_v11 = vadd.f32 %v466_v6, %v465_v29  ;;  %v578_v12 = vrot.slane %v577_v34, 1  ;;  %v745_v63 = vpack.c.bf16 %v681_v61, %v681_v61 }
  0x7f   :  { %v8810_v15 = vld [vmem:[#allocation5 + $0x880] sm:$0xf]  ;;  %v7532_v41 = vor.u32 %v8808_v14, %v8806_v13  ;;  %4178 = vmatpush.bf16.msrb.mxu2 %v7276_v40  ;;  %v355_v7 = vadd.f32 %v354_v3, %v353_v27  ;;  %v411_v8 = vadd.f32 %v410_v30, %v409_v52  ;;  %v634_v40 = vrot.slane %v633_v59, 1 }
  0x80   :  { %v8814_v17 = vld [vmem:[#allocation5 + $0x89c] sm:$0xf0]  ;;  %v523_v13 = vadd.f32 %v522_v35, %v521_v58  ;;  %v737_v62 = vpack.c.bf16 %v673_v60, %v673_v60  ;;  %v1403_v9 = vunpack.c.l.b16 %v745_v63 }
  0x81   :  { %v8816_v18 = vld [vmem:[#allocation5 + $0xa80] sm:$0xf]  ;;  %v6732_v42 = vor.u32 %v8814_v17, %v8810_v15  ;;  %4191 = vmatpush.bf16.msrb.mxu3 %v7532_v41  ;;  %v689_v14 = vmul.f32 0.0625, %v355_v7  ;;  %v697_v41 = vmul.f32 0.0625, %v411_v8  ;;  %v579_v15 = vadd.f32 %v578_v12, %v577_v34 }
  0x82   :  { %v8818_v19 = vld [vmem:[#allocation5 + $0xa9c] sm:$0xf0]  ;;  %v635_v17 = vadd.f32 %v634_v40, %v633_v59 }
  0x83   :  { %v8828_v24 = vld [vmem:[#allocation5 + $0xc80] sm:$0xf]  ;;  %v6988_v47 = vor.u32 %v8818_v19, %v8816_v18  ;;  %4153 = vmatpush.bf16.msrb.mxu0 %v6732_v42  ;;  %v705_v42 = vmul.f32 0.0625, %v467_v11  ;;  %v713_v19 = vmul.f32 0.0625, %v523_v13  ;;  %v761_v1 = vpack.c.bf16 %v697_v41, %v697_v41 }
  0x84   :  { %v8830_v25 = vld [vmem:[#allocation5 + $0xc9c] sm:$0xf0] }
  0x85   :  { %v8832_v26 = vld [vmem:[#allocation5 + $0xe80] sm:$0xf]  ;;  %v7244_v54 = vor.u32 %v8830_v25, %v8828_v24  ;;  %4166 = vmatpush.bf16.msrb.mxu1 %v6988_v47  ;;  %v753_v47 = vpack.c.bf16 %v689_v14, %v689_v14  ;;  %v1395_v24 = vunpack.c.l.b16 %v737_v62  ;;  %v721_v25 = vmul.f32 0.0625, %v579_v15 }
  0x86   :  { %v8842_v31 = vld [vmem:[#allocation5 + $0xe9c] sm:$0xf0]  ;;  %v769_v4 = vpack.c.bf16 %v705_v42, %v705_v42  ;;  %v777_v20 = vpack.c.bf16 %v713_v19, %v713_v19 }
  0x87   :  { %v7500_v55 = vor.u32 %v8842_v31, %v8832_v26  ;;  %4179 = vmatpush.bf16.msrb.mxu2 %v7244_v54  ;;  %v95_v0 = vld [vmem:[#allocation2] sm:$0xff]  ;;  %v729_v54 = vmul.f32 0.0625, %v635_v17  ;;  %v1411_v32 = vunpack.c.l.b16 %v753_v47  ;;  %v1419_v26 = vunpack.c.l.b16 %v761_v1 }
  0x88   :  { %v103_v18 = vld [vmem:[#allocation2 + $0x40] sm:$0xff]  ;;  %v785_v36 = vpack.c.bf16 %v721_v25, %v721_v25  ;;  %v1427_v38 = vunpack.c.l.b16 %v769_v4  ;;  %v1478_v43 = vsel %vm1457_vm0, %v1403_v9, %v1395_v24  ;;  %v1435_v44 = vunpack.c.l.b16 %v777_v20 }
  0x89   :  { %4192 = vmatpush.bf16.msrb.mxu3 %v7500_v55  ;;  %v111_v10 = vld [vmem:[#allocation2 + $0x80] sm:$0xff]  ;;  %v223_v33 = vadd.f32 %v103_v18, %v95_v0  ;;  %v793_v37 = vpack.c.bf16 %v729_v54, %v729_v54  ;;  %v1479_v45 = vsel %vm1459_vm1, %v1411_v32, %v1478_v43 }
  0x8a   :  { %v119_v16 = vld [vmem:[#allocation2 + $0xc0] sm:$0xff]  ;;  %v1443_v51 = vunpack.c.l.b16 %v785_v36  ;;  %v1480_v52 = vsel %vm1461_vm2, %v1419_v26, %v1479_v45 }
  0x8b   :  { %v127_v31 = vld [vmem:[#allocation2 + $0x100] sm:$0xff]  ;;  %v224_v49 = vrot.slane %v223_v33, 4  ;;  %v279_v50 = vadd.f32 %v119_v16, %v111_v10  ;;  %v1451_v27 = vunpack.c.l.b16 %v793_v37  ;;  %v1481_v28 = vsel %vm1463_vm3, %v1427_v38, %v1480_v52 }
  0x8c   :  { %v135_v55 = vld [vmem:[#allocation2 + $0x140] sm:$0xff]  ;;  %v1482_v2 = vsel %vm1465_vm4, %v1435_v44, %v1481_v28 }
  0x8d   :  { %v143_v21 = vld [vmem:[#allocation2 + $0x180] sm:$0xff]  ;;  %v335_v53 = vadd.f32 %v135_v55, %v127_v31  ;;  %v225_v29 = vadd.f32 %v224_v49, %v223_v33  ;;  %v280_v56 = vrot.slane %v279_v50, 4  ;;  %v1483_v5 = vsel %vm1467_vm5, %v1443_v51, %v1482_v2  ;;  %v98_v51 = vld [vmem:[#allocation2 + $0x18] sm:$0xff] }
  0x8e   :  { %v151_v22 = vld [vmem:[#allocation2 + $0x1c0] sm:$0xff]  ;;  %v1484_v35 = vsel %vm1469_vm6, %v1451_v27, %v1483_v5  ;;  %v106_v27 = vld [vmem:[#allocation2 + $0x58] sm:$0xff] }
  0x8f   :  { %v159_v39 = vld [vmem:[#allocation2 + $0x200] sm:$0xff]  ;;  %v391_v57 = vadd.f32 %v151_v22, %v143_v21  ;;  %v336_v3 = vrot.slane %v335_v53, 4  ;;  %v226_v59 = vrot.slane %v225_v29, 2  ;;  %v281_v7 = vadd.f32 %v280_v56, %v279_v50 }
  0x90   :  { %v167_v48 = vld [vmem:[#allocation2 + $0x240] sm:$0xff]  ;;  %v8894_v13 = vpack.c.b16 %v1484_v35, %v1484_v35  ;;  %v114_v35 = vld [vmem:[#allocation2 + $0x98] sm:$0xff] }
  0x91   :  { %v175_v23 = vld [vmem:[#allocation2 + $0x280] sm:$0xff]  ;;  %v447_v30 = vadd.f32 %v167_v48, %v159_v39  ;;  %v392_v8 = vrot.slane %v391_v57, 4  ;;  %v337_v12 = vadd.f32 %v336_v3, %v335_v53  ;;  %v227_v14 = vadd.f32 %v226_v59, %v225_v29 }
  0x92   :  { %v183_v46 = vld [vmem:[#allocation2 + $0x2c0] sm:$0xff]  ;;  %v282_v41 = vrot.slane %v281_v7, 2  ;;  %4130 = vmatmul.bf16.vlgmr.msra.gmra.mxu2 %v8894_v13 }
  0x93   :  { %v503_v58 = vadd.f32 %v183_v46, %v175_v23  ;;  %v191_v6 = vld [vmem:[#allocation2 + $0x300] sm:$0xff]  ;;  %v448_v40 = vrot.slane %v447_v30, 4  ;;  %v393_v62 = vadd.f32 %v392_v8, %v391_v57  ;;  %v338_v15 = vrot.slane %v337_v12, 2 }
  0x94   :  { %v199_v34 = vld [vmem:[#allocation2 + $0x340] sm:$0xff]  ;;  %v228_v0 = vrot.slane %v227_v14, 1  ;;  %v283_v18 = vadd.f32 %v282_v41, %v281_v7  ;;  %v146_v41 = vld [vmem:[#allocation2 + $0x198] sm:$0xff] }
  0x95   :  { %v207_v60 = vld [vmem:[#allocation2 + $0x380] sm:$0xff]  ;;  %v504_v61 = vrot.slane %v503_v58, 4  ;;  %v449_v17 = vadd.f32 %v448_v40, %v447_v30  ;;  %v559_v63 = vadd.f32 %v199_v34, %v191_v6  ;;  %v394_v19 = vrot.slane %v393_v62, 2 }
  0x96   :  { %v215_v11 = vld [vmem:[#allocation2 + $0x3c0] sm:$0xff]  ;;  %v339_v1 = vadd.f32 %v338_v15, %v337_v12  ;;  %v229_v4 = vadd.f32 %v228_v0, %v227_v14  ;;  %v284_v9 = vrot.slane %v283_v18, 1  ;;  %v244_v6 = vadd.f32 %v106_v27, %v98_v51  ;;  %v138_v14 = vld [vmem:[#allocation2 + $0x158] sm:$0xff] }
  0x97   :  { %v505_v42 = vadd.f32 %v504_v61, %v503_v58  ;;  %v615_v47 = vadd.f32 %v215_v11, %v207_v60  ;;  %v450_v24 = vrot.slane %v449_v17, 2  ;;  %v560_v54 = vrot.slane %v559_v63, 4  ;;  %v122_v60 = vld [vmem:[#allocation2 + $0xd8] sm:$0xff] }
  0x98   :  { %v395_v10 = vadd.f32 %v394_v19, %v393_v62  ;;  %v340_v20 = vrot.slane %v339_v1, 1  ;;  %v285_v55 = vadd.f32 %v284_v9, %v283_v18  ;;  %v671_v37 = vmul.f32 0.0625, %v229_v4  ;;  %v130_v11 = vld [vmem:[#allocation2 + $0x118] sm:$0xff] }
  0x99   :  { %v506_v25 = vrot.slane %v505_v42, 2  ;;  %v616_v16 = vrot.slane %v615_v47, 4  ;;  %v451_v32 = vadd.f32 %v450_v24, %v449_v17  ;;  %v561_v31 = vadd.f32 %v560_v54, %v559_v63  ;;  %v154_v62 = vld [vmem:[#allocation2 + $0x1d8] sm:$0xff] }
  0x9a   :  { %v396_v33 = vrot.slane %v395_v10, 1  ;;  %v341_v38 = vadd.f32 %v340_v20, %v339_v1  ;;  %v679_v45 = vmul.f32 0.0625, %v285_v55  ;;  %v735_v48 = vpack.c.bf16 %v671_v37, %v671_v37  ;;  %v170_v1 = vld [vmem:[#allocation2 + $0x258] sm:$0xff] }
  0x9b   :  { %v507_v26 = vadd.f32 %v506_v25, %v505_v42  ;;  %v617_v36 = vadd.f32 %v616_v16, %v615_v47  ;;  %v452_v43 = vrot.slane %v451_v32, 1  ;;  %v562_v22 = vrot.slane %v561_v31, 2  ;;  %v162_v47 = vld [vmem:[#allocation2 + $0x218] sm:$0xff] }
  0x9c   :  { %v397_v39 = vadd.f32 %v396_v33, %v395_v10  ;;  %v687_v50 = vmul.f32 0.0625, %v341_v38  ;;  %v743_v28 = vpack.c.bf16 %v679_v45, %v679_v45  ;;  %v1393_v29 = vunpack.c.l.b16 %v735_v48  ;;  %v178_v9 = vld [vmem:[#allocation2 + $0x298] sm:$0xff] }
  0x9d   :  { %v508_v21 = vrot.slane %v507_v26, 1  ;;  %v618_v44 = vrot.slane %v617_v36, 2  ;;  %v453_v23 = vadd.f32 %v452_v43, %v451_v32  ;;  %v563_v49 = vadd.f32 %v562_v22, %v561_v31  ;;  %v186_v10 = vld [vmem:[#allocation2 + $0x2d8] sm:$0xff] }
  0x9e   :  { %v695_v53 = vmul.f32 0.0625, %v397_v39  ;;  %v751_v3 = vpack.c.bf16 %v687_v50, %v687_v50  ;;  %v1401_v5 = vunpack.c.l.b16 %v743_v28  ;;  %v245_v15 = vrot.slane %v244_v6, 4  ;;  %v194_v45 = vld [vmem:[#allocation2 + $0x318] sm:$0xff] }
  0x9f   :  { %v509_v46 = vadd.f32 %v508_v21, %v507_v26  ;;  %v619_v52 = vadd.f32 %v618_v44, %v617_v36  ;;  %v564_v56 = vrot.slane %v563_v49, 1  ;;  %v703_v57 = vmul.f32 0.0625, %v453_v23  ;;  %v202_v48 = vld [vmem:[#allocation2 + $0x358] sm:$0xff] }
  0xa0   :  { %v759_v58 = vpack.c.bf16 %v695_v53, %v695_v53  ;;  %v1409_v8 = vunpack.c.l.b16 %v751_v3  ;;  %v1458_v61 = vsel %vm1457_vm0, %v1401_v5, %v1393_v29  ;;  %v246_v24 = vadd.f32 %v245_v15, %v244_v6  ;;  %v210_v51 = vld [vmem:[#allocation2 + $0x398] sm:$0xff] }
  0xa1   :  { %v711_v2 = vmul.f32 0.0625, %v509_v46  ;;  %v620_v30 = vrot.slane %v619_v52, 1  ;;  %v565_v34 = vadd.f32 %v564_v56, %v563_v49  ;;  %v767_v59 = vpack.c.bf16 %v703_v57, %v703_v57  ;;  %v218_v27 = vld [vmem:[#allocation2 + $0x3d8] sm:$0xff] }
  0xa2   :  { %v1417_v40 = vunpack.c.l.b16 %v759_v58  ;;  %v1460_v0 = vsel %vm1459_vm1, %v1409_v8, %v1458_v61  ;;  %v300_v25 = vadd.f32 %v122_v60, %v114_v35  ;;  %v356_v16 = vadd.f32 %v138_v14, %v130_v11 }
  0xa3   :  { %v775_v7 = vpack.c.bf16 %v711_v2, %v711_v2  ;;  %v621_v12 = vadd.f32 %v620_v30, %v619_v52  ;;  %v719_v17 = vmul.f32 0.0625, %v565_v34  ;;  %v1425_v42 = vunpack.c.l.b16 %v767_v59 }
  0xa4   :  { %v1462_v19 = vsel %vm1461_vm2, %v1417_v40, %v1460_v0  ;;  %v412_v20 = vadd.f32 %v154_v62, %v146_v41  ;;  %v247_v31 = vrot.slane %v246_v24, 2  ;;  %v301_v55 = vrot.slane %v300_v25, 4 }
  0xa5   :  { %v1433_v63 = vunpack.c.l.b16 %v775_v7  ;;  %v727_v18 = vmul.f32 0.0625, %v621_v12  ;;  %v783_v54 = vpack.c.bf16 %v719_v17, %v719_v17  ;;  %v1464_v4 = vsel %vm1463_vm3, %v1425_v42, %v1462_v19  ;;  %v6699_v19 = vld [vmem:[#allocation5 + $0x840] sm:$0xf] }
  0xa6   :  { %v357_v36 = vrot.slane %v356_v16, 4  ;;  %v413_v37 = vrot.slane %v412_v20, 4  ;;  %v468_v38 = vadd.f32 %v170_v1, %v162_v47  ;;  %v248_v21 = vadd.f32 %v247_v31, %v246_v24  ;;  %v8213_v47 = vld [vmem:[#allocation5 + $0x85c] sm:$0xf0] }
  0xa7   :  { %v791_v32 = vpack.c.bf16 %v727_v18, %v727_v18  ;;  %v1466_v26 = vsel %vm1465_vm4, %v1433_v63, %v1464_v4  ;;  %v1441_v33 = vunpack.c.l.b16 %v783_v54  ;;  %v302_v22 = vadd.f32 %v301_v55, %v300_v25  ;;  %v6955_v4 = vld [vmem:[#allocation5 + $0xa40] sm:$0xf] }
  0xa8   :  { %v524_v39 = vadd.f32 %v186_v10, %v178_v9  ;;  %v358_v23 = vadd.f32 %v357_v36, %v356_v16  ;;  %v414_v46 = vadd.f32 %v413_v37, %v412_v20  ;;  %v469_v49 = vrot.slane %v468_v38, 4 }
  0xa9   :  { %v1449_v43 = vunpack.c.l.b16 %v791_v32  ;;  %v1468_v44 = vsel %vm1467_vm5, %v1441_v33, %v1466_v26  ;;  %v249_v52 = vrot.slane %v248_v21, 1  ;;  %v303_v53 = vrot.slane %v302_v22, 2  ;;  %v8277_v32 = vld [vmem:[#allocation5 + $0xa5c] sm:$0xf0] }
  0xaa   :  { %v525_v28 = vrot.slane %v524_v39, 4  ;;  %v359_v56 = vrot.slane %v358_v23, 2  ;;  %v415_v57 = vrot.slane %v414_v46, 2  ;;  %v470_v2 = vadd.f32 %v469_v49, %v468_v38 }
  0xab   :  { %v1470_v50 = vsel %vm1469_vm6, %v1449_v43, %v1468_v44  ;;  %v250_v3 = vadd.f32 %v249_v52, %v248_v21  ;;  %v304_v30 = vadd.f32 %v303_v53, %v302_v22  ;;  %v580_v5 = vadd.f32 %v202_v48, %v194_v45  ;;  %v7211_v21 = vld [vmem:[#allocation5 + $0xc40] sm:$0xf]  ;;  %v96_v52 = vld [vmem:[#allocation2 + $0x8] sm:$0xff] }
  0xac   :  { %v8904_v29 = vpack.c.b16 %v1470_v50, %v1470_v50  ;;  %v526_v58 = vadd.f32 %v525_v28, %v524_v39  ;;  %v360_v6 = vadd.f32 %v359_v56, %v358_v23  ;;  %v416_v34 = vadd.f32 %v415_v57, %v414_v46  ;;  %v8341_v22 = vld [vmem:[#allocation5 + $0xc5c] sm:$0xf0]  ;;  %v104_v53 = vld [vmem:[#allocation2 + $0x48] sm:$0xff] }
  0xad   :  { %v471_v59 = vrot.slane %v470_v2, 2  ;;  %v636_v7 = vadd.f32 %v218_v27, %v210_v51  ;;  %v305_v8 = vrot.slane %v304_v30, 1  ;;  %v581_v60 = vrot.slane %v580_v5, 4  ;;  %v7467_v23 = vld [vmem:[#allocation5 + $0xe40] sm:$0xf]  ;;  %v112_v28 = vld [vmem:[#allocation2 + $0x88] sm:$0xff] }
  0xae   :  { %4104 = vmatmul.bf16.vlgmr.msra.gmra.mxu0 %v8904_v29  ;;  %v527_v35 = vrot.slane %v526_v58, 2  ;;  %v674_v11 = vmul.f32 0.0625, %v250_v3  ;;  %v361_v12 = vrot.slane %v360_v6, 1  ;;  %v417_v40 = vrot.slane %v416_v34, 1  ;;  %v8405_v46 = vld [vmem:[#allocation5 + $0xe5c] sm:$0xf0] }
  0xaf   :  { %v472_v61 = vadd.f32 %v471_v59, %v470_v2  ;;  %v637_v14 = vrot.slane %v636_v7, 4  ;;  %v306_v41 = vadd.f32 %v305_v8, %v304_v30  ;;  %v582_v15 = vadd.f32 %v581_v60, %v580_v5  ;;  %v120_v30 = vld [vmem:[#allocation2 + $0xc8] sm:$0xff] }
  0xb0   :  { %v528_v62 = vadd.f32 %v527_v35, %v526_v58  ;;  %v738_v17 = vpack.c.bf16 %v674_v11, %v674_v11  ;;  %v362_v42 = vadd.f32 %v361_v12, %v360_v6  ;;  %v418_v63 = vadd.f32 %v417_v40, %v416_v34  ;;  %v128_v58 = vld [vmem:[#allocation2 + $0x108] sm:$0xff] }
  0xb1   :  { %v473_v0 = vrot.slane %v472_v61, 1  ;;  %v638_v18 = vadd.f32 %v637_v14, %v636_v7  ;;  %v583_v24 = vrot.slane %v582_v15, 2  ;;  %v682_v25 = vmul.f32 0.0625, %v306_v41  ;;  %v136_v5 = vld [vmem:[#allocation2 + $0x148] sm:$0xff] }
  0xb2   :  { %v529_v1 = vrot.slane %v528_v62, 1  ;;  %v1396_v54 = vunpack.c.l.b16 %v738_v17  ;;  %v690_v16 = vmul.f32 0.0625, %v362_v42  ;;  %v698_v20 = vmul.f32 0.0625, %v418_v63  ;;  %v144_v8 = vld [vmem:[#allocation2 + $0x188] sm:$0xff] }
  0xb3   :  { %v474_v9 = vadd.f32 %v473_v0, %v472_v61  ;;  %v639_v10 = vrot.slane %v638_v18, 2  ;;  %v584_v31 = vadd.f32 %v583_v24, %v582_v15  ;;  %v746_v55 = vpack.c.bf16 %v682_v25, %v682_v25  ;;  %v152_v35 = vld [vmem:[#allocation2 + $0x1c8] sm:$0xff] }
  0xb4   :  { %v530_v26 = vadd.f32 %v529_v1, %v528_v62  ;;  %v6700_v33 = vor.u32 %v8213_v47, %v6699_v19  ;;  %v754_v38 = vpack.c.bf16 %v690_v16, %v690_v16  ;;  %v762_v43 = vpack.c.bf16 %v698_v20, %v698_v20  ;;  %v160_v40 = vld [vmem:[#allocation2 + $0x208] sm:$0xff] }
  0xb5   :  { %v640_v36 = vadd.f32 %v639_v10, %v638_v18  ;;  %v706_v37 = vmul.f32 0.0625, %v474_v9  ;;  %v585_v39 = vrot.slane %v584_v31, 1  ;;  %v1404_v45 = vunpack.c.l.b16 %v746_v55  ;;  %v168_v61 = vld [vmem:[#allocation2 + $0x248] sm:$0xff] }
  0xb6   :  { %v714_v44 = vmul.f32 0.0625, %v530_v26  ;;  %4154 = vmatpush.bf16.msrb.mxu0 %v6700_v33  ;;  %v6956_v48 = vor.u32 %v8277_v32, %v6955_v4  ;;  %v1412_v51 = vunpack.c.l.b16 %v754_v38  ;;  %v1420_v27 = vunpack.c.l.b16 %v762_v43  ;;  %v176_v15 = vld [vmem:[#allocation2 + $0x288] sm:$0xff] }
  0xb7   :  { %v641_v49 = vrot.slane %v640_v36, 1  ;;  %v770_v50 = vpack.c.bf16 %v706_v37, %v706_v37  ;;  %v586_v56 = vadd.f32 %v585_v39, %v584_v31  ;;  %v1485_v2 = vsel %vm1457_vm0, %v1404_v45, %v1396_v54  ;;  %v184_v17 = vld [vmem:[#allocation2 + $0x2c8] sm:$0xff] }
  0xb8   :  { %v778_v57 = vpack.c.bf16 %v714_v44, %v714_v44  ;;  %4167 = vmatpush.bf16.msrb.mxu1 %v6956_v48  ;;  %v7212_v3 = vor.u32 %v8341_v22, %v7211_v21  ;;  %v1486_v59 = vsel %vm1459_vm1, %v1412_v51, %v1485_v2  ;;  %v7468_v7 = vor.u32 %v8405_v46, %v7467_v23  ;;  %v192_v33 = vld [vmem:[#allocation2 + $0x308] sm:$0xff] }
  0xb9   :  { %v642_v6 = vadd.f32 %v641_v49, %v640_v36  ;;  %v1428_v34 = vunpack.c.l.b16 %v770_v50  ;;  %v722_v60 = vmul.f32 0.0625, %v586_v56  ;;  %v1487_v12 = vsel %vm1461_vm2, %v1420_v27, %v1486_v59  ;;  %v200_v36 = vld [vmem:[#allocation2 + $0x348] sm:$0xff] }
  0xba   :  { %v1436_v11 = vunpack.c.l.b16 %v778_v57  ;;  %4180 = vmatpush.bf16.msrb.mxu2 %v7212_v3  ;;  %v230_v14 = vadd.f32 %v104_v53, %v96_v52  ;;  %4193 = vmatpush.bf16.msrb.mxu3 %v7468_v7  ;;  %v286_v42 = vadd.f32 %v120_v30, %v112_v28  ;;  %v342_v63 = vadd.f32 %v136_v5, %v128_v58  ;;  %v208_v22 = vld [vmem:[#allocation2 + $0x388] sm:$0xff] }
  0xbb   :  { %v730_v41 = vmul.f32 0.0625, %v642_v6  ;;  %v1488_v62 = vsel %vm1463_vm3, %v1428_v34, %v1487_v12  ;;  %v786_v0 = vpack.c.bf16 %v722_v60, %v722_v60  ;;  %v398_v47 = vadd.f32 %v152_v35, %v144_v8  ;;  %v216_v39 = vld [vmem:[#allocation2 + $0x3c8] sm:$0xff] }
  0xbc   :  { %v1489_v18 = vsel %vm1465_vm4, %v1436_v11, %v1488_v62  ;;  %v231_v19 = vrot.slane %v230_v14, 4  ;;  %v287_v24 = vrot.slane %v286_v42, 4  ;;  %v343_v25 = vrot.slane %v342_v63, 4 }
  0xbd   :  { %v794_v1 = vpack.c.bf16 %v730_v41, %v730_v41  ;;  %v454_v54 = vadd.f32 %v168_v61, %v160_v40  ;;  %v1444_v4 = vunpack.c.l.b16 %v786_v0  ;;  %v399_v10 = vrot.slane %v398_v47, 4 }
  0xbe   :  { %v232_v9 = vadd.f32 %v231_v19, %v230_v14  ;;  %v510_v16 = vadd.f32 %v184_v17, %v176_v15  ;;  %v288_v32 = vadd.f32 %v287_v24, %v286_v42  ;;  %v344_v26 = vadd.f32 %v343_v25, %v342_v63  ;;  %v6667_v42 = vld [vmem:[#allocation5 + $0x800] sm:$0xf] }
  0xbf   :  { %v1452_v20 = vunpack.c.l.b16 %v794_v1  ;;  %v455_v31 = vrot.slane %v454_v54, 4  ;;  %v1490_v55 = vsel %vm1467_vm5, %v1444_v4, %v1489_v18  ;;  %v400_v38 = vadd.f32 %v399_v10, %v398_v47  ;;  %v8205_v63 = vld [vmem:[#allocation5 + $0x81c] sm:$0xf0] }
  0xc0   :  { %v233_v37 = vrot.slane %v232_v9, 2  ;;  %v511_v43 = vrot.slane %v510_v16, 4  ;;  %v289_v44 = vrot.slane %v288_v32, 2  ;;  %v345_v45 = vrot.slane %v344_v26, 2  ;;  %v6923_v1 = vld [vmem:[#allocation5 + $0xa00] sm:$0xf] }
  0xc1   :  { %v1491_v21 = vsel %vm1469_vm6, %v1452_v20, %v1490_v55  ;;  %v456_v48 = vadd.f32 %v455_v31, %v454_v54  ;;  %v401_v49 = vrot.slane %v400_v38, 2  ;;  %v566_v53 = vadd.f32 %v200_v36, %v192_v33  ;;  %v8269_v24 = vld [vmem:[#allocation5 + $0xa1c] sm:$0xf0]  ;;  %v8001_v36 = vld [vmem:[#allocation5 + $0x1c4] sm:$0xf] }
  0xc2   :  { %v8914_v23 = vpack.c.b16 %v1491_v21, %v1491_v21  ;;  %v234_v46 = vadd.f32 %v233_v37, %v232_v9  ;;  %v512_v50 = vadd.f32 %v511_v43, %v510_v16  ;;  %v290_v51 = vadd.f32 %v289_v44, %v288_v32  ;;  %v7179_v10 = vld [vmem:[#allocation5 + $0xc00] sm:$0xf]  ;;  %v5869_v37 = vld [vmem:[#allocation5 + $0x1e0] sm:$0xf0] }
  0xc3   :  { %v346_v27 = vadd.f32 %v345_v45, %v344_v26  ;;  %v457_v52 = vrot.slane %v456_v48, 2  ;;  %v402_v56 = vadd.f32 %v401_v49, %v400_v38  ;;  %v622_v2 = vadd.f32 %v216_v39, %v208_v22  ;;  %v8333_v16 = vld [vmem:[#allocation5 + $0xc1c] sm:$0xf0]  ;;  %v8917_v39 = vld [vmem:[#allocation5 + $0x3c4] sm:$0xf] }
  0xc4   :  { %4143 = vmatmul.bf16.vlgmr.msra.gmra.mxu3 %v8914_v23  ;;  %v235_v28 = vrot.slane %v234_v46, 1  ;;  %v513_v57 = vrot.slane %v512_v50, 2  ;;  %v291_v3 = vrot.slane %v290_v51, 1  ;;  %v567_v5 = vrot.slane %v566_v53, 4  ;;  %v7435_v55 = vld [vmem:[#allocation5 + $0xe00] sm:$0xf] }
  0xc5   :  { %v347_v30 = vrot.slane %v346_v27, 1  ;;  %v458_v58 = vadd.f32 %v457_v52, %v456_v48  ;;  %v403_v34 = vrot.slane %v402_v56, 1  ;;  %v623_v7 = vrot.slane %v622_v2, 4  ;;  %v8397_v33 = vld [vmem:[#allocation5 + $0xe1c] sm:$0xf0] }
  0xc6   :  { %v236_v6 = vadd.f32 %v235_v28, %v234_v46  ;;  %v514_v59 = vadd.f32 %v513_v57, %v512_v50  ;;  %v292_v8 = vadd.f32 %v291_v3, %v290_v51  ;;  %v568_v11 = vadd.f32 %v567_v5, %v566_v53  ;;  %v8919_v44 = vld [vmem:[#allocation5 + $0x3e0] sm:$0xf0] }
  0xc7   :  { %v348_v35 = vadd.f32 %v347_v30, %v346_v27  ;;  %v459_v60 = vrot.slane %v458_v58, 1  ;;  %v404_v12 = vadd.f32 %v403_v34, %v402_v56  ;;  %v624_v61 = vadd.f32 %v623_v7, %v622_v2  ;;  %v8129_v50 = vld [vmem:[#allocation5 + $0x5c4] sm:$0xf]  ;;  %v101_v7 = vld [vmem:[#allocation2 + $0x30] sm:$0xff] }
  0xc8   :  { %v515_v40 = vrot.slane %v514_v59, 1  ;;  %v672_v14 = vmul.f32 0.0625, %v236_v6  ;;  %v569_v62 = vrot.slane %v568_v11, 2  ;;  %v680_v15 = vmul.f32 0.0625, %v292_v8  ;;  %v6381_v51 = vld [vmem:[#allocation5 + $0x5e0] sm:$0xf0] }
  0xc9   :  { %v460_v41 = vadd.f32 %v459_v60, %v458_v58  ;;  %v688_v17 = vmul.f32 0.0625, %v348_v35  ;;  %v625_v18 = vrot.slane %v624_v61, 2  ;;  %v696_v19 = vmul.f32 0.0625, %v404_v12  ;;  %v8193_v56 = vld [vmem:[#allocation5 + $0x7c4] sm:$0xf]  ;;  %v109_v8 = vld [vmem:[#allocation2 + $0x70] sm:$0xff] }
  0xca   :  { %v516_v0 = vadd.f32 %v515_v40, %v514_v59  ;;  %v736_v47 = vpack.c.bf16 %v672_v14, %v672_v14  ;;  %v570_v25 = vadd.f32 %v569_v62, %v568_v11  ;;  %v744_v4 = vpack.c.bf16 %v680_v15, %v680_v15  ;;  %v6637_v57 = vld [vmem:[#allocation5 + $0x7e0] sm:$0xf0]  ;;  %v117_v35 = vld [vmem:[#allocation2 + $0xb0] sm:$0xff] }
  0xcb   :  { %v704_v54 = vmul.f32 0.0625, %v460_v41  ;;  %v752_v9 = vpack.c.bf16 %v688_v17, %v688_v17  ;;  %v626_v20 = vadd.f32 %v625_v18, %v624_v61  ;;  %v760_v26 = vpack.c.bf16 %v696_v19, %v696_v19  ;;  %v7993_v2 = vld [vmem:[#allocation5 + $0x184] sm:$0xf]  ;;  %v125_v60 = vld [vmem:[#allocation2 + $0xf0] sm:$0xff] }
  0xcc   :  { %v712_v32 = vmul.f32 0.0625, %v516_v0  ;;  %v1394_v31 = vunpack.c.l.b16 %v736_v47  ;;  %v571_v38 = vrot.slane %v570_v25, 1  ;;  %v1402_v21 = vunpack.c.l.b16 %v744_v4  ;;  %v5837_v6 = vld [vmem:[#allocation5 + $0x1a0] sm:$0xf0]  ;;  %v133_v62 = vld [vmem:[#allocation2 + $0x130] sm:$0xff] }
  0xcd   :  { %v768_v43 = vpack.c.bf16 %v704_v54, %v704_v54  ;;  %v1410_v22 = vunpack.c.l.b16 %v752_v9  ;;  %v627_v45 = vrot.slane %v626_v20, 1  ;;  %v1418_v46 = vunpack.c.l.b16 %v760_v26  ;;  %v8923_v34 = vld [vmem:[#allocation5 + $0x384] sm:$0xf]  ;;  %v141_v15 = vld [vmem:[#allocation2 + $0x170] sm:$0xff] }
  0xce   :  { %v776_v48 = vpack.c.bf16 %v712_v32, %v712_v32  ;;  %v6668_v49 = vor.u32 %v8205_v63, %v6667_v42  ;;  %v572_v27 = vadd.f32 %v571_v38, %v570_v25  ;;  %v1471_v53 = vsel %vm1457_vm0, %v1402_v21, %v1394_v31  ;;  %v8925_v59 = vld [vmem:[#allocation5 + $0x3a0] sm:$0xf0]  ;;  %v149_v47 = vld [vmem:[#allocation2 + $0x1b0] sm:$0xff] }
  0xcf   :  { %v1426_v52 = vunpack.c.l.b16 %v768_v43  ;;  %v6924_v28 = vor.u32 %v8269_v24, %v6923_v1  ;;  %v628_v3 = vadd.f32 %v627_v45, %v626_v20  ;;  %v1472_v58 = vsel %vm1459_vm1, %v1410_v22, %v1471_v53  ;;  %v8121_v14 = vld [vmem:[#allocation5 + $0x584] sm:$0xf]  ;;  %v157_v54 = vld [vmem:[#allocation2 + $0x1f0] sm:$0xff] }
  0xd0   :  { %v1434_v30 = vunpack.c.l.b16 %v776_v48  ;;  %4155 = vmatpush.bf16.msrb.mxu0 %v6668_v49  ;;  %v7180_v5 = vor.u32 %v8333_v16, %v7179_v10  ;;  %v720_v11 = vmul.f32 0.0625, %v572_v27  ;;  %v1473_v12 = vsel %vm1461_vm2, %v1418_v46, %v1472_v58  ;;  %v6349_v41 = vld [vmem:[#allocation5 + $0x5a0] sm:$0xf0]  ;;  %v165_v4 = vld [vmem:[#allocation2 + $0x230] sm:$0xff] }
  0xd1   :  { %4168 = vmatpush.bf16.msrb.mxu1 %v6924_v28  ;;  %v7436_v40 = vor.u32 %v8397_v33, %v7435_v55  ;;  %v5872_v61 = vor.u32 %v8001_v36, %v5869_v37  ;;  %v728_v17 = vmul.f32 0.0625, %v628_v3  ;;  %v1474_v42 = vsel %vm1463_vm3, %v1426_v52, %v1473_v12  ;;  %v8185_v18 = vld [vmem:[#allocation5 + $0x784] sm:$0xf]  ;;  %v173_v9 = vld [vmem:[#allocation2 + $0x270] sm:$0xff] }
  0xd2   :  { %4181 = vmatpush.bf16.msrb.mxu2 %v7180_v5  ;;  %v6128_v63 = vor.u32 %v8917_v39, %v8919_v44  ;;  %v6384_v0 = vor.u32 %v8129_v50, %v6381_v51  ;;  %v6605_v19 = vld [vmem:[#allocation5 + $0x7a0] sm:$0xf0]  ;;  %v784_v1 = vpack.c.bf16 %v720_v11, %v720_v11  ;;  %v1475_v24 = vsel %vm1465_vm4, %v1434_v30, %v1474_v42  ;;  %v181_v26 = vld [vmem:[#allocation2 + $0x2b0] sm:$0xff] }
  0xd3   :  { %4194 = vmatpush.bf16.msrb.mxu3 %v7436_v40  ;;  %v6640_v25 = vor.u32 %v8193_v56, %v6637_v57  ;;  %v792_v10 = vpack.c.bf16 %v728_v17, %v728_v17  ;;  %v5840_v16 = vor.u32 %v7993_v2, %v5837_v6  ;;  %v6096_v20 = vor.u32 %v8923_v34, %v8925_v59  ;;  %v189_v31 = vld [vmem:[#allocation2 + $0x2f0] sm:$0xff] }
  0xd4   :  { %4200 = vmatpush.bf16.msra.mxu0 %v5872_v61  ;;  %v6352_v32 = vor.u32 %v8121_v14, %v6349_v41  ;;  %v1442_v55 = vunpack.c.l.b16 %v784_v1  ;;  %v6608_v33 = vor.u32 %v8185_v18, %v6605_v19  ;;  %v265_v36 = vadd.f32 %v109_v8, %v101_v7  ;;  %v197_v44 = vld [vmem:[#allocation2 + $0x330] sm:$0xff] }
  0xd5   :  { %v321_v37 = vadd.f32 %v125_v60, %v117_v35  ;;  %v1450_v38 = vunpack.c.l.b16 %v792_v10  ;;  %v377_v43 = vadd.f32 %v141_v15, %v133_v62  ;;  %v433_v21 = vadd.f32 %v157_v54, %v149_v47  ;;  %v205_v45 = vld [vmem:[#allocation2 + $0x370] sm:$0xff] }
  0xd6   :  { %4226 = vmatpush.bf16.msra.mxu2 %v6384_v0  ;;  %v489_v22 = vadd.f32 %v173_v9, %v165_v4  ;;  %v1476_v39 = vsel %vm1467_vm5, %v1442_v55, %v1475_v24  ;;  %v266_v48 = vrot.slane %v265_v36, 4  ;;  %v545_v49 = vadd.f32 %v189_v31, %v181_v26  ;;  %v213_v51 = vld [vmem:[#allocation2 + $0x3b0] sm:$0xff] }
  0xd7   :  { %4239 = vmatpush.bf16.msra.mxu3 %v6640_v25  ;;  %v322_v46 = vrot.slane %v321_v37, 4  ;;  %v1477_v50 = vsel %vm1469_vm6, %v1450_v38, %v1476_v39  ;;  %v221_v27 = vld [vmem:[#allocation2 + $0x3f0] sm:$0xff]  ;;  %v378_v52 = vrot.slane %v377_v43, 4  ;;  %v434_v53 = vrot.slane %v433_v21, 4 }
  0xd8   :  { %4201 = vmatpush.bf16.msra.mxu0 %v5840_v16  ;;  %v490_v28 = vrot.slane %v489_v22, 4  ;;  %v8936_v56 = vpack.c.b16 %v1477_v50, %v1477_v50  ;;  %v267_v57 = vadd.f32 %v266_v48, %v265_v36  ;;  %v546_v3 = vrot.slane %v545_v49, 4 }
  0xd9   :  { %v323_v2 = vadd.f32 %v322_v46, %v321_v37  ;;  %v379_v30 = vadd.f32 %v378_v52, %v377_v43  ;;  %v435_v58 = vadd.f32 %v434_v53, %v433_v21  ;;  %v601_v6 = vadd.f32 %v205_v45, %v197_v44  ;;  %v8049_v52 = vld [vmem:[#allocation5 + $0x344] sm:$0xf] }
  0xda   :  { %4227 = vmatpush.bf16.msra.mxu2 %v6352_v32  ;;  %v491_v5 = vadd.f32 %v490_v28, %v489_v22  ;;  %4117 = vmatmul.bf16.vlgmr.msra.gmra.mxu1 %v8936_v56  ;;  %v268_v34 = vrot.slane %v267_v57, 2  ;;  %v547_v7 = vadd.f32 %v546_v3, %v545_v49  ;;  %v657_v8 = vadd.f32 %v221_v27, %v213_v51  ;;  %v7985_v51 = vld [vmem:[#allocation5 + $0x144] sm:$0xf] }
  0xdb   :  { %4240 = vmatpush.bf16.msra.mxu3 %v6608_v33  ;;  %v324_v59 = vrot.slane %v323_v2, 2  ;;  %4213 = vmatpush.bf16.msra.mxu1 %v6128_v63  ;;  %v380_v35 = vrot.slane %v379_v30, 2  ;;  %v436_v60 = vrot.slane %v435_v58, 2  ;;  %v602_v12 = vrot.slane %v601_v6, 4  ;;  %v5805_v27 = vld [vmem:[#allocation5 + $0x160] sm:$0xf0] }
  0xdc   :  { %v492_v11 = vrot.slane %v491_v5, 2  ;;  %v269_v40 = vadd.f32 %v268_v34, %v267_v57  ;;  %v548_v14 = vrot.slane %v547_v7, 2  ;;  %v658_v41 = vrot.slane %v657_v8, 4  ;;  %v99_v53 = vld [vmem:[#allocation2 + $0x20] sm:$0xff] }
  0xdd   :  { %v325_v61 = vadd.f32 %v324_v59, %v323_v2  ;;  %v381_v62 = vadd.f32 %v380_v35, %v379_v30  ;;  %v437_v15 = vadd.f32 %v436_v60, %v435_v58  ;;  %v603_v42 = vadd.f32 %v602_v12, %v601_v6  ;;  %v107_v28 = vld [vmem:[#allocation2 + $0x60] sm:$0xff] }
  0xde   :  { %v493_v17 = vadd.f32 %v492_v11, %v491_v5  ;;  %v270_v0 = vrot.slane %v269_v40, 1  ;;  %v549_v19 = vadd.f32 %v548_v14, %v547_v7  ;;  %v659_v47 = vadd.f32 %v658_v41, %v657_v8  ;;  %v6061_v58 = vld [vmem:[#allocation5 + $0x360] sm:$0xf0] }
  0xdf   :  { %v326_v18 = vrot.slane %v325_v61, 1  ;;  %4214 = vmatpush.bf16.msra.mxu1 %v6096_v20  ;;  %v382_v1 = vrot.slane %v381_v62, 1  ;;  %v438_v24 = vrot.slane %v437_v15, 1  ;;  %v604_v25 = vrot.slane %v603_v42, 2  ;;  %v8113_v5 = vld [vmem:[#allocation5 + $0x544] sm:$0xf] }
  0xe0   :  { %v494_v63 = vrot.slane %v493_v17, 1  ;;  %v271_v54 = vadd.f32 %v270_v0, %v269_v40  ;;  %v550_v9 = vrot.slane %v549_v19, 1  ;;  %v660_v10 = vrot.slane %v659_v47, 2  ;;  %v6317_v6 = vld [vmem:[#allocation5 + $0x560] sm:$0xf0] }
  0xe1   :  { %v327_v4 = vadd.f32 %v326_v18, %v325_v61  ;;  %v383_v16 = vadd.f32 %v382_v1, %v381_v62  ;;  %v439_v32 = vadd.f32 %v438_v24, %v437_v15  ;;  %v605_v31 = vadd.f32 %v604_v25, %v603_v42  ;;  %v8177_v35 = vld [vmem:[#allocation5 + $0x744] sm:$0xf] }
  0xe2   :  { %v495_v26 = vadd.f32 %v494_v63, %v493_v17  ;;  %v551_v55 = vadd.f32 %v550_v9, %v549_v19  ;;  %v661_v33 = vadd.f32 %v660_v10, %v659_v47  ;;  %v677_v36 = vmul.f32 0.0625, %v271_v54  ;;  %v6573_v60 = vld [vmem:[#allocation5 + $0x760] sm:$0xf0] }
  0xe3   :  { %v685_v37 = vmul.f32 0.0625, %v327_v4  ;;  %v606_v38 = vrot.slane %v605_v31, 1  ;;  %v693_v43 = vmul.f32 0.0625, %v383_v16  ;;  %v701_v21 = vmul.f32 0.0625, %v439_v32  ;;  %v115_v11 = vld [vmem:[#allocation2 + $0xa0] sm:$0xff] }
  0xe4   :  { %v709_v20 = vmul.f32 0.0625, %v495_v26  ;;  %v662_v22 = vrot.slane %v661_v33, 1  ;;  %v717_v39 = vmul.f32 0.0625, %v551_v55  ;;  %v741_v44 = vpack.c.bf16 %v677_v36, %v677_v36  ;;  %v123_v41 = vld [vmem:[#allocation2 + $0xe0] sm:$0xff] }
  0xe5   :  { %v749_v45 = vpack.c.bf16 %v685_v37, %v685_v37  ;;  %v607_v48 = vadd.f32 %v606_v38, %v605_v31  ;;  %v757_v46 = vpack.c.bf16 %v693_v43, %v693_v43  ;;  %v765_v49 = vpack.c.bf16 %v701_v21, %v701_v21  ;;  %v131_v62 = vld [vmem:[#allocation2 + $0x120] sm:$0xff] }
  0xe6   :  { %v773_v50 = vpack.c.bf16 %v709_v20, %v709_v20  ;;  %v663_v57 = vadd.f32 %v662_v22, %v661_v33  ;;  %v781_v2 = vpack.c.bf16 %v717_v39, %v717_v39  ;;  %v1399_v3 = vunpack.c.l.b16 %v741_v44  ;;  %v139_v15 = vld [vmem:[#allocation2 + $0x160] sm:$0xff] }
  0xe7   :  { %v1407_v30 = vunpack.c.l.b16 %v749_v45  ;;  %v725_v34 = vmul.f32 0.0625, %v607_v48  ;;  %v1415_v59 = vunpack.c.l.b16 %v757_v46  ;;  %v1423_v7 = vunpack.c.l.b16 %v765_v49  ;;  %v147_v19 = vld [vmem:[#allocation2 + $0x1a0] sm:$0xff] }
  0xe8   :  { %v1431_v8 = vunpack.c.l.b16 %v773_v50  ;;  %v733_v12 = vmul.f32 0.0625, %v663_v57  ;;  %v1439_v40 = vunpack.c.l.b16 %v781_v2  ;;  %v5808_v14 = vor.u32 %v7985_v51, %v5805_v27  ;;  %v155_v47 = vld [vmem:[#allocation2 + $0x1e0] sm:$0xff] }
  0xe9   :  { %v1506_v61 = vsel %vm1457_vm0, %v1407_v30, %v1399_v3  ;;  %v789_v17 = vpack.c.bf16 %v725_v34, %v725_v34  ;;  %v6064_v0 = vor.u32 %v8049_v52, %v6061_v58  ;;  %v6320_v18 = vor.u32 %v8113_v5, %v6317_v6  ;;  %v163_v25 = vld [vmem:[#allocation2 + $0x220] sm:$0xff] }
  0xea   :  { %v1507_v42 = vsel %vm1459_vm1, %v1415_v59, %v1506_v61  ;;  %v797_v1 = vpack.c.bf16 %v733_v12, %v733_v12  ;;  %4202 = vmatpush.bf16.msra.mxu0 %v5808_v14  ;;  %v6576_v63 = vor.u32 %v8177_v35, %v6573_v60  ;;  %v171_v54 = vld [vmem:[#allocation2 + $0x260] sm:$0xff]  ;;  %v251_v4 = vadd.f32 %v107_v28, %v99_v53 }
  0xeb   :  { %v1508_v24 = vsel %vm1461_vm2, %v1423_v7, %v1507_v42  ;;  %v1447_v9 = vunpack.c.l.b16 %v789_v17  ;;  %4215 = vmatpush.bf16.msra.mxu1 %v6064_v0  ;;  %4228 = vmatpush.bf16.msra.mxu2 %v6320_v18  ;;  %v179_v16 = vld [vmem:[#allocation2 + $0x2a0] sm:$0xff]  ;;  %v307_v26 = vadd.f32 %v123_v41, %v115_v11  ;;  %v363_v31 = vadd.f32 %v139_v15, %v131_v62 }
  0xec   :  { %v1509_v10 = vsel %vm1463_vm3, %v1431_v8, %v1508_v24  ;;  %v187_v32 = vld [vmem:[#allocation2 + $0x2e0] sm:$0xff]  ;;  %v1455_v55 = vunpack.c.l.b16 %v797_v1  ;;  %4241 = vmatpush.bf16.msra.mxu3 %v6576_v63  ;;  %v252_v36 = vrot.slane %v251_v4, 4  ;;  %v419_v37 = vadd.f32 %v155_v47, %v147_v19 }
  0xed   :  { %v1510_v33 = vsel %vm1465_vm4, %v1439_v40, %v1509_v10  ;;  %v195_v43 = vld [vmem:[#allocation2 + $0x320] sm:$0xff]  ;;  %v308_v20 = vrot.slane %v307_v26, 4  ;;  %v364_v22 = vrot.slane %v363_v31, 4  ;;  %v475_v39 = vadd.f32 %v171_v54, %v163_v25 }
  0xee   :  { %v1511_v38 = vsel %vm1467_vm5, %v1447_v9, %v1510_v33  ;;  %v203_v21 = vld [vmem:[#allocation2 + $0x360] sm:$0xff]  ;;  %v253_v46 = vadd.f32 %v252_v36, %v251_v4  ;;  %v420_v49 = vrot.slane %v419_v37, 4  ;;  %v531_v50 = vadd.f32 %v187_v32, %v179_v16 }
  0xef   :  { %v1512_v44 = vsel %vm1469_vm6, %v1455_v55, %v1511_v38  ;;  %v211_v45 = vld [vmem:[#allocation2 + $0x3a0] sm:$0xff]  ;;  %v309_v27 = vadd.f32 %v308_v20, %v307_v26  ;;  %v365_v52 = vadd.f32 %v364_v22, %v363_v31  ;;  %v476_v53 = vrot.slane %v475_v39, 4  ;;  %v102_v22 = vld [vmem:[#allocation2 + $0x38] sm:$0xff] }
  0xf0   :  { %v219_v48 = vld [vmem:[#allocation2 + $0x3e0] sm:$0xff]  ;;  %v8946_v51 = vpack.c.b16 %v1512_v44, %v1512_v44  ;;  %v254_v28 = vrot.slane %v253_v46, 2  ;;  %v421_v57 = vadd.f32 %v420_v49, %v419_v37  ;;  %v532_v2 = vrot.slane %v531_v50, 4  ;;  %v118_v49 = vld [vmem:[#allocation2 + $0xb8] sm:$0xff] }
  0xf1   :  { %v587_v3 = vadd.f32 %v203_v21, %v195_v43  ;;  %v310_v30 = vrot.slane %v309_v27, 2  ;;  %v366_v58 = vrot.slane %v365_v52, 2  ;;  %v477_v5 = vadd.f32 %v476_v53, %v475_v39  ;;  %v110_v39 = vld [vmem:[#allocation2 + $0x78] sm:$0xff] }
  0xf2   :  { %4182 = vmatmul.bf16.vlgmr.msrb.gmra.mxu2 %v8946_v51  ;;  %v643_v6 = vadd.f32 %v219_v48, %v211_v45  ;;  %v255_v34 = vadd.f32 %v254_v28, %v253_v46  ;;  %v422_v59 = vrot.slane %v421_v57, 2  ;;  %v533_v7 = vadd.f32 %v532_v2, %v531_v50  ;;  %v126_v50 = vld [vmem:[#allocation2 + $0xf8] sm:$0xff] }
  0xf3   :  { %v588_v8 = vrot.slane %v587_v3, 4  ;;  %v311_v35 = vadd.f32 %v310_v30, %v309_v27  ;;  %v367_v60 = vadd.f32 %v366_v58, %v365_v52  ;;  %v478_v11 = vrot.slane %v477_v5, 2  ;;  %v134_v30 = vld [vmem:[#allocation2 + $0x138] sm:$0xff] }
  0xf4   :  { %v644_v12 = vrot.slane %v643_v6, 4  ;;  %v256_v40 = vrot.slane %v255_v34, 1  ;;  %v423_v61 = vadd.f32 %v422_v59, %v421_v57  ;;  %v534_v14 = vrot.slane %v533_v7, 2  ;;  %v142_v58 = vld [vmem:[#allocation2 + $0x178] sm:$0xff] }
  0xf5   :  { %v589_v41 = vadd.f32 %v588_v8, %v587_v3  ;;  %v312_v62 = vrot.slane %v311_v35, 1  ;;  %v368_v15 = vrot.slane %v367_v60, 1  ;;  %v479_v17 = vadd.f32 %v478_v11, %v477_v5  ;;  %v158_v8 = vld [vmem:[#allocation2 + $0x1f8] sm:$0xff] }
  0xf6   :  { %v645_v42 = vadd.f32 %v644_v12, %v643_v6  ;;  %v257_v0 = vadd.f32 %v256_v40, %v255_v34  ;;  %v424_v18 = vrot.slane %v423_v61, 1  ;;  %v535_v19 = vadd.f32 %v534_v14, %v533_v7  ;;  %v150_v7 = vld [vmem:[#allocation2 + $0x1b8] sm:$0xff] }
  0xf7   :  { %v590_v47 = vrot.slane %v589_v41, 2  ;;  %v313_v1 = vadd.f32 %v312_v62, %v311_v35  ;;  %v369_v24 = vadd.f32 %v368_v15, %v367_v60  ;;  %v480_v63 = vrot.slane %v479_v17, 1  ;;  %v174_v62 = vld [vmem:[#allocation2 + $0x278] sm:$0xff] }
  0xf8   :  { %v646_v25 = vrot.slane %v645_v42, 2  ;;  %v425_v54 = vadd.f32 %v424_v18, %v423_v61  ;;  %v536_v4 = vrot.slane %v535_v19, 1  ;;  %v675_v10 = vmul.f32 0.0625, %v257_v0  ;;  %v182_v18 = vld [vmem:[#allocation2 + $0x2b8] sm:$0xff] }
  0xf9   :  { %v591_v9 = vadd.f32 %v590_v47, %v589_v41  ;;  %v481_v16 = vadd.f32 %v480_v63, %v479_v17  ;;  %v683_v26 = vmul.f32 0.0625, %v313_v1  ;;  %v691_v31 = vmul.f32 0.0625, %v369_v24  ;;  %v166_v41 = vld [vmem:[#allocation2 + $0x238] sm:$0xff] }
  0xfa   :  { %v647_v32 = vadd.f32 %v646_v25, %v645_v42  ;;  %v537_v55 = vadd.f32 %v536_v4, %v535_v19  ;;  %v699_v36 = vmul.f32 0.0625, %v425_v54  ;;  %v739_v37 = vpack.c.bf16 %v675_v10, %v675_v10  ;;  %v190_v19 = vld [vmem:[#allocation2 + $0x2f8] sm:$0xff] }
  0xfb   :  { %v592_v33 = vrot.slane %v591_v9, 1  ;;  %v707_v43 = vmul.f32 0.0625, %v481_v16  ;;  %v747_v21 = vpack.c.bf16 %v683_v26, %v683_v26  ;;  %v755_v20 = vpack.c.bf16 %v691_v31, %v691_v31  ;;  %v206_v10 = vld [vmem:[#allocation2 + $0x378] sm:$0xff] }
  0xfc   :  { %v648_v38 = vrot.slane %v647_v32, 1  ;;  %v715_v45 = vmul.f32 0.0625, %v537_v55  ;;  %v763_v48 = vpack.c.bf16 %v699_v36, %v699_v36  ;;  %v1397_v46 = vunpack.c.l.b16 %v739_v37  ;;  %v214_v55 = vld [vmem:[#allocation2 + $0x3b8] sm:$0xff] }
  0xfd   :  { %v593_v44 = vadd.f32 %v592_v33, %v591_v9  ;;  %v771_v52 = vpack.c.bf16 %v707_v43, %v707_v43  ;;  %v1405_v53 = vunpack.c.l.b16 %v747_v21  ;;  %v1413_v28 = vunpack.c.l.b16 %v755_v20  ;;  %v198_v9 = vld [vmem:[#allocation2 + $0x338] sm:$0xff] }
  0xfe   :  { %v649_v27 = vadd.f32 %v648_v38, %v647_v32  ;;  %v779_v2 = vpack.c.bf16 %v715_v45, %v715_v45  ;;  %v1421_v3 = vunpack.c.l.b16 %v763_v48  ;;  %v272_v5 = vadd.f32 %v110_v39, %v102_v22  ;;  %v222_v33 = vld [vmem:[#allocation2 + $0x3f8] sm:$0xff] }
  0xff   :  { %v723_v57 = vmul.f32 0.0625, %v593_v44  ;;  %v1429_v34 = vunpack.c.l.b16 %v771_v52  ;;  %v1492_v59 = vsel %vm1457_vm0, %v1405_v53, %v1397_v46  ;;  %v328_v35 = vadd.f32 %v126_v50, %v118_v49 }
 0x100   :  { %v731_v6 = vmul.f32 0.0625, %v649_v27  ;;  %v1437_v11 = vunpack.c.l.b16 %v779_v2  ;;  %v1493_v12 = vsel %vm1459_vm1, %v1413_v28, %v1492_v59  ;;  %v273_v40 = vrot.slane %v272_v5, 4 }
 0x101   :  { %v787_v60 = vpack.c.bf16 %v723_v57, %v723_v57  ;;  %v1494_v14 = vsel %vm1461_vm2, %v1421_v3, %v1493_v12  ;;  %v329_v15 = vrot.slane %v328_v35, 4  ;;  %v384_v17 = vadd.f32 %v142_v58, %v134_v30 }
 0x102   :  { %v795_v61 = vpack.c.bf16 %v731_v6, %v731_v6  ;;  %v1495_v0 = vsel %vm1463_vm3, %v1429_v34, %v1494_v14  ;;  %v274_v47 = vadd.f32 %v273_v40, %v272_v5  ;;  %v440_v1 = vadd.f32 %v158_v8, %v150_v7 }
 0x103   :  { %v1445_v42 = vunpack.c.l.b16 %v787_v60  ;;  %v1496_v63 = vsel %vm1465_vm4, %v1437_v11, %v1495_v0  ;;  %v330_v25 = vadd.f32 %v329_v15, %v328_v35  ;;  %v385_v54 = vrot.slane %v384_v17, 4 }
 0x104   :  { %v1453_v24 = vunpack.c.l.b16 %v795_v61  ;;  %v275_v16 = vrot.slane %v274_v47, 2  ;;  %v441_v32 = vrot.slane %v440_v1, 4  ;;  %v496_v26 = vadd.f32 %v174_v62, %v166_v41 }
 0x105   :  { %v1497_v4 = vsel %vm1467_vm5, %v1445_v42, %v1496_v63  ;;  %v331_v36 = vrot.slane %v330_v25, 2  ;;  %v386_v37 = vadd.f32 %v385_v54, %v384_v17  ;;  %v552_v38 = vadd.f32 %v190_v19, %v182_v18  ;;  %v100_v19 = vld [vmem:[#allocation2 + $0x28] sm:$0xff] }
 0x106   :  { %v1498_v31 = vsel %vm1469_vm6, %v1453_v24, %v1497_v4  ;;  %v276_v21 = vadd.f32 %v275_v16, %v274_v47  ;;  %v442_v20 = vadd.f32 %v441_v32, %v440_v1  ;;  %v497_v22 = vrot.slane %v496_v26, 4  ;;  %v108_v47 = vld [vmem:[#allocation2 + $0x68] sm:$0xff] }
 0x107   :  { %v8956_v43 = vpack.c.b16 %v1498_v31, %v1498_v31  ;;  %v332_v39 = vadd.f32 %v331_v36, %v330_v25  ;;  %v387_v44 = vrot.slane %v386_v37, 2  ;;  %v553_v45 = vrot.slane %v552_v38, 4  ;;  %v116_v31 = vld [vmem:[#allocation2 + $0xa8] sm:$0xff] }
 0x108   :  { %v608_v48 = vadd.f32 %v206_v10, %v198_v9  ;;  %v277_v46 = vrot.slane %v276_v21, 1  ;;  %v443_v49 = vrot.slane %v442_v20, 2  ;;  %v498_v50 = vadd.f32 %v497_v22, %v496_v26 }
 0x109   :  { %4156 = vmatmul.bf16.vlgmr.msrb.gmra.mxu0 %v8956_v43  ;;  %v664_v27 = vadd.f32 %v222_v33, %v214_v55  ;;  %v333_v52 = vrot.slane %v332_v39, 1  ;;  %v388_v53 = vadd.f32 %v387_v44, %v386_v37  ;;  %v554_v28 = vadd.f32 %v553_v45, %v552_v38  ;;  %v124_v55 = vld [vmem:[#allocation2 + $0xe8] sm:$0xff] }
 0x10a   :  { %v609_v57 = vrot.slane %v608_v48, 4  ;;  %v278_v2 = vadd.f32 %v277_v46, %v276_v21  ;;  %v444_v3 = vadd.f32 %v443_v49, %v442_v20  ;;  %v499_v30 = vrot.slane %v498_v50, 2  ;;  %v132_v44 = vld [vmem:[#allocation2 + $0x128] sm:$0xff] }
 0x10b   :  { %v665_v58 = vrot.slane %v664_v27, 4  ;;  %v334_v5 = vadd.f32 %v333_v52, %v332_v39  ;;  %v389_v6 = vrot.slane %v388_v53, 1  ;;  %v555_v34 = vrot.slane %v554_v28, 2  ;;  %v140_v45 = vld [vmem:[#allocation2 + $0x168] sm:$0xff] }
 0x10c   :  { %v610_v59 = vadd.f32 %v609_v57, %v608_v48  ;;  %v445_v7 = vrot.slane %v444_v3, 1  ;;  %v500_v8 = vadd.f32 %v499_v30, %v498_v50  ;;  %v678_v60 = vmul.f32 0.0625, %v278_v2  ;;  %v156_v52 = vld [vmem:[#allocation2 + $0x1e8] sm:$0xff] }
 0x10d   :  { %v666_v35 = vadd.f32 %v665_v58, %v664_v27  ;;  %v390_v11 = vadd.f32 %v389_v6, %v388_v53  ;;  %v556_v12 = vadd.f32 %v555_v34, %v554_v28  ;;  %v686_v61 = vmul.f32 0.0625, %v334_v5  ;;  %v148_v27 = vld [vmem:[#allocation2 + $0x1a8] sm:$0xff] }
 0x10e   :  { %v611_v40 = vrot.slane %v610_v59, 2  ;;  %v446_v14 = vadd.f32 %v445_v7, %v444_v3  ;;  %v501_v41 = vrot.slane %v500_v8, 1  ;;  %v742_v15 = vpack.c.bf16 %v678_v60, %v678_v60  ;;  %v164_v5 = vld [vmem:[#allocation2 + $0x228] sm:$0xff] }
 0x10f   :  { %v667_v62 = vrot.slane %v666_v35, 2  ;;  %v557_v17 = vrot.slane %v556_v12, 1  ;;  %v694_v0 = vmul.f32 0.0625, %v390_v11  ;;  %v750_v18 = vpack.c.bf16 %v686_v61, %v686_v61  ;;  %v172_v6 = vld [vmem:[#allocation2 + $0x268] sm:$0xff] }
 0x110   :  { %v612_v42 = vadd.f32 %v611_v40, %v610_v59  ;;  %v502_v1 = vadd.f32 %v501_v41, %v500_v8  ;;  %v702_v63 = vmul.f32 0.0625, %v446_v14  ;;  %v1400_v25 = vunpack.c.l.b16 %v742_v15  ;;  %v188_v60 = vld [vmem:[#allocation2 + $0x2e8] sm:$0xff] }
 0x111   :  { %v668_v24 = vadd.f32 %v667_v62, %v666_v35  ;;  %v558_v54 = vadd.f32 %v557_v17, %v556_v12  ;;  %v758_v9 = vpack.c.bf16 %v694_v0, %v694_v0  ;;  %v1408_v10 = vunpack.c.l.b16 %v750_v18  ;;  %v180_v35 = vld [vmem:[#allocation2 + $0x2a8] sm:$0xff] }
 0x112   :  { %v613_v4 = vrot.slane %v612_v42, 1  ;;  %v710_v32 = vmul.f32 0.0625, %v502_v1  ;;  %v766_v26 = vpack.c.bf16 %v702_v63, %v702_v63  ;;  %v258_v33 = vadd.f32 %v108_v47, %v100_v19  ;;  %v196_v18 = vld [vmem:[#allocation2 + $0x328] sm:$0xff] }
 0x113   :  { %v669_v16 = vrot.slane %v668_v24, 1  ;;  %v718_v37 = vmul.f32 0.0625, %v558_v54  ;;  %v1416_v38 = vunpack.c.l.b16 %v758_v9  ;;  %v1513_v21 = vsel %vm1457_vm0, %v1408_v10, %v1400_v25  ;;  %v204_v19 = vld [vmem:[#allocation2 + $0x368] sm:$0xff] }
 0x114   :  { %v614_v36 = vadd.f32 %v613_v4, %v612_v42  ;;  %v774_v22 = vpack.c.bf16 %v710_v32, %v710_v32  ;;  %v1424_v39 = vunpack.c.l.b16 %v766_v26  ;;  %v259_v48 = vrot.slane %v258_v33, 4  ;;  %v212_v25 = vld [vmem:[#allocation2 + $0x3a8] sm:$0xff] }
 0x115   :  { %v670_v20 = vadd.f32 %v669_v16, %v668_v24  ;;  %v782_v49 = vpack.c.bf16 %v718_v37, %v718_v37  ;;  %v1514_v50 = vsel %vm1459_vm1, %v1416_v38, %v1513_v21  ;;  %v314_v53 = vadd.f32 %v124_v55, %v116_v31  ;;  %v220_v54 = vld [vmem:[#allocation2 + $0x3e8] sm:$0xff] }
 0x116   :  { %v726_v46 = vmul.f32 0.0625, %v614_v36  ;;  %v1432_v57 = vunpack.c.l.b16 %v774_v22  ;;  %v1515_v2 = vsel %vm1461_vm2, %v1424_v39, %v1514_v50  ;;  %v260_v3 = vadd.f32 %v259_v48, %v258_v33 }
 0x117   :  { %v734_v28 = vmul.f32 0.0625, %v670_v20  ;;  %v1440_v58 = vunpack.c.l.b16 %v782_v49  ;;  %v315_v34 = vrot.slane %v314_v53, 4  ;;  %v370_v59 = vadd.f32 %v140_v45, %v132_v44 }
 0x118   :  { %v790_v30 = vpack.c.bf16 %v726_v46, %v726_v46  ;;  %v1516_v8 = vsel %vm1463_vm3, %v1432_v57, %v1515_v2  ;;  %v261_v11 = vrot.slane %v260_v3, 2  ;;  %v426_v12 = vadd.f32 %v156_v52, %v148_v27 }
 0x119   :  { %v798_v7 = vpack.c.bf16 %v734_v28, %v734_v28  ;;  %v1517_v61 = vsel %vm1465_vm4, %v1440_v58, %v1516_v8  ;;  %v316_v14 = vadd.f32 %v315_v34, %v314_v53  ;;  %v371_v41 = vrot.slane %v370_v59, 4 }
 0x11a   :  { %v1448_v40 = vunpack.c.l.b16 %v790_v30  ;;  %v262_v15 = vadd.f32 %v261_v11, %v260_v3  ;;  %v427_v17 = vrot.slane %v426_v12, 4  ;;  %v482_v42 = vadd.f32 %v172_v6, %v164_v5  ;;  %v7977_v5 = vld [vmem:[#allocation5 + $0x104] sm:$0xf] }
 0x11b   :  { %v1456_v62 = vunpack.c.l.b16 %v798_v7  ;;  %v317_v47 = vrot.slane %v316_v14, 2  ;;  %v372_v1 = vadd.f32 %v371_v41, %v370_v59  ;;  %v538_v24 = vadd.f32 %v188_v60, %v180_v35  ;;  %v5773_v6 = vld [vmem:[#allocation5 + $0x120] sm:$0xf0] }
 0x11c   :  { %v1518_v0 = vsel %vm1467_vm5, %v1448_v40, %v1517_v61  ;;  %v263_v4 = vrot.slane %v262_v15, 1  ;;  %v428_v9 = vadd.f32 %v427_v17, %v426_v12  ;;  %v483_v10 = vrot.slane %v482_v42, 4  ;;  %v8041_v35 = vld [vmem:[#allocation5 + $0x304] sm:$0xf] }
 0x11d   :  { %v1519_v63 = vsel %vm1469_vm6, %v1456_v62, %v1518_v0  ;;  %v318_v32 = vadd.f32 %v317_v47, %v316_v14  ;;  %v373_v26 = vrot.slane %v372_v1, 2  ;;  %v539_v31 = vrot.slane %v538_v24, 4  ;;  %v6029_v61 = vld [vmem:[#allocation5 + $0x320] sm:$0xf0] }
 0x11e   :  { %v8966_v16 = vpack.c.b16 %v1519_v63, %v1519_v63  ;;  %v264_v55 = vadd.f32 %v263_v4, %v262_v15  ;;  %v429_v33 = vrot.slane %v428_v9, 2  ;;  %v484_v36 = vadd.f32 %v483_v10, %v482_v42  ;;  %v8105_v17 = vld [vmem:[#allocation5 + $0x504] sm:$0xf] }
 0x11f   :  { %v594_v37 = vadd.f32 %v204_v19, %v196_v18  ;;  %v319_v38 = vrot.slane %v318_v32, 1  ;;  %v374_v21 = vadd.f32 %v373_v26, %v372_v1  ;;  %v540_v20 = vadd.f32 %v539_v31, %v538_v24  ;;  %v6285_v47 = vld [vmem:[#allocation5 + $0x520] sm:$0xf0] }
 0x120   :  { %4195 = vmatmul.bf16.vlgmr.msrb.gmra.mxu3 %v8966_v16  ;;  %v650_v22 = vadd.f32 %v220_v54, %v212_v25  ;;  %v430_v39 = vadd.f32 %v429_v33, %v428_v9  ;;  %v485_v44 = vrot.slane %v484_v36, 2  ;;  %v676_v48 = vmul.f32 0.0625, %v264_v55  ;;  %v8169_v1 = vld [vmem:[#allocation5 + $0x704] sm:$0xf] }
 0x121   :  { %v595_v45 = vrot.slane %v594_v37, 4  ;;  %v320_v46 = vadd.f32 %v319_v38, %v318_v32  ;;  %v375_v49 = vrot.slane %v374_v21, 1  ;;  %v541_v50 = vrot.slane %v540_v20, 2  ;;  %v6541_v24 = vld [vmem:[#allocation5 + $0x720] sm:$0xf0] }
 0x122   :  { %v651_v27 = vrot.slane %v650_v22, 4  ;;  %v431_v52 = vrot.slane %v430_v39, 1  ;;  %v486_v53 = vadd.f32 %v485_v44, %v484_v36  ;;  %v740_v57 = vpack.c.bf16 %v676_v48, %v676_v48  ;;  %v7969_v9 = vld [vmem:[#allocation5 + $0xc4] sm:$0xf] }
 0x123   :  { %v596_v28 = vadd.f32 %v595_v45, %v594_v37  ;;  %v376_v2 = vadd.f32 %v375_v49, %v374_v21  ;;  %v542_v3 = vadd.f32 %v541_v50, %v540_v20  ;;  %v684_v58 = vmul.f32 0.0625, %v320_v46  ;;  %v5741_v10 = vld [vmem:[#allocation5 + $0xe0] sm:$0xf0] }
 0x124   :  { %v652_v30 = vadd.f32 %v651_v27, %v650_v22  ;;  %v432_v34 = vadd.f32 %v431_v52, %v430_v39  ;;  %v487_v59 = vrot.slane %v486_v53, 1  ;;  %v1398_v8 = vunpack.c.l.b16 %v740_v57  ;;  %v8033_v33 = vld [vmem:[#allocation5 + $0x2c4] sm:$0xf] }
 0x125   :  { %v597_v7 = vrot.slane %v596_v28, 2  ;;  %v543_v60 = vrot.slane %v542_v3, 1  ;;  %v692_v12 = vmul.f32 0.0625, %v376_v2  ;;  %v748_v40 = vpack.c.bf16 %v684_v58, %v684_v58  ;;  %v5997_v36 = vld [vmem:[#allocation5 + $0x2e0] sm:$0xf0] }
 0x126   :  { %v653_v11 = vrot.slane %v652_v30, 2  ;;  %v488_v14 = vadd.f32 %v487_v59, %v486_v53  ;;  %v700_v62 = vmul.f32 0.0625, %v432_v34  ;;  %v5776_v15 = vor.u32 %v7977_v5, %v5773_v6  ;;  %v8097_v22 = vld [vmem:[#allocation5 + $0x4c4] sm:$0xf] }
 0x127   :  { %v598_v41 = vadd.f32 %v597_v7, %v596_v28  ;;  %v544_v42 = vadd.f32 %v543_v60, %v542_v3  ;;  %v756_v18 = vpack.c.bf16 %v692_v12, %v692_v12  ;;  %v1406_v19 = vunpack.c.l.b16 %v748_v40  ;;  %v6253_v39 = vld [vmem:[#allocation5 + $0x4e0] sm:$0xf0] }
 0x128   :  { %v654_v0 = vadd.f32 %v653_v11, %v652_v30  ;;  %v708_v25 = vmul.f32 0.0625, %v488_v14  ;;  %v764_v54 = vpack.c.bf16 %v700_v62, %v700_v62  ;;  %4203 = vmatpush.bf16.msra.mxu0 %v5776_v15  ;;  %v6032_v4 = vor.u32 %v8041_v35, %v6029_v61  ;;  %v8161_v44 = vld [vmem:[#allocation5 + $0x6c4] sm:$0xf] }
 0x129   :  { %v599_v63 = vrot.slane %v598_v41, 1  ;;  %v716_v26 = vmul.f32 0.0625, %v544_v42  ;;  %v1414_v31 = vunpack.c.l.b16 %v756_v18  ;;  %v1499_v55 = vsel %vm1457_vm0, %v1406_v19, %v1398_v8  ;;  %v6509_v50 = vld [vmem:[#allocation5 + $0x6e0] sm:$0xf0] }
 0x12a   :  { %v655_v32 = vrot.slane %v654_v0, 1  ;;  %v772_v38 = vpack.c.bf16 %v708_v25, %v708_v25  ;;  %v1422_v21 = vunpack.c.l.b16 %v764_v54  ;;  %4216 = vmatpush.bf16.msra.mxu1 %v6032_v4  ;;  %v6288_v20 = vor.u32 %v8105_v17, %v6285_v47  ;;  %v7961_v27 = vld [vmem:[#allocation5 + $0x84] sm:$0xf] }
 0x12b   :  { %v600_v37 = vadd.f32 %v599_v63, %v598_v41  ;;  %v780_v48 = vpack.c.bf16 %v716_v26, %v716_v26  ;;  %v1500_v46 = vsel %vm1459_vm1, %v1414_v31, %v1499_v55  ;;  %v6544_v49 = vor.u32 %v8169_v1, %v6541_v24  ;;  %v5709_v52 = vld [vmem:[#allocation5 + $0xa0] sm:$0xf0] }
 0x12c   :  { %v656_v45 = vadd.f32 %v655_v32, %v654_v0  ;;  %v1430_v28 = vunpack.c.l.b16 %v772_v38  ;;  %v1501_v57 = vsel %vm1461_vm2, %v1422_v21, %v1500_v46  ;;  %4229 = vmatpush.bf16.msra.mxu2 %v6288_v20  ;;  %v5744_v2 = vor.u32 %v7969_v9, %v5741_v10  ;;  %v8025_v3 = vld [vmem:[#allocation5 + $0x284] sm:$0xf] }
 0x12d   :  { %v724_v53 = vmul.f32 0.0625, %v600_v37  ;;  %v5965_v30 = vld [vmem:[#allocation5 + $0x2a0] sm:$0xf0]  ;;  %v1438_v5 = vunpack.c.l.b16 %v780_v48  ;;  %4242 = vmatpush.bf16.msra.mxu3 %v6544_v49  ;;  %v6000_v6 = vor.u32 %v8033_v33, %v5997_v36  ;;  %v6256_v34 = vor.u32 %v8097_v22, %v6253_v39 }
 0x12e   :  { %v732_v58 = vmul.f32 0.0625, %v656_v45  ;;  %v8089_v59 = vld [vmem:[#allocation5 + $0x484] sm:$0xf]  ;;  %v1502_v35 = vsel %vm1463_vm3, %v1430_v28, %v1501_v57  ;;  %4204 = vmatpush.bf16.msra.mxu0 %v5744_v2  ;;  %v6512_v60 = vor.u32 %v8161_v44, %v6509_v50  ;;  %v5712_v11 = vor.u32 %v7961_v27, %v5709_v52 }
 0x12f   :  { %v6221_v7 = vld [vmem:[#allocation5 + $0x4a0] sm:$0xf0]  ;;  %v788_v8 = vpack.c.bf16 %v724_v53, %v724_v53  ;;  %v1503_v14 = vsel %vm1465_vm4, %v1438_v5, %v1502_v35  ;;  %4217 = vmatpush.bf16.msra.mxu1 %v6000_v6  ;;  %v5968_v41 = vor.u32 %v8025_v3, %v5965_v30 }
 0x130   :  { %v8153_v12 = vld [vmem:[#allocation5 + $0x684] sm:$0xf]  ;;  %v796_v61 = vpack.c.bf16 %v732_v58, %v732_v58  ;;  %4230 = vmatpush.bf16.msra.mxu2 %v6256_v34  ;;  %v6224_v42 = vor.u32 %v8089_v59, %v6221_v7 }
 0x131   :  { %v6477_v40 = vld [vmem:[#allocation5 + $0x6a0] sm:$0xf0]  ;;  %v1446_v17 = vunpack.c.l.b16 %v788_v8  ;;  %4243 = vmatpush.bf16.msra.mxu3 %v6512_v60 }
 0x132   :  { %v7953_v62 = vld [vmem:[#allocation5 + $0x44] sm:$0xf]  ;;  %v1454_v19 = vunpack.c.l.b16 %v796_v61  ;;  %v6480_v47 = vor.u32 %v8153_v12, %v6477_v40  ;;  %4205 = vmatpush.bf16.msra.mxu0 %v5712_v11 }
 0x133   :  { %v5677_v15 = vld [vmem:[#allocation5 + $0x60] sm:$0xf0]  ;;  %v1504_v25 = vsel %vm1467_vm5, %v1446_v17, %v1503_v14  ;;  %4218 = vmatpush.bf16.msra.mxu1 %v5968_v41 }
 0x134   :  { %v8017_v0 = vld [vmem:[#allocation5 + $0x244] sm:$0xf]  ;;  %v5680_v54 = vor.u32 %v7953_v62, %v5677_v15  ;;  %v1505_v32 = vsel %vm1469_vm6, %v1454_v19, %v1504_v25  ;;  %4231 = vmatpush.bf16.msra.mxu2 %v6224_v42 }
 0x135   :  { %v5933_v18 = vld [vmem:[#allocation5 + $0x260] sm:$0xf0]  ;;  %v8976_v36 = vpack.c.b16 %v1505_v32, %v1505_v32  ;;  %4244 = vmatpush.bf16.msra.mxu3 %v6480_v47 }
 0x136   :  { %v8081_v1 = vld [vmem:[#allocation5 + $0x444] sm:$0xf]  ;;  %v5936_v26 = vor.u32 %v8017_v0, %v5933_v18  ;;  %4206 = vmatpush.bf16.msra.mxu0 %v5680_v54 }
 0x137   :  { %v6189_v24 = vld [vmem:[#allocation5 + $0x460] sm:$0xf0]  ;;  %4169 = vmatmul.bf16.vlgmr.msrb.gmra.mxu1 %v8976_v36 }
 0x138   :  { %v8145_v63 = vld [vmem:[#allocation5 + $0x644] sm:$0xf]  ;;  %v6192_v37 = vor.u32 %v8081_v1, %v6189_v24  ;;  %4219 = vmatpush.bf16.msra.mxu1 %v5936_v26 }
 0x139   :  { %v6445_v4 = vld [vmem:[#allocation5 + $0x660] sm:$0xf0] }
 0x13a   :  { %v7945_v9 = vld [vmem:[#allocation5 + $0x4] sm:$0xf]  ;;  %v6448_v22 = vor.u32 %v8145_v63, %v6445_v4  ;;  %4232 = vmatpush.bf16.msra.mxu2 %v6192_v37 }
 0x13b   :  { %v5645_v10 = vld [vmem:[#allocation5 + $0x20] sm:$0xf0] }
 0x13c   :  { %v8009_v31 = vld [vmem:[#allocation5 + $0x204] sm:$0xf]  ;;  %v5648_v48 = vor.u32 %v7945_v9, %v5645_v10  ;;  %4245 = vmatpush.bf16.msra.mxu3 %v6448_v22 }
 0x13d   :  { %v5901_v55 = vld [vmem:[#allocation5 + $0x220] sm:$0xf0] }
 0x13e   :  { %v8073_v33 = vld [vmem:[#allocation5 + $0x404] sm:$0xf]  ;;  %v5904_v27 = vor.u32 %v8009_v31, %v5901_v55  ;;  %4207 = vmatpush.bf16.msra.mxu0 %v5648_v48 }
 0x13f   :  { %v6157_v38 = vld [vmem:[#allocation5 + $0x420] sm:$0xf0] }
 0x140   :  { %v8257_v21 = vld [vmem:[#allocation5 + $0x9c4] sm:$0xf]  ;;  %v6160_v57 = vor.u32 %v8073_v33, %v6157_v38  ;;  %4220 = vmatpush.bf16.msra.mxu1 %v5904_v27 }
 0x141   :  { %v6893_v20 = vld [vmem:[#allocation5 + $0x9e0] sm:$0xf0]  ;;  %4208 = vmatmul.bf16.vlgmr.msra.gmra.mxu0 %v8904_v29 }
 0x142   :  { %v8137_v39 = vld [vmem:[#allocation5 + $0x604] sm:$0xf]  ;;  %v6896_v52 = vor.u32 %v8257_v21, %v6893_v20  ;;  %4233 = vmatpush.bf16.msra.mxu2 %v6160_v57 }
 0x143   :  { %v8321_v44 = vld [vmem:[#allocation5 + $0xbc4] sm:$0xf] }
 0x144   :  { %v7149_v45 = vld [vmem:[#allocation5 + $0xbe0] sm:$0xf0]  ;;  %4252 = vmatpush.bf16.msrb.mxu0 %v6896_v52 }
 0x145   :  { %v6413_v46 = vld [vmem:[#allocation5 + $0x620] sm:$0xf0]  ;;  %v7152_v2 = vor.u32 %v8321_v44, %v7149_v45  ;;  %4234 = vmatmul.bf16.vlgmr.msra.gmra.mxu2 %v8894_v13 }
 0x146   :  { %v8385_v49 = vld [vmem:[#allocation5 + $0xdc4] sm:$0xf]  ;;  %v6416_v58 = vor.u32 %v8137_v39, %v6413_v46 }
 0x147   :  { %v7405_v50 = vld [vmem:[#allocation5 + $0xde0] sm:$0xf0]  ;;  %4265 = vmatpush.bf16.msrb.mxu1 %v7152_v2 }
 0x148   :  { %v8449_v53 = vld [vmem:[#allocation5 + $0xfc4] sm:$0xf]  ;;  %v7408_v5 = vor.u32 %v8385_v49, %v7405_v50  ;;  %4246 = vmatpush.bf16.msra.mxu3 %v6416_v58  ;;  %4221 = vmatmul.bf16.vlgmr.msra.gmra.mxu1 %v8936_v56 }
 0x149   :  { %v7661_v28 = vld [vmem:[#allocation5 + $0xfe0] sm:$0xf0] }
 0x14a   :  { %v8249_v3 = vld [vmem:[#allocation5 + $0x984] sm:$0xf]  ;;  %v7664_v59 = vor.u32 %v8449_v53, %v7661_v28  ;;  %4278 = vmatpush.bf16.msrb.mxu2 %v7408_v5 }
 0x14b   :  { %v6861_v30 = vld [vmem:[#allocation5 + $0x9a0] sm:$0xf0]  ;;  %4247 = vmatmul.bf16.vlgmr.msra.gmra.mxu3 %v8914_v23 }
 0x14c   :  { %v8313_v6 = vld [vmem:[#allocation5 + $0xb84] sm:$0xf]  ;;  %v6864_v35 = vor.u32 %v8249_v3, %v6861_v30  ;;  %4291 = vmatpush.bf16.msrb.mxu3 %v7664_v59 }
 0x14d   :  { %v7117_v34 = vld [vmem:[#allocation5 + $0xba0] sm:$0xf0] }
 0x14e   :  { %v8377_v7 = vld [vmem:[#allocation5 + $0xd84] sm:$0xf]  ;;  %v7120_v12 = vor.u32 %v8313_v6, %v7117_v34  ;;  %4253 = vmatpush.bf16.msrb.mxu0 %v6864_v35 }
 0x14f   :  { %v7373_v8 = vld [vmem:[#allocation5 + $0xda0] sm:$0xf0] }
 0x150   :  { %v8441_v60 = vld [vmem:[#allocation5 + $0xf84] sm:$0xf]  ;;  %v7376_v14 = vor.u32 %v8377_v7, %v7373_v8  ;;  %4266 = vmatpush.bf16.msrb.mxu1 %v7120_v12 }
 0x151   :  { %v7629_v11 = vld [vmem:[#allocation5 + $0xfa0] sm:$0xf0] }
 0x152   :  { %v8241_v40 = vld [vmem:[#allocation5 + $0x944] sm:$0xf]  ;;  %v7632_v15 = vor.u32 %v8441_v60, %v7629_v11  ;;  %4279 = vmatpush.bf16.msrb.mxu2 %v7376_v14 }
 0x153   :  { %v6829_v61 = vld [vmem:[#allocation5 + $0x960] sm:$0xf0] }
 0x154   :  { %v8305_v41 = vld [vmem:[#allocation5 + $0xb44] sm:$0xf]  ;;  %v6832_v0 = vor.u32 %v8241_v40, %v6829_v61  ;;  %4292 = vmatpush.bf16.msrb.mxu3 %v7632_v15 }
 0x155   :  { %v7085_v62 = vld [vmem:[#allocation5 + $0xb60] sm:$0xf0] }
 0x156   :  { %v8369_v17 = vld [vmem:[#allocation5 + $0xd44] sm:$0xf]  ;;  %v7088_v47 = vor.u32 %v8305_v41, %v7085_v62  ;;  %4254 = vmatpush.bf16.msrb.mxu0 %v6832_v0 }
 0x157   :  { %v7341_v42 = vld [vmem:[#allocation5 + $0xd60] sm:$0xf0] }
 0x158   :  { %v8433_v18 = vld [vmem:[#allocation5 + $0xf44] sm:$0xf]  ;;  %v7344_v63 = vor.u32 %v8369_v17, %v7341_v42  ;;  %4267 = vmatpush.bf16.msrb.mxu1 %v7088_v47  ;;  %v5875_v47 = vld [vmem:[#allocation5 + $0x1c8] sm:$0xf] }
 0x159   :  { %v7597_v19 = vld [vmem:[#allocation5 + $0xf60] sm:$0xf0] }
 0x15a   :  { %v8233_v1 = vld [vmem:[#allocation5 + $0x904] sm:$0xf]  ;;  %v7600_v4 = vor.u32 %v8433_v18, %v7597_v19  ;;  %4280 = vmatpush.bf16.msrb.mxu2 %v7344_v63 }
 0x15b   :  { %v6797_v24 = vld [vmem:[#allocation5 + $0x920] sm:$0xf0] }
 0x15c   :  { %v8297_v25 = vld [vmem:[#allocation5 + $0xb04] sm:$0xf]  ;;  %v6800_v32 = vor.u32 %v8233_v1, %v6797_v24  ;;  %4293 = vmatpush.bf16.msrb.mxu3 %v7600_v4  ;;  %v8006_v1 = vld [vmem:[#allocation5 + $0x1e4] sm:$0xf0] }
 0x15d   :  { %v7053_v54 = vld [vmem:[#allocation5 + $0xb20] sm:$0xf0] }
 0x15e   :  { %v8361_v9 = vld [vmem:[#allocation5 + $0xd04] sm:$0xf]  ;;  %v7056_v55 = vor.u32 %v8297_v25, %v7053_v54  ;;  %4255 = vmatpush.bf16.msrb.mxu0 %v6800_v32  ;;  %v6131_v25 = vld [vmem:[#allocation5 + $0x3c8] sm:$0xf] }
 0x15f   :  { %v7309_v10 = vld [vmem:[#allocation5 + $0xd20] sm:$0xf0]  ;;  %v8070_v54 = vld [vmem:[#allocation5 + $0x3e4] sm:$0xf0] }
 0x160   :  { %v8425_v26 = vld [vmem:[#allocation5 + $0xf04] sm:$0xf]  ;;  %v7312_v38 = vor.u32 %v8361_v9, %v7309_v10  ;;  %4268 = vmatpush.bf16.msrb.mxu1 %v7056_v55  ;;  %v6387_v10 = vld [vmem:[#allocation5 + $0x5c8] sm:$0xf] }
 0x161   :  { %v7565_v31 = vld [vmem:[#allocation5 + $0xf20] sm:$0xf0]  ;;  %v8134_v32 = vld [vmem:[#allocation5 + $0x5e4] sm:$0xf0] }
 0x162   :  { %v8225_v33 = vld [vmem:[#allocation5 + $0x8c4] sm:$0xf]  ;;  %v7568_v22 = vor.u32 %v8425_v26, %v7565_v31  ;;  %4281 = vmatpush.bf16.msrb.mxu2 %v7312_v38  ;;  %v5876_v31 = vor.u32 %v8006_v1, %v5875_v47  ;;  %v6643_v55 = vld [vmem:[#allocation5 + $0x7c8] sm:$0xf]  ;;  %v6132_v38 = vor.u32 %v8070_v54, %v6131_v25 }
 0x163   :  { %v6765_v37 = vld [vmem:[#allocation5 + $0x8e0] sm:$0xf0]  ;;  %v6003_v47 = vld [vmem:[#allocation5 + $0x2c8] sm:$0xf] }
 0x164   :  { %v8289_v21 = vld [vmem:[#allocation5 + $0xac4] sm:$0xf]  ;;  %v6768_v45 = vor.u32 %v8225_v33, %v6765_v37  ;;  %4294 = vmatpush.bf16.msrb.mxu3 %v7568_v22  ;;  %v8198_v33 = vld [vmem:[#allocation5 + $0x7e4] sm:$0xf0] }
 0x165   :  { %v7021_v20 = vld [vmem:[#allocation5 + $0xae0] sm:$0xf0]  ;;  %v8038_v1 = vld [vmem:[#allocation5 + $0x2e4] sm:$0xf0] }
 0x166   :  { %v8353_v39 = vld [vmem:[#allocation5 + $0xcc4] sm:$0xf]  ;;  %v7024_v49 = vor.u32 %v8289_v21, %v7021_v20  ;;  %4256 = vmatpush.bf16.msrb.mxu0 %v6768_v45  ;;  %v5843_v21 = vld [vmem:[#allocation5 + $0x188] sm:$0xf] }
 0x167   :  { %v7277_v44 = vld [vmem:[#allocation5 + $0xce0] sm:$0xf0]  ;;  %v7998_v20 = vld [vmem:[#allocation5 + $0x1a4] sm:$0xf0] }
 0x168   :  { %v8417_v48 = vld [vmem:[#allocation5 + $0xec4] sm:$0xf]  ;;  %v7280_v52 = vor.u32 %v8353_v39, %v7277_v44  ;;  %4269 = vmatpush.bf16.msrb.mxu1 %v7024_v49  ;;  %v6388_v39 = vor.u32 %v8134_v32, %v6387_v10  ;;  %v6099_v44 = vld [vmem:[#allocation5 + $0x388] sm:$0xf]  ;;  %v6004_v10 = vor.u32 %v8038_v1, %v6003_v47 }
 0x169   :  { %v7533_v46 = vld [vmem:[#allocation5 + $0xee0] sm:$0xf0]  ;;  %v8062_v45 = vld [vmem:[#allocation5 + $0x3a4] sm:$0xf0] }
 0x16a   :  { %v8217_v50 = vld [vmem:[#allocation5 + $0x884] sm:$0xf]  ;;  %v7536_v57 = vor.u32 %v8417_v48, %v7533_v46  ;;  %4282 = vmatpush.bf16.msrb.mxu2 %v7280_v52  ;;  %v6644_v48 = vor.u32 %v8198_v33, %v6643_v55  ;;  %v6355_v46 = vld [vmem:[#allocation5 + $0x588] sm:$0xf] }
 0x16b   :  { %v6733_v27 = vld [vmem:[#allocation5 + $0x8a0] sm:$0xf0]  ;;  %v8126_v49 = vld [vmem:[#allocation5 + $0x5a4] sm:$0xf0] }
 0x16c   :  { %v8281_v53 = vld [vmem:[#allocation5 + $0xa84] sm:$0xf]  ;;  %v6736_v30 = vor.u32 %v8217_v50, %v6733_v27  ;;  %4295 = vmatpush.bf16.msrb.mxu3 %v7536_v57  ;;  %v5844_v50 = vor.u32 %v7998_v20, %v5843_v21  ;;  %v6611_v27 = vld [vmem:[#allocation5 + $0x788] sm:$0xf] }
 0x16d   :  { %v6989_v28 = vld [vmem:[#allocation5 + $0xaa0] sm:$0xf0]  ;;  %v8190_v52 = vld [vmem:[#allocation5 + $0x7a4] sm:$0xf0] }
 0x16e   :  { %v8345_v2 = vld [vmem:[#allocation5 + $0xc84] sm:$0xf]  ;;  %v6992_v6 = vor.u32 %v8281_v53, %v6989_v28  ;;  %4257 = vmatpush.bf16.msrb.mxu0 %v6736_v30  ;;  %v6100_v53 = vor.u32 %v8062_v45, %v6099_v44  ;;  %v5811_v28 = vld [vmem:[#allocation5 + $0x148] sm:$0xf] }
 0x16f   :  { %v7245_v3 = vld [vmem:[#allocation5 + $0xca0] sm:$0xf0]  ;;  %v7990_v57 = vld [vmem:[#allocation5 + $0x164] sm:$0xf0] }
 0x170   :  { %v8409_v58 = vld [vmem:[#allocation5 + $0xe84] sm:$0xf]  ;;  %v7248_v7 = vor.u32 %v8345_v2, %v7245_v3  ;;  %4270 = vmatpush.bf16.msrb.mxu1 %v6992_v6  ;;  %v6356_v2 = vor.u32 %v8126_v49, %v6355_v46  ;;  %v6067_v3 = vld [vmem:[#allocation5 + $0x348] sm:$0xf] }
 0x171   :  { %v7501_v5 = vld [vmem:[#allocation5 + $0xea0] sm:$0xf0]  ;;  %v8054_v30 = vld [vmem:[#allocation5 + $0x364] sm:$0xf0] }
 0x172   :  { %v8209_v34 = vld [vmem:[#allocation5 + $0x844] sm:$0xf]  ;;  %v7504_v60 = vor.u32 %v8409_v58, %v7501_v5  ;;  %4283 = vmatpush.bf16.msrb.mxu2 %v7248_v7  ;;  %v6612_v58 = vor.u32 %v8190_v52, %v6611_v27  ;;  %v6323_v5 = vld [vmem:[#allocation5 + $0x548] sm:$0xf] }
 0x173   :  { %v6701_v59 = vld [vmem:[#allocation5 + $0x860] sm:$0xf0]  ;;  %v8118_v6 = vld [vmem:[#allocation5 + $0x564] sm:$0xf0] }
 0x174   :  { %v8273_v8 = vld [vmem:[#allocation5 + $0xa44] sm:$0xf]  ;;  %v6704_v61 = vor.u32 %v8209_v34, %v6701_v59  ;;  %4296 = vmatpush.bf16.msrb.mxu3 %v7504_v60  ;;  %v5812_v34 = vor.u32 %v7990_v57, %v5811_v28  ;;  %v6579_v59 = vld [vmem:[#allocation5 + $0x748] sm:$0xf] }
 0x175   :  { %v6957_v35 = vld [vmem:[#allocation5 + $0xa60] sm:$0xf0]  ;;  %v8182_v7 = vld [vmem:[#allocation5 + $0x764] sm:$0xf0] }
 0x176   :  { %v8337_v11 = vld [vmem:[#allocation5 + $0xc44] sm:$0xf]  ;;  %v6960_v15 = vor.u32 %v8273_v8, %v6957_v35  ;;  %4258 = vmatpush.bf16.msrb.mxu0 %v6704_v61  ;;  %v6068_v8 = vor.u32 %v8054_v30, %v6067_v3  ;;  %v5779_v35 = vld [vmem:[#allocation5 + $0x108] sm:$0xf]  ;;  %v6580_v61 = vor.u32 %v8182_v7, %v6579_v59 }
 0x177   :  { %v7213_v12 = vld [vmem:[#allocation5 + $0xc60] sm:$0xf0]  ;;  %v7982_v60 = vld [vmem:[#allocation5 + $0x124] sm:$0xf0] }
 0x178   :  { %v8401_v40 = vld [vmem:[#allocation5 + $0xe44] sm:$0xf]  ;;  %v7216_v18 = vor.u32 %v8337_v11, %v7213_v12  ;;  %4271 = vmatpush.bf16.msrb.mxu1 %v6960_v15  ;;  %v6324_v11 = vor.u32 %v8118_v6, %v6323_v5  ;;  %v6035_v12 = vld [vmem:[#allocation5 + $0x308] sm:$0xf] }
 0x179   :  { %v7469_v14 = vld [vmem:[#allocation5 + $0xe60] sm:$0xf0]  ;;  %v6547_v15 = vld [vmem:[#allocation5 + $0x708] sm:$0xf] }
 0x17a   :  { %v8201_v41 = vld [vmem:[#allocation5 + $0x804] sm:$0xf]  ;;  %v7472_v24 = vor.u32 %v8401_v40, %v7469_v14  ;;  %4284 = vmatpush.bf16.msrb.mxu2 %v7216_v18  ;;  %v8046_v40 = vld [vmem:[#allocation5 + $0x324] sm:$0xf0] }
 0x17b   :  { %v6669_v62 = vld [vmem:[#allocation5 + $0x820] sm:$0xf0]  ;;  %v6291_v14 = vld [vmem:[#allocation5 + $0x508] sm:$0xf] }
 0x17c   :  { %v8265_v17 = vld [vmem:[#allocation5 + $0xa04] sm:$0xf]  ;;  %v6672_v4 = vor.u32 %v8201_v41, %v6669_v62  ;;  %4297 = vmatpush.bf16.msrb.mxu3 %v7472_v24  ;;  %v8110_v41 = vld [vmem:[#allocation5 + $0x524] sm:$0xf0]  ;;  %v5780_v62 = vor.u32 %v7982_v60, %v5779_v35 }
 0x17d   :  { %v6925_v42 = vld [vmem:[#allocation5 + $0xa20] sm:$0xf0]  ;;  %v7974_v18 = vld [vmem:[#allocation5 + $0xe4] sm:$0xf0] }
 0x17e   :  { %v8329_v0 = vld [vmem:[#allocation5 + $0xc04] sm:$0xf]  ;;  %v6928_v26 = vor.u32 %v8265_v17, %v6925_v42  ;;  %4259 = vmatpush.bf16.msrb.mxu0 %v6672_v4  ;;  %v8174_v17 = vld [vmem:[#allocation5 + $0x724] sm:$0xf0]  ;;  %v6036_v42 = vor.u32 %v8046_v40, %v6035_v12 }
 0x17f   :  { %v7181_v19 = vld [vmem:[#allocation5 + $0xc20] sm:$0xf0]  ;;  %v6548_v24 = vor.u32 %v8174_v17, %v6547_v15  ;;  %v8102_v25 = vld [vmem:[#allocation5 + $0x4e4] sm:$0xf0] }
 0x180   :  { %v8393_v63 = vld [vmem:[#allocation5 + $0xe04] sm:$0xf]  ;;  %v7184_v37 = vor.u32 %v8329_v0, %v7181_v19  ;;  %4272 = vmatpush.bf16.msrb.mxu1 %v6928_v26  ;;  %v5747_v0 = vld [vmem:[#allocation5 + $0xc8] sm:$0xf]  ;;  %v6292_v19 = vor.u32 %v8110_v41, %v6291_v14 }
 0x181   :  { %v7437_v9 = vld [vmem:[#allocation5 + $0xe20] sm:$0xf0]  ;;  %4260 = vmatmul.bf16.vlgmr.msrb.gmra.mxu0 %v8956_v43  ;;  %v5748_v54 = vor.u32 %v7974_v18, %v5747_v0  ;;  %v6515_v4 = vld [vmem:[#allocation5 + $0x6c8] sm:$0xf] }
 0x182   :  { %v7440_v22 = vor.u32 %v8393_v63, %v7437_v9  ;;  %4304 = vmatpush.bf16.msra.mxu0 %v5876_v31  ;;  %4285 = vmatpush.bf16.msrb.mxu2 %v7184_v37  ;;  %v6259_v63 = vld [vmem:[#allocation5 + $0x4c8] sm:$0xf] }
 0x183   :  { %4273 = vmatmul.bf16.vlgmr.msrb.gmra.mxu1 %v8976_v36  ;;  %v8166_v9 = vld [vmem:[#allocation5 + $0x6e4] sm:$0xf0]  ;;  %v6260_v31 = vor.u32 %v8102_v25, %v6259_v63 }
 0x184   :  { %4317 = vmatpush.bf16.msra.mxu1 %v6132_v38  ;;  %4298 = vmatpush.bf16.msrb.mxu3 %v7440_v22  ;;  %v5715_v32 = vld [vmem:[#allocation5 + $0x88] sm:$0xf]  ;;  %v6516_v37 = vor.u32 %v8166_v9, %v6515_v4 }
 0x185   :  { %4286 = vmatmul.bf16.vlgmr.msrb.gmra.mxu2 %v8946_v51  ;;  %v7966_v26 = vld [vmem:[#allocation5 + $0xa4] sm:$0xf0] }
 0x186   :  { %4330 = vmatpush.bf16.msra.mxu2 %v6388_v39  ;;  %4305 = vmatpush.bf16.msra.mxu0 %v5844_v50  ;;  %v5971_v55 = vld [vmem:[#allocation5 + $0x288] sm:$0xf]  ;;  %v5716_v20 = vor.u32 %v7966_v26, %v5715_v32 }
 0x187   :  { %4299 = vmatmul.bf16.vlgmr.msrb.gmra.mxu3 %v8966_v16  ;;  %v8030_v33 = vld [vmem:[#allocation5 + $0x2a4] sm:$0xf0] }
 0x188   :  { %4343 = vmatpush.bf16.msra.mxu3 %v6644_v48  ;;  %4318 = vmatpush.bf16.msra.mxu1 %v6100_v53  ;;  %v6227_v38 = vld [vmem:[#allocation5 + $0x488] sm:$0xf]  ;;  %v5972_v44 = vor.u32 %v8030_v33, %v5971_v55 }
 0x189   :  { %v8094_v21 = vld [vmem:[#allocation5 + $0x4a4] sm:$0xf0] }
 0x18a   :  { %4331 = vmatpush.bf16.msra.mxu2 %v6356_v2  ;;  %4306 = vmatpush.bf16.msra.mxu0 %v5812_v34  ;;  %v6483_v22 = vld [vmem:[#allocation5 + $0x688] sm:$0xf]  ;;  %v6228_v46 = vor.u32 %v8094_v21, %v6227_v38  ;;  %v8987_v38 = vld [vmem:[#allocation7] sm:$0xff]  ;;  %v4105_v21 = vpop.f32.mrf.mxu0 }
 0x18b   :  { %v8158_v39 = vld [vmem:[#allocation5 + $0x6a4] sm:$0xf0] }
 0x18c   :  { %4344 = vmatpush.bf16.msra.mxu3 %v6612_v58  ;;  %4319 = vmatpush.bf16.msra.mxu1 %v6068_v8  ;;  %v5683_v45 = vld [vmem:[#allocation5 + $0x48] sm:$0xf]  ;;  %v6484_v27 = vor.u32 %v8158_v39, %v6483_v22 }
 0x18d   :  { %v7958_v48 = vld [vmem:[#allocation5 + $0x64] sm:$0xf0] }
 0x18e   :  { %4332 = vmatpush.bf16.msra.mxu2 %v6324_v11  ;;  %4307 = vmatpush.bf16.msra.mxu0 %v5780_v62  ;;  %v5939_v49 = vld [vmem:[#allocation5 + $0x248] sm:$0xf]  ;;  %v5684_v57 = vor.u32 %v7958_v48, %v5683_v45 }
 0x18f   :  { %v8022_v50 = vld [vmem:[#allocation5 + $0x264] sm:$0xf0] }
 0x190   :  { %4345 = vmatpush.bf16.msra.mxu3 %v6580_v61  ;;  %4320 = vmatpush.bf16.msra.mxu1 %v6036_v42  ;;  %v6195_v52 = vld [vmem:[#allocation5 + $0x448] sm:$0xf]  ;;  %v5940_v58 = vor.u32 %v8022_v50, %v5939_v49 }
 0x191   :  { %v8086_v53 = vld [vmem:[#allocation5 + $0x464] sm:$0xf0] }
 0x192   :  { %4333 = vmatpush.bf16.msra.mxu2 %v6292_v19  ;;  %4308 = vmatpush.bf16.msra.mxu0 %v5748_v54  ;;  %v6451_v28 = vld [vmem:[#allocation5 + $0x648] sm:$0xf]  ;;  %v6196_v59 = vor.u32 %v8086_v53, %v6195_v52  ;;  %v4118_v53 = vpop.f32.mrf.mxu1 }
 0x193   :  { %v8150_v2 = vld [vmem:[#allocation5 + $0x664] sm:$0xf0] }
 0x194   :  { %4346 = vmatpush.bf16.msra.mxu3 %v6548_v24  ;;  %4321 = vmatpush.bf16.msra.mxu1 %v6004_v10  ;;  %v5651_v3 = vld [vmem:[#allocation5 + $0x8] sm:$0xf]  ;;  %v6452_v60 = vor.u32 %v8150_v2, %v6451_v28  ;;  %v4131_v28 = vpop.f32.mrf.mxu2 }
 0x195   :  { %v7950_v30 = vld [vmem:[#allocation5 + $0x24] sm:$0xf0] }
 0x196   :  { %4334 = vmatpush.bf16.msra.mxu2 %v6260_v31  ;;  %4309 = vmatpush.bf16.msra.mxu0 %v5716_v20  ;;  %v5907_v5 = vld [vmem:[#allocation5 + $0x208] sm:$0xf]  ;;  %v5652_v61 = vor.u32 %v7950_v30, %v5651_v3 }
 0x197   :  { %v8014_v6 = vld [vmem:[#allocation5 + $0x224] sm:$0xf0] }
 0x198   :  { %4347 = vmatpush.bf16.msra.mxu3 %v6516_v37  ;;  %4322 = vmatpush.bf16.msra.mxu1 %v5972_v44  ;;  %v6163_v34 = vld [vmem:[#allocation5 + $0x408] sm:$0xf]  ;;  %v5908_v15 = vor.u32 %v8014_v6, %v5907_v5  ;;  %v1313_v44 = vperm.slane %v8987_v38, 0 }
 0x199   :  { %v8078_v7 = vld [vmem:[#allocation5 + $0x424] sm:$0xf0] }
 0x19a   :  { %4335 = vmatpush.bf16.msra.mxu2 %v6228_v46  ;;  %v6899_v8 = vld [vmem:[#allocation5 + $0x9c8] sm:$0xf]  ;;  %4310 = vmatpush.bf16.msra.mxu0 %v5684_v57  ;;  %v6164_v18 = vor.u32 %v8078_v7, %v6163_v34  ;;  %v4106_v52 = vadd.f32 %v4105_v21, %v1313_v44 }
 0x19b   :  { %v8262_v35 = vld [vmem:[#allocation5 + $0x9e4] sm:$0xf0] }
 0x19c   :  { %4348 = vmatpush.bf16.msra.mxu3 %v6484_v27  ;;  %v6419_v11 = vld [vmem:[#allocation5 + $0x608] sm:$0xf]  ;;  %4323 = vmatpush.bf16.msra.mxu1 %v5940_v58  ;;  %v6900_v17 = vor.u32 %v8262_v35, %v6899_v8  ;;  %v4119_v6 = vadd.f32 %v4118_v53, %v4106_v52 }
 0x19d   :  { %v7155_v12 = vld [vmem:[#allocation5 + $0xbc8] sm:$0xf] }
 0x19e   :  { %v8326_v40 = vld [vmem:[#allocation5 + $0xbe4] sm:$0xf0]  ;;  %4336 = vmatpush.bf16.msra.mxu2 %v6196_v59  ;;  %4311 = vmatpush.bf16.msra.mxu0 %v5652_v61 }
 0x19f   :  { %v8142_v14 = vld [vmem:[#allocation5 + $0x624] sm:$0xf0]  ;;  %v7156_v19 = vor.u32 %v8326_v40, %v7155_v12  ;;  %v4144_v12 = vpop.f32.mrf.mxu3 }
 0x1a0   :  { %v7411_v41 = vld [vmem:[#allocation5 + $0xdc8] sm:$0xf]  ;;  %4349 = vmatpush.bf16.msra.mxu3 %v6452_v60  ;;  %v6420_v24 = vor.u32 %v8142_v14, %v6419_v11  ;;  %4324 = vmatpush.bf16.msra.mxu1 %v5908_v15  ;;  %v4132_v11 = vadd.f32 %v4131_v28, %v4119_v6 }
 0x1a1   :  { %v8390_v62 = vld [vmem:[#allocation5 + $0xde4] sm:$0xf0]  ;;  %4312 = vmatmul.bf16.vlgmr.msra.gmra.mxu0 %v8904_v29 }
 0x1a2   :  { %v7667_v42 = vld [vmem:[#allocation5 + $0xfc8] sm:$0xf]  ;;  %v7412_v63 = vor.u32 %v8390_v62, %v7411_v41  ;;  %4356 = vmatpush.bf16.msrb.mxu0 %v6900_v17  ;;  %4337 = vmatpush.bf16.msra.mxu2 %v6164_v18  ;;  %v4107_v41 = vpop.f32.mrf.mxu0 }
 0x1a3   :  { %v8454_v0 = vld [vmem:[#allocation5 + $0xfe4] sm:$0xf0]  ;;  %4325 = vmatmul.bf16.vlgmr.msra.gmra.mxu1 %v8936_v56 }
 0x1a4   :  { %v6867_v47 = vld [vmem:[#allocation5 + $0x988] sm:$0xf]  ;;  %v7668_v4 = vor.u32 %v8454_v0, %v7667_v42  ;;  %4369 = vmatpush.bf16.msrb.mxu1 %v7156_v19  ;;  %4350 = vmatpush.bf16.msra.mxu3 %v6420_v24  ;;  %v4145_v42 = vadd.f32 %v4144_v12, %v4132_v11 }
 0x1a5   :  { %v8254_v1 = vld [vmem:[#allocation5 + $0x9a4] sm:$0xf0]  ;;  %4338 = vmatmul.bf16.vlgmr.msra.gmra.mxu2 %v8894_v13 }
 0x1a6   :  { %v7123_v25 = vld [vmem:[#allocation5 + $0xb88] sm:$0xf]  ;;  %v6868_v32 = vor.u32 %v8254_v1, %v6867_v47  ;;  %4382 = vmatpush.bf16.msrb.mxu2 %v7412_v63  ;;  %v4120_v63 = vpop.f32.mrf.mxu1 }
 0x1a7   :  { %v8318_v54 = vld [vmem:[#allocation5 + $0xba4] sm:$0xf0]  ;;  %4351 = vmatmul.bf16.vlgmr.msra.gmra.mxu3 %v8914_v23  ;;  %v5845_v63 = vld [vmem:[#allocation5 + $0x1a8] sm:$0xf0] }
 0x1a8   :  { %v7379_v9 = vld [vmem:[#allocation5 + $0xd88] sm:$0xf]  ;;  %v7124_v55 = vor.u32 %v8318_v54, %v7123_v25  ;;  %4395 = vmatpush.bf16.msrb.mxu3 %v7668_v4  ;;  %4357 = vmatpush.bf16.msrb.mxu0 %v6868_v32  ;;  %v4133_v25 = vpop.f32.mrf.mxu2 }
 0x1a9   :  { %v8382_v10 = vld [vmem:[#allocation5 + $0xda4] sm:$0xf0] }
 0x1aa   :  { %v7635_v26 = vld [vmem:[#allocation5 + $0xf88] sm:$0xf]  ;;  %v7380_v20 = vor.u32 %v8382_v10, %v7379_v9  ;;  %4370 = vmatpush.bf16.msrb.mxu1 %v7124_v55 }
 0x1ab   :  { %v8446_v31 = vld [vmem:[#allocation5 + $0xfa4] sm:$0xf0] }
 0x1ac   :  { %v6835_v33 = vld [vmem:[#allocation5 + $0x948] sm:$0xf]  ;;  %v7636_v45 = vor.u32 %v8446_v31, %v7635_v26  ;;  %4383 = vmatpush.bf16.msrb.mxu2 %v7380_v20 }
 0x1ad   :  { %v8246_v37 = vld [vmem:[#allocation5 + $0x964] sm:$0xf0] }
 0x1ae   :  { %v7091_v22 = vld [vmem:[#allocation5 + $0xb48] sm:$0xf]  ;;  %v6836_v49 = vor.u32 %v8246_v37, %v6835_v33  ;;  %4396 = vmatpush.bf16.msrb.mxu3 %v7636_v45 }
 0x1af   :  { %v8310_v39 = vld [vmem:[#allocation5 + $0xb64] sm:$0xf0] }
 0x1b0   :  { %v7347_v48 = vld [vmem:[#allocation5 + $0xd48] sm:$0xf]  ;;  %v7092_v57 = vor.u32 %v8310_v39, %v7091_v22  ;;  %4358 = vmatpush.bf16.msrb.mxu0 %v6836_v49  ;;  %v4146_v22 = vpop.f32.mrf.mxu3 }
 0x1b1   :  { %v8374_v46 = vld [vmem:[#allocation5 + $0xd64] sm:$0xf0] }
 0x1b2   :  { %v7603_v50 = vld [vmem:[#allocation5 + $0xf48] sm:$0xf]  ;;  %v7348_v30 = vor.u32 %v8374_v46, %v7347_v48  ;;  %4371 = vmatpush.bf16.msrb.mxu1 %v7092_v57  ;;  %v4157_v48 = vpop.f32.mrf.mxu0 }
 0x1b3   :  { %v8438_v27 = vld [vmem:[#allocation5 + $0xf64] sm:$0xf0] }
 0x1b4   :  { %v6803_v2 = vld [vmem:[#allocation5 + $0x908] sm:$0xf]  ;;  %v7604_v34 = vor.u32 %v8438_v27, %v7603_v50  ;;  %4384 = vmatpush.bf16.msrb.mxu2 %v7348_v30  ;;  %v8994_v27 = vadd.f32 %v4157_v48, %v4145_v42 }
 0x1b5   :  { %v8238_v3 = vld [vmem:[#allocation5 + $0x924] sm:$0xf0] }
 0x1b6   :  { %v7059_v58 = vld [vmem:[#allocation5 + $0xb08] sm:$0xf]  ;;  %v6804_v8 = vor.u32 %v8238_v3, %v6803_v2  ;;  %4397 = vmatpush.bf16.msrb.mxu3 %v7604_v34 }
 0x1b7   :  { %v8302_v5 = vld [vmem:[#allocation5 + $0xb24] sm:$0xf0] }
 0x1b8   :  { %v7315_v59 = vld [vmem:[#allocation5 + $0xd08] sm:$0xf]  ;;  %v7060_v40 = vor.u32 %v8302_v5, %v7059_v58  ;;  %4359 = vmatpush.bf16.msrb.mxu0 %v6804_v8 }
 0x1b9   :  { %v8366_v7 = vld [vmem:[#allocation5 + $0xd24] sm:$0xf0] }
 0x1ba   :  { %v7571_v35 = vld [vmem:[#allocation5 + $0xf08] sm:$0xf]  ;;  %v7316_v62 = vor.u32 %v8366_v7, %v7315_v59  ;;  %4372 = vmatpush.bf16.msrb.mxu1 %v7060_v40  ;;  %v8066_v40 = vld [vmem:[#allocation5 + $0x3cc] sm:$0xf] }
 0x1bb   :  { %v8430_v60 = vld [vmem:[#allocation5 + $0xf24] sm:$0xf0] }
 0x1bc   :  { %v6771_v61 = vld [vmem:[#allocation5 + $0x8c8] sm:$0xf]  ;;  %v7572_v0 = vor.u32 %v8430_v60, %v7571_v35  ;;  %4385 = vmatpush.bf16.msrb.mxu2 %v7316_v62  ;;  %v8002_v35 = vld [vmem:[#allocation5 + $0x1cc] sm:$0xf] }
 0x1bd   :  { %v8230_v14 = vld [vmem:[#allocation5 + $0x8e4] sm:$0xf0]  ;;  %v5877_v60 = vld [vmem:[#allocation5 + $0x1e8] sm:$0xf0] }
 0x1be   :  { %v7027_v15 = vld [vmem:[#allocation5 + $0xac8] sm:$0xf]  ;;  %v6772_v47 = vor.u32 %v8230_v14, %v6771_v61  ;;  %4398 = vmatpush.bf16.msrb.mxu3 %v7572_v0  ;;  %v6133_v61 = vld [vmem:[#allocation5 + $0x3e8] sm:$0xf0]  ;;  %v5880_v42 = vor.u32 %v8002_v35, %v5877_v60 }
 0x1bf   :  { %v8294_v17 = vld [vmem:[#allocation5 + $0xae4] sm:$0xf0]  ;;  %v8130_v62 = vld [vmem:[#allocation5 + $0x5cc] sm:$0xf] }
 0x1c0   :  { %v7283_v18 = vld [vmem:[#allocation5 + $0xcc8] sm:$0xf]  ;;  %v7028_v54 = vor.u32 %v8294_v17, %v7027_v15  ;;  %4360 = vmatpush.bf16.msrb.mxu0 %v6772_v47  ;;  %v6389_v15 = vld [vmem:[#allocation5 + $0x5e8] sm:$0xf0] }
 0x1c1   :  { %v8358_v19 = vld [vmem:[#allocation5 + $0xce4] sm:$0xf0]  ;;  %v8194_v0 = vld [vmem:[#allocation5 + $0x7cc] sm:$0xf] }
 0x1c2   :  { %v7539_v1 = vld [vmem:[#allocation5 + $0xec8] sm:$0xf]  ;;  %v7284_v10 = vor.u32 %v8358_v19, %v7283_v18  ;;  %4373 = vmatpush.bf16.msrb.mxu1 %v7028_v54  ;;  %v6645_v18 = vld [vmem:[#allocation5 + $0x7e8] sm:$0xf0]  ;;  %v4159_v19 = vpop.f32.mrf.mxu0  ;;  %v6392_v54 = vor.u32 %v8130_v62, %v6389_v15 }
 0x1c3   :  { %v8422_v24 = vld [vmem:[#allocation5 + $0xee4] sm:$0xf0]  ;;  %v7970_v60 = vld [vmem:[#allocation5 + $0xcc] sm:$0xf] }
 0x1c4   :  { %v6739_v4 = vld [vmem:[#allocation5 + $0x888] sm:$0xf]  ;;  %v7540_v31 = vor.u32 %v8422_v24, %v7539_v1  ;;  %4386 = vmatpush.bf16.msrb.mxu2 %v7284_v10  ;;  %v6136_v1 = vor.u32 %v8066_v40, %v6133_v61  ;;  %v7994_v24 = vld [vmem:[#allocation5 + $0x18c] sm:$0xf]  ;;  %v6648_v10 = vor.u32 %v8194_v0, %v6645_v18 }
 0x1c5   :  { %v8222_v9 = vld [vmem:[#allocation5 + $0x8a4] sm:$0xf0]  ;;  %v8034_v40 = vld [vmem:[#allocation5 + $0x2cc] sm:$0xf] }
 0x1c6   :  { %v6995_v32 = vld [vmem:[#allocation5 + $0xa88] sm:$0xf]  ;;  %v6740_v37 = vor.u32 %v8222_v9, %v6739_v4  ;;  %4399 = vmatpush.bf16.msrb.mxu3 %v7540_v31  ;;  %v8058_v4 = vld [vmem:[#allocation5 + $0x38c] sm:$0xf]  ;;  %v5848_v31 = vor.u32 %v7994_v24, %v5845_v63 }
 0x1c7   :  { %v8286_v26 = vld [vmem:[#allocation5 + $0xaa4] sm:$0xf0]  ;;  %v6101_v9 = vld [vmem:[#allocation5 + $0x3a8] sm:$0xf0] }
 0x1c8   :  { %v7251_v55 = vld [vmem:[#allocation5 + $0xc88] sm:$0xf]  ;;  %v6996_v39 = vor.u32 %v8286_v26, %v6995_v32  ;;  %4361 = vmatpush.bf16.msrb.mxu0 %v6740_v37  ;;  %v8122_v32 = vld [vmem:[#allocation5 + $0x58c] sm:$0xf]  ;;  %v6104_v37 = vor.u32 %v8058_v4, %v6101_v9 }
 0x1c9   :  { %v8350_v33 = vld [vmem:[#allocation5 + $0xca4] sm:$0xf0]  ;;  %v6357_v26 = vld [vmem:[#allocation5 + $0x5a8] sm:$0xf0] }
 0x1ca   :  { %v7507_v21 = vld [vmem:[#allocation5 + $0xe88] sm:$0xf]  ;;  %v7252_v46 = vor.u32 %v8350_v33, %v7251_v55  ;;  %4374 = vmatpush.bf16.msrb.mxu1 %v6996_v39  ;;  %v8186_v55 = vld [vmem:[#allocation5 + $0x78c] sm:$0xf]  ;;  %v6360_v22 = vor.u32 %v8122_v32, %v6357_v26  ;;  %v9002_v26 = vpop.f32.mrf.mxu3 }
 0x1cb   :  { %v8414_v20 = vld [vmem:[#allocation5 + $0xea4] sm:$0xf0]  ;;  %v6613_v33 = vld [vmem:[#allocation5 + $0x7a8] sm:$0xf0] }
 0x1cc   :  { %v6707_v44 = vld [vmem:[#allocation5 + $0x848] sm:$0xf]  ;;  %v7508_v52 = vor.u32 %v8414_v20, %v7507_v21  ;;  %4387 = vmatpush.bf16.msrb.mxu2 %v7252_v46  ;;  %v7986_v21 = vld [vmem:[#allocation5 + $0x14c] sm:$0xf]  ;;  %v6616_v48 = vor.u32 %v8186_v55, %v6613_v33 }
 0x1cd   :  { %v8214_v45 = vld [vmem:[#allocation5 + $0x864] sm:$0xf0]  ;;  %v5813_v20 = vld [vmem:[#allocation5 + $0x168] sm:$0xf0] }
 0x1ce   :  { %v6963_v49 = vld [vmem:[#allocation5 + $0xa48] sm:$0xf]  ;;  %v6708_v2 = vor.u32 %v8214_v45, %v6707_v44  ;;  %4400 = vmatpush.bf16.msrb.mxu3 %v7508_v52  ;;  %v8050_v39 = vld [vmem:[#allocation5 + $0x34c] sm:$0xf]  ;;  %v8996_v45 = vpop.f32.mrf.mxu2 }
 0x1cf   :  { %v8278_v50 = vld [vmem:[#allocation5 + $0xa64] sm:$0xf0]  ;;  %v6069_v44 = vld [vmem:[#allocation5 + $0x368] sm:$0xf0] }
 0x1d0   :  { %v7219_v53 = vld [vmem:[#allocation5 + $0xc48] sm:$0xf]  ;;  %v6964_v5 = vor.u32 %v8278_v50, %v6963_v49  ;;  %4362 = vmatpush.bf16.msrb.mxu0 %v6708_v2  ;;  %v8114_v46 = vld [vmem:[#allocation5 + $0x54c] sm:$0xf]  ;;  %v5816_v50 = vor.u32 %v7986_v21, %v5813_v20 }
 0x1d1   :  { %v8342_v28 = vld [vmem:[#allocation5 + $0xc64] sm:$0xf0]  ;;  %v6325_v49 = vld [vmem:[#allocation5 + $0x568] sm:$0xf0] }
 0x1d2   :  { %v7475_v57 = vld [vmem:[#allocation5 + $0xe48] sm:$0xf]  ;;  %v7220_v7 = vor.u32 %v8342_v28, %v7219_v53  ;;  %4375 = vmatpush.bf16.msrb.mxu1 %v6964_v5  ;;  %v8178_v52 = vld [vmem:[#allocation5 + $0x74c] sm:$0xf]  ;;  %v6072_v28 = vor.u32 %v8050_v39, %v6069_v44 }
 0x1d3   :  { %v8406_v3 = vld [vmem:[#allocation5 + $0xe64] sm:$0xf0]  ;;  %v6581_v53 = vld [vmem:[#allocation5 + $0x768] sm:$0xf0] }
 0x1d4   :  { %v6675_v30 = vld [vmem:[#allocation5 + $0x808] sm:$0xf]  ;;  %v7476_v11 = vor.u32 %v8406_v3, %v7475_v57  ;;  %4388 = vmatpush.bf16.msrb.mxu2 %v7220_v7  ;;  %v7978_v57 = vld [vmem:[#allocation5 + $0x10c] sm:$0xf]  ;;  %v6328_v3 = vor.u32 %v8114_v46, %v6325_v49  ;;  %v6584_v5 = vor.u32 %v8178_v52, %v6581_v53 }
 0x1d5   :  { %v8206_v58 = vld [vmem:[#allocation5 + $0x824] sm:$0xf0]  ;;  %v5781_v2 = vld [vmem:[#allocation5 + $0x128] sm:$0xf0] }
 0x1d6   :  { %v6931_v6 = vld [vmem:[#allocation5 + $0xa08] sm:$0xf]  ;;  %v6676_v14 = vor.u32 %v8206_v58, %v6675_v30  ;;  %4401 = vmatpush.bf16.msrb.mxu3 %v7476_v11  ;;  %v8042_v30 = vld [vmem:[#allocation5 + $0x30c] sm:$0xf] }
 0x1d7   :  { %v8270_v34 = vld [vmem:[#allocation5 + $0xa24] sm:$0xf0]  ;;  %v6037_v58 = vld [vmem:[#allocation5 + $0x328] sm:$0xf0] }
 0x1d8   :  { %v7187_v59 = vld [vmem:[#allocation5 + $0xc08] sm:$0xf]  ;;  %v6932_v17 = vor.u32 %v8270_v34, %v6931_v6  ;;  %4363 = vmatpush.bf16.msrb.mxu0 %v6676_v14  ;;  %v8106_v6 = vld [vmem:[#allocation5 + $0x50c] sm:$0xf]  ;;  %v6040_v35 = vor.u32 %v8042_v30, %v6037_v58  ;;  %v4185_v14 = vpop.f32.mrf.mxu2 }
 0x1d9   :  { %v8334_v8 = vld [vmem:[#allocation5 + $0xc24] sm:$0xf0]  ;;  %v6293_v34 = vld [vmem:[#allocation5 + $0x528] sm:$0xf0] }
 0x1da   :  { %v7443_v12 = vld [vmem:[#allocation5 + $0xe08] sm:$0xf]  ;;  %v7188_v47 = vor.u32 %v8334_v8, %v7187_v59  ;;  %4376 = vmatpush.bf16.msrb.mxu1 %v6932_v17  ;;  %v5784_v59 = vor.u32 %v7978_v57, %v5781_v2  ;;  %v8170_v7 = vld [vmem:[#allocation5 + $0x70c] sm:$0xf] }
 0x1db   :  { %v8398_v41 = vld [vmem:[#allocation5 + $0xe24] sm:$0xf0]  ;;  %4364 = vmatmul.bf16.vlgmr.msrb.gmra.mxu0 %v8956_v43  ;;  %v6549_v8 = vld [vmem:[#allocation5 + $0x728] sm:$0xf0] }
 0x1dc   :  { %v7444_v25 = vor.u32 %v8398_v41, %v7443_v12  ;;  %4408 = vmatpush.bf16.msra.mxu0 %v5880_v42  ;;  %4389 = vmatpush.bf16.msrb.mxu2 %v7188_v47  ;;  %v5749_v11 = vld [vmem:[#allocation5 + $0xe8] sm:$0xf0]  ;;  %v6296_v12 = vor.u32 %v8106_v6, %v6293_v34  ;;  %v6552_v41 = vor.u32 %v8170_v7, %v6549_v8 }
 0x1dd   :  { %4377 = vmatmul.bf16.vlgmr.msrb.gmra.mxu1 %v8976_v36  ;;  %v6005_v61 = vld [vmem:[#allocation5 + $0x2e8] sm:$0xf0]  ;;  %v5752_v17 = vor.u32 %v7970_v60, %v5749_v11 }
 0x1de   :  { %4421 = vmatpush.bf16.msra.mxu1 %v6136_v1  ;;  %4402 = vmatpush.bf16.msrb.mxu3 %v7444_v25  ;;  %v8098_v62 = vld [vmem:[#allocation5 + $0x4cc] sm:$0xf]  ;;  %v6008_v18 = vor.u32 %v8034_v40, %v6005_v61 }
 0x1df   :  { %4390 = vmatmul.bf16.vlgmr.msrb.gmra.mxu2 %v8946_v51  ;;  %v6261_v15 = vld [vmem:[#allocation5 + $0x4e8] sm:$0xf0] }
 0x1e0   :  { %4434 = vmatpush.bf16.msra.mxu2 %v6392_v54  ;;  %4409 = vmatpush.bf16.msra.mxu0 %v5848_v31  ;;  %v8162_v42 = vld [vmem:[#allocation5 + $0x6cc] sm:$0xf]  ;;  %v6264_v1 = vor.u32 %v8098_v62, %v6261_v15 }
 0x1e1   :  { %4403 = vmatmul.bf16.vlgmr.msrb.gmra.mxu3 %v8966_v16  ;;  %v6517_v0 = vld [vmem:[#allocation5 + $0x6e8] sm:$0xf0] }
 0x1e2   :  { %4447 = vmatpush.bf16.msra.mxu3 %v6648_v10  ;;  %4422 = vmatpush.bf16.msra.mxu1 %v6104_v37  ;;  %v7962_v19 = vld [vmem:[#allocation5 + $0x8c] sm:$0xf]  ;;  %v6520_v25 = vor.u32 %v8162_v42, %v6517_v0 }
 0x1e3   :  { %v5717_v47 = vld [vmem:[#allocation5 + $0xa8] sm:$0xf0] }
 0x1e4   :  { %4435 = vmatpush.bf16.msra.mxu2 %v6360_v22  ;;  %4410 = vmatpush.bf16.msra.mxu0 %v5816_v50  ;;  %v8026_v24 = vld [vmem:[#allocation5 + $0x28c] sm:$0xf]  ;;  %v5720_v9 = vor.u32 %v7962_v19, %v5717_v47 }
 0x1e5   :  { %v5973_v63 = vld [vmem:[#allocation5 + $0x2a8] sm:$0xf0] }
 0x1e6   :  { %4448 = vmatpush.bf16.msra.mxu3 %v6616_v48  ;;  %4423 = vmatpush.bf16.msra.mxu1 %v6072_v28  ;;  %v8090_v54 = vld [vmem:[#allocation5 + $0x48c] sm:$0xf]  ;;  %v5976_v31 = vor.u32 %v8026_v24, %v5973_v63 }
 0x1e7   :  { %v6229_v4 = vld [vmem:[#allocation5 + $0x4a8] sm:$0xf0] }
 0x1e8   :  { %4436 = vmatpush.bf16.msra.mxu2 %v6328_v3  ;;  %4411 = vmatpush.bf16.msra.mxu0 %v5784_v59  ;;  %v8154_v10 = vld [vmem:[#allocation5 + $0x68c] sm:$0xf]  ;;  %v6232_v37 = vor.u32 %v8090_v54, %v6229_v4 }
 0x1e9   :  { %v6485_v32 = vld [vmem:[#allocation5 + $0x6a8] sm:$0xf0] }
 0x1ea   :  { %4449 = vmatpush.bf16.msra.mxu3 %v6584_v5  ;;  %4424 = vmatpush.bf16.msra.mxu1 %v6040_v35  ;;  %v7954_v55 = vld [vmem:[#allocation5 + $0x4c] sm:$0xf]  ;;  %v6488_v22 = vor.u32 %v8154_v10, %v6485_v32 }
 0x1eb   :  { %v5685_v33 = vld [vmem:[#allocation5 + $0x68] sm:$0xf0] }
 0x1ec   :  { %4437 = vmatpush.bf16.msra.mxu2 %v6296_v12  ;;  %4412 = vmatpush.bf16.msra.mxu0 %v5752_v17  ;;  %v8018_v21 = vld [vmem:[#allocation5 + $0x24c] sm:$0xf]  ;;  %v5688_v46 = vor.u32 %v7954_v55, %v5685_v33  ;;  %v4198_v12 = vpop.f32.mrf.mxu3 }
 0x1ed   :  { %v5941_v20 = vld [vmem:[#allocation5 + $0x268] sm:$0xf0] }
 0x1ee   :  { %4450 = vmatpush.bf16.msra.mxu3 %v6552_v41  ;;  %4425 = vmatpush.bf16.msra.mxu1 %v6008_v18  ;;  %v8082_v39 = vld [vmem:[#allocation5 + $0x44c] sm:$0xf]  ;;  %v5944_v53 = vor.u32 %v8018_v21, %v5941_v20 }
 0x1ef   :  { %v6197_v44 = vld [vmem:[#allocation5 + $0x468] sm:$0xf0] }
 0x1f0   :  { %4438 = vmatpush.bf16.msra.mxu2 %v6264_v1  ;;  %v8146_v48 = vld [vmem:[#allocation5 + $0x64c] sm:$0xf]  ;;  %4413 = vmatpush.bf16.msra.mxu0 %v5720_v9  ;;  %v6200_v3 = vor.u32 %v8082_v39, %v6197_v44 }
 0x1f1   :  { %v6453_v49 = vld [vmem:[#allocation5 + $0x668] sm:$0xf0] }
 0x1f2   :  { %4451 = vmatpush.bf16.msra.mxu3 %v6520_v25  ;;  %v7946_v50 = vld [vmem:[#allocation5 + $0xc] sm:$0xf]  ;;  %4426 = vmatpush.bf16.msra.mxu1 %v5976_v31  ;;  %v6456_v6 = vor.u32 %v8146_v48, %v6453_v49 }
 0x1f3   :  { %v5653_v52 = vld [vmem:[#allocation5 + $0x28] sm:$0xf0] }
 0x1f4   :  { %v8010_v28 = vld [vmem:[#allocation5 + $0x20c] sm:$0xf]  ;;  %4439 = vmatpush.bf16.msra.mxu2 %v6232_v37  ;;  %4414 = vmatpush.bf16.msra.mxu0 %v5688_v46  ;;  %v5656_v8 = vor.u32 %v7946_v50, %v5653_v52 }
 0x1f5   :  { %v5909_v57 = vld [vmem:[#allocation5 + $0x228] sm:$0xf0] }
 0x1f6   :  { %v8074_v2 = vld [vmem:[#allocation5 + $0x40c] sm:$0xf]  ;;  %4452 = vmatpush.bf16.msra.mxu3 %v6488_v22  ;;  %4427 = vmatpush.bf16.msra.mxu1 %v5944_v53  ;;  %v5912_v40 = vor.u32 %v8010_v28, %v5909_v57  ;;  %v4170_v22 = vpop.f32.mrf.mxu1 }
 0x1f7   :  { %v6165_v30 = vld [vmem:[#allocation5 + $0x428] sm:$0xf0]  ;;  %v4171_v46 = vadd.f32 %v4170_v22, %v8994_v27 }
 0x1f8   :  { %v8258_v58 = vld [vmem:[#allocation5 + $0x9cc] sm:$0xf]  ;;  %4440 = vmatpush.bf16.msra.mxu2 %v6200_v3  ;;  %v6168_v62 = vor.u32 %v8074_v2, %v6165_v30  ;;  %4415 = vmatpush.bf16.msra.mxu0 %v5656_v8 }
 0x1f9   :  { %v6901_v5 = vld [vmem:[#allocation5 + $0x9e8] sm:$0xf0]  ;;  %v4184_v2 = vadd.f32 %v8996_v45, %v4171_v46 }
 0x1fa   :  { %v8138_v34 = vld [vmem:[#allocation5 + $0x60c] sm:$0xf]  ;;  %v6904_v61 = vor.u32 %v8258_v58, %v6901_v5  ;;  %4453 = vmatpush.bf16.msra.mxu3 %v6456_v6  ;;  %4428 = vmatpush.bf16.msra.mxu1 %v5912_v40 }
 0x1fb   :  { %v8322_v59 = vld [vmem:[#allocation5 + $0xbcc] sm:$0xf]  ;;  %4416 = vmatmul.bf16.vlgmr.msra.gmra.mxu0 %v8904_v29 }
 0x1fc   :  { %v7157_v7 = vld [vmem:[#allocation5 + $0xbe8] sm:$0xf0]  ;;  %4460 = vmatpush.bf16.msrb.mxu0 %v6904_v61  ;;  %4441 = vmatpush.bf16.msra.mxu2 %v6168_v62 }
 0x1fd   :  { %v6421_v35 = vld [vmem:[#allocation5 + $0x628] sm:$0xf0]  ;;  %v7160_v15 = vor.u32 %v8322_v59, %v7157_v7  ;;  %4429 = vmatmul.bf16.vlgmr.msra.gmra.mxu1 %v8936_v56 }
 0x1fe   :  { %v8386_v60 = vld [vmem:[#allocation5 + $0xdcc] sm:$0xf]  ;;  %v6424_v0 = vor.u32 %v8138_v34, %v6421_v35  ;;  %v9011_v34 = vadd.f32 %v9002_v26, %v4184_v2  ;;  %v4172_v61 = vpop.f32.mrf.mxu1 }
 0x1ff   :  { %v7413_v11 = vld [vmem:[#allocation5 + $0xde8] sm:$0xf0]  ;;  %4473 = vmatpush.bf16.msrb.mxu1 %v7160_v15  ;;  %4442 = vmatmul.bf16.vlgmr.msra.gmra.mxu2 %v8894_v13  ;;  %v4209_v15 = vpop.f32.mrf.mxu0 }
 0x200   :  { %v8450_v14 = vld [vmem:[#allocation5 + $0xfcc] sm:$0xf]  ;;  %v7416_v18 = vor.u32 %v8386_v60, %v7413_v11  ;;  %4454 = vmatpush.bf16.msra.mxu3 %v6424_v0  ;;  %v1314_v0 = vperm.slane %v8987_v38, 1 }
 0x201   :  { %v7669_v41 = vld [vmem:[#allocation5 + $0xfe8] sm:$0xf0] }
 0x202   :  { %v8250_v17 = vld [vmem:[#allocation5 + $0x98c] sm:$0xf]  ;;  %v7672_v1 = vor.u32 %v8450_v14, %v7669_v41  ;;  %4486 = vmatpush.bf16.msrb.mxu2 %v7416_v18 }
 0x203   :  { %v6869_v42 = vld [vmem:[#allocation5 + $0x9a8] sm:$0xf0]  ;;  %4455 = vmatmul.bf16.vlgmr.msra.gmra.mxu3 %v8914_v23 }
 0x204   :  { %v8314_v19 = vld [vmem:[#allocation5 + $0xb8c] sm:$0xf]  ;;  %v6872_v25 = vor.u32 %v8250_v17, %v6869_v42  ;;  %4499 = vmatpush.bf16.msrb.mxu3 %v7672_v1 }
 0x205   :  { %v7125_v47 = vld [vmem:[#allocation5 + $0xba8] sm:$0xf0] }
 0x206   :  { %v8378_v24 = vld [vmem:[#allocation5 + $0xd8c] sm:$0xf]  ;;  %v7128_v9 = vor.u32 %v8314_v19, %v7125_v47  ;;  %4461 = vmatpush.bf16.msrb.mxu0 %v6872_v25  ;;  %v4222_v46 = vpop.f32.mrf.mxu1 }
 0x207   :  { %v7381_v63 = vld [vmem:[#allocation5 + $0xda8] sm:$0xf0] }
 0x208   :  { %v8442_v54 = vld [vmem:[#allocation5 + $0xf8c] sm:$0xf]  ;;  %v7384_v31 = vor.u32 %v8378_v24, %v7381_v63  ;;  %4474 = vmatpush.bf16.msrb.mxu1 %v7128_v9 }
 0x209   :  { %v7637_v4 = vld [vmem:[#allocation5 + $0xfa8] sm:$0xf0] }
 0x20a   :  { %v8242_v10 = vld [vmem:[#allocation5 + $0x94c] sm:$0xf]  ;;  %v7640_v37 = vor.u32 %v8442_v54, %v7637_v4  ;;  %4487 = vmatpush.bf16.msrb.mxu2 %v7384_v31  ;;  %v4210_v31 = vadd.f32 %v4209_v15, %v1314_v0  ;;  %v7999_v0 = vld [vmem:[#allocation5 + $0x1ac] sm:$0xf0] }
 0x20b   :  { %v6837_v32 = vld [vmem:[#allocation5 + $0x968] sm:$0xf0] }
 0x20c   :  { %v8306_v55 = vld [vmem:[#allocation5 + $0xb4c] sm:$0xf]  ;;  %v6840_v39 = vor.u32 %v8242_v10, %v6837_v32  ;;  %4500 = vmatpush.bf16.msrb.mxu3 %v7640_v37 }
 0x20d   :  { %v7093_v33 = vld [vmem:[#allocation5 + $0xb68] sm:$0xf0] }
 0x20e   :  { %v8370_v21 = vld [vmem:[#allocation5 + $0xd4c] sm:$0xf]  ;;  %v7096_v49 = vor.u32 %v8306_v55, %v7093_v33  ;;  %4462 = vmatpush.bf16.msrb.mxu0 %v6840_v39  ;;  %v4235_v39 = vpop.f32.mrf.mxu2 }
 0x20f   :  { %v7349_v20 = vld [vmem:[#allocation5 + $0xd68] sm:$0xf0] }
 0x210   :  { %v8434_v44 = vld [vmem:[#allocation5 + $0xf4c] sm:$0xf]  ;;  %v7352_v53 = vor.u32 %v8370_v21, %v7349_v20  ;;  %4475 = vmatpush.bf16.msrb.mxu1 %v7096_v49 }
 0x211   :  { %v7605_v48 = vld [vmem:[#allocation5 + $0xf68] sm:$0xf0] }
 0x212   :  { %v8234_v50 = vld [vmem:[#allocation5 + $0x90c] sm:$0xf]  ;;  %v7608_v3 = vor.u32 %v8434_v44, %v7605_v48  ;;  %4488 = vmatpush.bf16.msrb.mxu2 %v7352_v53 }
 0x213   :  { %v6805_v52 = vld [vmem:[#allocation5 + $0x928] sm:$0xf0] }
 0x214   :  { %v8298_v28 = vld [vmem:[#allocation5 + $0xb0c] sm:$0xf]  ;;  %v6808_v27 = vor.u32 %v8234_v50, %v6805_v52  ;;  %4501 = vmatpush.bf16.msrb.mxu3 %v7608_v3  ;;  %v4248_v52 = vpop.f32.mrf.mxu3 }
 0x215   :  { %v7061_v57 = vld [vmem:[#allocation5 + $0xb28] sm:$0xf0] }
 0x216   :  { %v8362_v30 = vld [vmem:[#allocation5 + $0xd0c] sm:$0xf]  ;;  %v7064_v59 = vor.u32 %v8298_v28, %v7061_v57  ;;  %4463 = vmatpush.bf16.msrb.mxu0 %v6808_v27  ;;  %v4223_v28 = vadd.f32 %v4222_v46, %v4210_v31  ;;  %v8191_v31 = vld [vmem:[#allocation5 + $0x7ac] sm:$0xf0] }
 0x217   :  { %v7317_v58 = vld [vmem:[#allocation5 + $0xd28] sm:$0xf0]  ;;  %v6587_v46 = vld [vmem:[#allocation5 + $0x750] sm:$0xf] }
 0x218   :  { %v8426_v5 = vld [vmem:[#allocation5 + $0xf0c] sm:$0xf]  ;;  %v7320_v35 = vor.u32 %v8362_v30, %v7317_v58  ;;  %4476 = vmatpush.bf16.msrb.mxu1 %v7064_v59  ;;  %v4211_v30 = vpop.f32.mrf.mxu0 }
 0x219   :  { %v7573_v6 = vld [vmem:[#allocation5 + $0xf28] sm:$0xf0]  ;;  %v6299_v30 = vld [vmem:[#allocation5 + $0x510] sm:$0xf] }
 0x21a   :  { %v8226_v7 = vld [vmem:[#allocation5 + $0x8cc] sm:$0xf]  ;;  %v7576_v45 = vor.u32 %v8426_v5, %v7573_v6  ;;  %4489 = vmatpush.bf16.msrb.mxu2 %v7320_v35  ;;  %v5883_v5 = vld [vmem:[#allocation5 + $0x1d0] sm:$0xf] }
 0x21b   :  { %v6773_v8 = vld [vmem:[#allocation5 + $0x8e8] sm:$0xf0]  ;;  %v8007_v6 = vld [vmem:[#allocation5 + $0x1ec] sm:$0xf0] }
 0x21c   :  { %v8290_v60 = vld [vmem:[#allocation5 + $0xacc] sm:$0xf]  ;;  %v6776_v14 = vor.u32 %v8226_v7, %v6773_v8  ;;  %4502 = vmatpush.bf16.msrb.mxu3 %v7576_v45  ;;  %v6139_v8 = vld [vmem:[#allocation5 + $0x3d0] sm:$0xf] }
 0x21d   :  { %v7029_v11 = vld [vmem:[#allocation5 + $0xae8] sm:$0xf0]  ;;  %v8071_v35 = vld [vmem:[#allocation5 + $0x3ec] sm:$0xf0] }
 0x21e   :  { %v8354_v12 = vld [vmem:[#allocation5 + $0xccc] sm:$0xf]  ;;  %v7032_v26 = vor.u32 %v8290_v60, %v7029_v11  ;;  %4464 = vmatpush.bf16.msrb.mxu0 %v6776_v14  ;;  %v4236_v60 = vadd.f32 %v4235_v39, %v4223_v28  ;;  %v5884_v14 = vor.u32 %v8007_v6, %v5883_v5  ;;  %v6331_v39 = vld [vmem:[#allocation5 + $0x550] sm:$0xf] }
 0x21f   :  { %v7285_v40 = vld [vmem:[#allocation5 + $0xce8] sm:$0xf0]  ;;  %v6555_v5 = vld [vmem:[#allocation5 + $0x710] sm:$0xf] }
 0x220   :  { %v8418_v41 = vld [vmem:[#allocation5 + $0xecc] sm:$0xf]  ;;  %v7288_v18 = vor.u32 %v8354_v12, %v7285_v40  ;;  %4477 = vmatpush.bf16.msrb.mxu1 %v7032_v26  ;;  %v6395_v12 = vld [vmem:[#allocation5 + $0x5d0] sm:$0xf]  ;;  %v9014_v15 = vadd.f32 %v4248_v52, %v4236_v60 }
 0x221   :  { %v7541_v62 = vld [vmem:[#allocation5 + $0xee8] sm:$0xf0]  ;;  %v8135_v40 = vld [vmem:[#allocation5 + $0x5ec] sm:$0xf0] }
 0x222   :  { %v8218_v17 = vld [vmem:[#allocation5 + $0x88c] sm:$0xf]  ;;  %v7544_v1 = vor.u32 %v8418_v41, %v7541_v62  ;;  %4490 = vmatpush.bf16.msrb.mxu2 %v7288_v18  ;;  %v6651_v41 = vld [vmem:[#allocation5 + $0x7d0] sm:$0xf] }
 0x223   :  { %v6741_v42 = vld [vmem:[#allocation5 + $0x8a8] sm:$0xf0]  ;;  %v8199_v62 = vld [vmem:[#allocation5 + $0x7ec] sm:$0xf0] }
 0x224   :  { %v8282_v19 = vld [vmem:[#allocation5 + $0xa8c] sm:$0xf]  ;;  %v6744_v25 = vor.u32 %v8218_v17, %v6741_v42  ;;  %4503 = vmatpush.bf16.msrb.mxu3 %v7544_v1  ;;  %v6140_v17 = vor.u32 %v8071_v35, %v6139_v8  ;;  %v5851_v42 = vld [vmem:[#allocation5 + $0x190] sm:$0xf] }
 0x225   :  { %v6997_v47 = vld [vmem:[#allocation5 + $0xaa8] sm:$0xf0]  ;;  %v8063_v1 = vld [vmem:[#allocation5 + $0x3ac] sm:$0xf0] }
 0x226   :  { %v8346_v24 = vld [vmem:[#allocation5 + $0xc8c] sm:$0xf]  ;;  %v7000_v9 = vor.u32 %v8282_v19, %v6997_v47  ;;  %4465 = vmatpush.bf16.msrb.mxu0 %v6744_v25  ;;  %v6396_v19 = vor.u32 %v8135_v40, %v6395_v12  ;;  %v6107_v47 = vld [vmem:[#allocation5 + $0x390] sm:$0xf] }
 0x227   :  { %v7253_v63 = vld [vmem:[#allocation5 + $0xca8] sm:$0xf0]  ;;  %v6363_v25 = vld [vmem:[#allocation5 + $0x590] sm:$0xf] }
 0x228   :  { %v8410_v54 = vld [vmem:[#allocation5 + $0xe8c] sm:$0xf]  ;;  %v7256_v55 = vor.u32 %v8346_v24, %v7253_v63  ;;  %4478 = vmatpush.bf16.msrb.mxu1 %v7000_v9  ;;  %v4237_v24 = vpop.f32.mrf.mxu2  ;;  %v6652_v63 = vor.u32 %v8199_v62, %v6651_v41  ;;  %v4250_v9 = vpop.f32.mrf.mxu3  ;;  %v5787_v52 = vld [vmem:[#allocation5 + $0x110] sm:$0xf] }
 0x229   :  { %v7509_v4 = vld [vmem:[#allocation5 + $0xea8] sm:$0xf0]  ;;  %v8175_v6 = vld [vmem:[#allocation5 + $0x72c] sm:$0xf0] }
 0x22a   :  { %v8210_v10 = vld [vmem:[#allocation5 + $0x84c] sm:$0xf]  ;;  %v7512_v37 = vor.u32 %v8410_v54, %v7509_v4  ;;  %4491 = vmatpush.bf16.msrb.mxu2 %v7256_v55  ;;  %v8127_v54 = vld [vmem:[#allocation5 + $0x5ac] sm:$0xf0]  ;;  %v4224_v4 = vpop.f32.mrf.mxu1  ;;  %v6108_v55 = vor.u32 %v8063_v1, %v6107_v47 }
 0x22b   :  { %v6709_v32 = vld [vmem:[#allocation5 + $0x868] sm:$0xf0]  ;;  %v7975_v8 = vld [vmem:[#allocation5 + $0xec] sm:$0xf0] }
 0x22c   :  { %v8274_v38 = vld [vmem:[#allocation5 + $0xa4c] sm:$0xf]  ;;  %v6712_v44 = vor.u32 %v8210_v10, %v6709_v32  ;;  %4504 = vmatpush.bf16.msrb.mxu3 %v7512_v37  ;;  %v5852_v10 = vor.u32 %v7999_v0, %v5851_v42  ;;  %v6619_v32 = vld [vmem:[#allocation5 + $0x790] sm:$0xf]  ;;  %v6364_v37 = vor.u32 %v8127_v54, %v6363_v25 }
 0x22d   :  { %v6965_v33 = vld [vmem:[#allocation5 + $0xa68] sm:$0xf0]  ;;  %v6011_v60 = vld [vmem:[#allocation5 + $0x2d0] sm:$0xf] }
 0x22e   :  { %v8338_v21 = vld [vmem:[#allocation5 + $0xc4c] sm:$0xf]  ;;  %v6968_v53 = vor.u32 %v8274_v38, %v6965_v33  ;;  %4466 = vmatpush.bf16.msrb.mxu0 %v6712_v44  ;;  %v5819_v38 = vld [vmem:[#allocation5 + $0x150] sm:$0xf] }
 0x22f   :  { %v7221_v20 = vld [vmem:[#allocation5 + $0xc68] sm:$0xf0]  ;;  %v7991_v33 = vld [vmem:[#allocation5 + $0x16c] sm:$0xf0] }
 0x230   :  { %v8402_v22 = vld [vmem:[#allocation5 + $0xe4c] sm:$0xf]  ;;  %v7224_v58 = vor.u32 %v8338_v21, %v7221_v20  ;;  %4479 = vmatpush.bf16.msrb.mxu1 %v6968_v53  ;;  %v6075_v21 = vld [vmem:[#allocation5 + $0x350] sm:$0xf] }
 0x231   :  { %v7477_v48 = vld [vmem:[#allocation5 + $0xe68] sm:$0xf0]  ;;  %v8055_v20 = vld [vmem:[#allocation5 + $0x36c] sm:$0xf0] }
 0x232   :  { %v8202_v49 = vld [vmem:[#allocation5 + $0x80c] sm:$0xf]  ;;  %v7480_v59 = vor.u32 %v8402_v22, %v7477_v48  ;;  %4492 = vmatpush.bf16.msrb.mxu2 %v7224_v58  ;;  %v6620_v22 = vor.u32 %v8191_v31, %v6619_v32  ;;  %v8119_v44 = vld [vmem:[#allocation5 + $0x56c] sm:$0xf0]  ;;  %v5820_v48 = vor.u32 %v7991_v33, %v5819_v38  ;;  %v4274_v1 = vpop.f32.mrf.mxu1 }
 0x233   :  { %v6677_v50 = vld [vmem:[#allocation5 + $0x828] sm:$0xf0]  ;;  %v7983_v53 = vld [vmem:[#allocation5 + $0x12c] sm:$0xf0]  ;;  %v6332_v28 = vor.u32 %v8119_v44, %v6331_v39 }
 0x234   :  { %v8266_v57 = vld [vmem:[#allocation5 + $0xa0c] sm:$0xf]  ;;  %v6680_v11 = vor.u32 %v8202_v49, %v6677_v50  ;;  %4505 = vmatpush.bf16.msrb.mxu3 %v7480_v59  ;;  %v8183_v49 = vld [vmem:[#allocation5 + $0x76c] sm:$0xf0]  ;;  %v6076_v50 = vor.u32 %v8055_v20, %v6075_v21 }
 0x235   :  { %v6933_v2 = vld [vmem:[#allocation5 + $0xa28] sm:$0xf0]  ;;  %v8111_v58 = vld [vmem:[#allocation5 + $0x52c] sm:$0xf0] }
 0x236   :  { %v8330_v3 = vld [vmem:[#allocation5 + $0xc0c] sm:$0xf]  ;;  %v6936_v61 = vor.u32 %v8266_v57, %v6933_v2  ;;  %4467 = vmatpush.bf16.msrb.mxu0 %v6680_v11  ;;  %v6043_v57 = vld [vmem:[#allocation5 + $0x310] sm:$0xf]  ;;  %v6300_v35 = vor.u32 %v8111_v58, %v6299_v30 }
 0x237   :  { %v7189_v27 = vld [vmem:[#allocation5 + $0xc28] sm:$0xf0]  ;;  %v8047_v2 = vld [vmem:[#allocation5 + $0x32c] sm:$0xf0] }
 0x238   :  { %v8394_v7 = vld [vmem:[#allocation5 + $0xe0c] sm:$0xf]  ;;  %v7192_v26 = vor.u32 %v8330_v3, %v7189_v27  ;;  %4480 = vmatpush.bf16.msrb.mxu1 %v6936_v61  ;;  %v6588_v3 = vor.u32 %v8183_v49, %v6587_v46  ;;  %v5788_v27 = vor.u32 %v7983_v53, %v5787_v52  ;;  %v6044_v59 = vor.u32 %v8047_v2, %v6043_v57  ;;  %v8039_v11 = vld [vmem:[#allocation5 + $0x2ec] sm:$0xf0]  ;;  %v4261_v61 = vpop.f32.mrf.mxu0 }
 0x239   :  { %v7445_v45 = vld [vmem:[#allocation5 + $0xe28] sm:$0xf0]  ;;  %4468 = vmatmul.bf16.vlgmr.msrb.gmra.mxu0 %v8956_v43  ;;  %v6267_v12 = vld [vmem:[#allocation5 + $0x4d0] sm:$0xf] }
 0x23a   :  { %v7448_v18 = vor.u32 %v8394_v7, %v7445_v45  ;;  %4512 = vmatpush.bf16.msra.mxu0 %v5884_v14  ;;  %4493 = vmatpush.bf16.msrb.mxu2 %v7192_v26  ;;  %v5755_v7 = vld [vmem:[#allocation5 + $0xd0] sm:$0xf]  ;;  %v6556_v45 = vor.u32 %v8175_v6, %v6555_v5  ;;  %v4262_v26 = vadd.f32 %v4261_v61, %v9014_v15 }
 0x23b   :  { %4481 = vmatmul.bf16.vlgmr.msrb.gmra.mxu1 %v8976_v36  ;;  %v8103_v40 = vld [vmem:[#allocation5 + $0x4ec] sm:$0xf0]  ;;  %v5756_v14 = vor.u32 %v7975_v8, %v5755_v7 }
 0x23c   :  { %4525 = vmatpush.bf16.msra.mxu1 %v6140_v17  ;;  %4506 = vmatpush.bf16.msrb.mxu3 %v7448_v18  ;;  %v6523_v41 = vld [vmem:[#allocation5 + $0x6d0] sm:$0xf]  ;;  %v6012_v17 = vor.u32 %v8039_v11, %v6011_v60  ;;  %v6268_v18 = vor.u32 %v8103_v40, %v6267_v12  ;;  %v4275_v54 = vadd.f32 %v4274_v1, %v4262_v26  ;;  %v4276_v60 = vpop.f32.mrf.mxu1 }
 0x23d   :  { %4494 = vmatmul.bf16.vlgmr.msrb.gmra.mxu2 %v8946_v51  ;;  %v8167_v62 = vld [vmem:[#allocation5 + $0x6ec] sm:$0xf0] }
 0x23e   :  { %4538 = vmatpush.bf16.msra.mxu2 %v6396_v19  ;;  %4513 = vmatpush.bf16.msra.mxu0 %v5852_v10  ;;  %v5723_v42 = vld [vmem:[#allocation5 + $0x90] sm:$0xf]  ;;  %v6524_v24 = vor.u32 %v8167_v62, %v6523_v41 }
 0x23f   :  { %4507 = vmatmul.bf16.vlgmr.msrb.gmra.mxu3 %v8966_v16  ;;  %v7967_v0 = vld [vmem:[#allocation5 + $0xac] sm:$0xf0] }
 0x240   :  { %4551 = vmatpush.bf16.msra.mxu3 %v6652_v63  ;;  %4526 = vmatpush.bf16.msra.mxu1 %v6108_v55  ;;  %v5979_v19 = vld [vmem:[#allocation5 + $0x290] sm:$0xf]  ;;  %v5724_v4 = vor.u32 %v7967_v0, %v5723_v42  ;;  %v4263_v53 = vpop.f32.mrf.mxu0 }
 0x241   :  { %v8031_v47 = vld [vmem:[#allocation5 + $0x2ac] sm:$0xf0] }
 0x242   :  { %4539 = vmatpush.bf16.msra.mxu2 %v6364_v37  ;;  %4514 = vmatpush.bf16.msra.mxu0 %v5820_v48  ;;  %v6235_v63 = vld [vmem:[#allocation5 + $0x490] sm:$0xf]  ;;  %v5980_v32 = vor.u32 %v8031_v47, %v5979_v19  ;;  %v4287_v37 = vpop.f32.mrf.mxu2  ;;  %v4300_v48 = vpop.f32.mrf.mxu3 }
 0x243   :  { %v8095_v25 = vld [vmem:[#allocation5 + $0x4ac] sm:$0xf0]  ;;  %v4288_v44 = vadd.f32 %v4287_v37, %v4275_v54 }
 0x244   :  { %4552 = vmatpush.bf16.msra.mxu3 %v6620_v22  ;;  %4527 = vmatpush.bf16.msra.mxu1 %v6076_v50  ;;  %v6491_v9 = vld [vmem:[#allocation5 + $0x690] sm:$0xf]  ;;  %v6236_v55 = vor.u32 %v8095_v25, %v6235_v63 }
 0x245   :  { %v8159_v10 = vld [vmem:[#allocation5 + $0x6ac] sm:$0xf0]  ;;  %v9021_v30 = vadd.f32 %v4300_v48, %v4288_v44 }
 0x246   :  { %4540 = vmatpush.bf16.msra.mxu2 %v6332_v28  ;;  %4515 = vmatpush.bf16.msra.mxu0 %v5788_v27  ;;  %v5691_v15 = vld [vmem:[#allocation5 + $0x50] sm:$0xf]  ;;  %v6492_v21 = vor.u32 %v8159_v10, %v6491_v9 }
 0x247   :  { %v7959_v31 = vld [vmem:[#allocation5 + $0x6c] sm:$0xf0] }
 0x248   :  { %4553 = vmatpush.bf16.msra.mxu3 %v6588_v3  ;;  %4528 = vmatpush.bf16.msra.mxu1 %v6044_v59  ;;  %v5947_v38 = vld [vmem:[#allocation5 + $0x250] sm:$0xf]  ;;  %v5692_v46 = vor.u32 %v7959_v31, %v5691_v15 }
 0x249   :  { %v8023_v33 = vld [vmem:[#allocation5 + $0x26c] sm:$0xf0] }
 0x24a   :  { %4541 = vmatpush.bf16.msra.mxu2 %v6300_v35  ;;  %4516 = vmatpush.bf16.msra.mxu0 %v5756_v14  ;;  %v6203_v20 = vld [vmem:[#allocation5 + $0x450] sm:$0xf]  ;;  %v5948_v28 = vor.u32 %v8023_v33, %v5947_v38 }
 0x24b   :  { %v8087_v22 = vld [vmem:[#allocation5 + $0x46c] sm:$0xf0] }
 0x24c   :  { %4554 = vmatpush.bf16.msra.mxu3 %v6556_v45  ;;  %4529 = vmatpush.bf16.msra.mxu1 %v6012_v17  ;;  %v6459_v39 = vld [vmem:[#allocation5 + $0x650] sm:$0xf]  ;;  %v6204_v58 = vor.u32 %v8087_v22, %v6203_v20 }
 0x24d   :  { %v8151_v49 = vld [vmem:[#allocation5 + $0x66c] sm:$0xf0] }
 0x24e   :  { %4542 = vmatpush.bf16.msra.mxu2 %v6268_v18  ;;  %4517 = vmatpush.bf16.msra.mxu0 %v5724_v4  ;;  %v5659_v50 = vld [vmem:[#allocation5 + $0x10] sm:$0xf]  ;;  %v6460_v59 = vor.u32 %v8151_v49, %v6459_v39  ;;  %v4302_v4 = vpop.f32.mrf.mxu3 }
 0x24f   :  { %v7951_v52 = vld [vmem:[#allocation5 + $0x2c] sm:$0xf0] }
 0x250   :  { %4555 = vmatpush.bf16.msra.mxu3 %v6524_v24  ;;  %4530 = vmatpush.bf16.msra.mxu1 %v5980_v32  ;;  %v5915_v57 = vld [vmem:[#allocation5 + $0x210] sm:$0xf]  ;;  %v5660_v11 = vor.u32 %v7951_v52, %v5659_v50  ;;  %v4289_v24 = vpop.f32.mrf.mxu2 }
 0x251   :  { %v8015_v2 = vld [vmem:[#allocation5 + $0x22c] sm:$0xf0] }
 0x252   :  { %v6171_v3 = vld [vmem:[#allocation5 + $0x410] sm:$0xf]  ;;  %4543 = vmatpush.bf16.msra.mxu2 %v6236_v55  ;;  %4518 = vmatpush.bf16.msra.mxu0 %v5692_v46  ;;  %v5916_v61 = vor.u32 %v8015_v2, %v5915_v57 }
 0x253   :  { %v8079_v27 = vld [vmem:[#allocation5 + $0x42c] sm:$0xf0] }
 0x254   :  { %v6907_v5 = vld [vmem:[#allocation5 + $0x9d0] sm:$0xf]  ;;  %4556 = vmatpush.bf16.msra.mxu3 %v6492_v21  ;;  %4531 = vmatpush.bf16.msra.mxu1 %v5948_v28  ;;  %v6172_v26 = vor.u32 %v8079_v27, %v6171_v3 }
 0x255   :  { %v8263_v6 = vld [vmem:[#allocation5 + $0x9ec] sm:$0xf0] }
 0x256   :  { %v6427_v7 = vld [vmem:[#allocation5 + $0x610] sm:$0xf]  ;;  %v6908_v14 = vor.u32 %v8263_v6, %v6907_v5  ;;  %4544 = vmatpush.bf16.msra.mxu2 %v6204_v58  ;;  %4519 = vmatpush.bf16.msra.mxu0 %v5660_v11 }
 0x257   :  { %v7163_v8 = vld [vmem:[#allocation5 + $0xbd0] sm:$0xf] }
 0x258   :  { %v8327_v35 = vld [vmem:[#allocation5 + $0xbec] sm:$0xf0]  ;;  %4557 = vmatpush.bf16.msra.mxu3 %v6460_v59  ;;  %4532 = vmatpush.bf16.msra.mxu1 %v5916_v61 }
 0x259   :  { %v8143_v45 = vld [vmem:[#allocation5 + $0x62c] sm:$0xf0]  ;;  %v7164_v17 = vor.u32 %v8327_v35, %v7163_v8  ;;  %4520 = vmatmul.bf16.vlgmr.msra.gmra.mxu0 %v8904_v29  ;;  %v9027_v8 = vld [vmem:[#allocation7] sm:$0xff] }
 0x25a   :  { %v7419_v12 = vld [vmem:[#allocation5 + $0xdd0] sm:$0xf]  ;;  %v6428_v18 = vor.u32 %v8143_v45, %v6427_v7  ;;  %4564 = vmatpush.bf16.msrb.mxu0 %v6908_v14  ;;  %4545 = vmatpush.bf16.msra.mxu2 %v6172_v26  ;;  %v1315_v35 = vperm.slane %v9027_v8, 2  ;;  %v4313_v26 = vpop.f32.mrf.mxu0 }
 0x25b   :  { %v8391_v40 = vld [vmem:[#allocation5 + $0xdec] sm:$0xf0]  ;;  %4533 = vmatmul.bf16.vlgmr.msra.gmra.mxu1 %v8936_v56 }
 0x25c   :  { %v7675_v41 = vld [vmem:[#allocation5 + $0xfd0] sm:$0xf]  ;;  %v7420_v19 = vor.u32 %v8391_v40, %v7419_v12  ;;  %4577 = vmatpush.bf16.msrb.mxu1 %v7164_v17  ;;  %4558 = vmatpush.bf16.msra.mxu3 %v6428_v18  ;;  %v4314_v18 = vadd.f32 %v4313_v26, %v1315_v35 }
 0x25d   :  { %v8455_v62 = vld [vmem:[#allocation5 + $0xfec] sm:$0xf0]  ;;  %4546 = vmatmul.bf16.vlgmr.msra.gmra.mxu2 %v8894_v13 }
 0x25e   :  { %v6875_v42 = vld [vmem:[#allocation5 + $0x990] sm:$0xf]  ;;  %v7676_v63 = vor.u32 %v8455_v62, %v7675_v41  ;;  %4590 = vmatpush.bf16.msrb.mxu2 %v7420_v19 }
 0x25f   :  { %v8255_v0 = vld [vmem:[#allocation5 + $0x9ac] sm:$0xf0]  ;;  %4559 = vmatmul.bf16.vlgmr.msra.gmra.mxu3 %v8914_v23 }
 0x260   :  { %v7131_v47 = vld [vmem:[#allocation5 + $0xb90] sm:$0xf]  ;;  %v6876_v9 = vor.u32 %v8255_v0, %v6875_v42  ;;  %4603 = vmatpush.bf16.msrb.mxu3 %v7676_v63 }
 0x261   :  { %v8319_v1 = vld [vmem:[#allocation5 + $0xbac] sm:$0xf0] }
 0x262   :  { %v7387_v25 = vld [vmem:[#allocation5 + $0xd90] sm:$0xf]  ;;  %v7132_v15 = vor.u32 %v8319_v1, %v7131_v47  ;;  %4565 = vmatpush.bf16.msrb.mxu0 %v6876_v9 }
 0x263   :  { %v8383_v54 = vld [vmem:[#allocation5 + $0xdac] sm:$0xf0] }
 0x264   :  { %v7643_v10 = vld [vmem:[#allocation5 + $0xf90] sm:$0xf]  ;;  %v7388_v38 = vor.u32 %v8383_v54, %v7387_v25  ;;  %4578 = vmatpush.bf16.msrb.mxu1 %v7132_v15  ;;  %v4326_v54 = vpop.f32.mrf.mxu1 }
 0x265   :  { %v8447_v32 = vld [vmem:[#allocation5 + $0xfac] sm:$0xf0] }
 0x266   :  { %v6843_v31 = vld [vmem:[#allocation5 + $0x950] sm:$0xf]  ;;  %v7644_v21 = vor.u32 %v8447_v32, %v7643_v10  ;;  %4591 = vmatpush.bf16.msrb.mxu2 %v7388_v38  ;;  %v4327_v32 = vadd.f32 %v4326_v54, %v4314_v18 }
 0x267   :  { %v8247_v55 = vld [vmem:[#allocation5 + $0x96c] sm:$0xf0] }
 0x268   :  { %v7099_v33 = vld [vmem:[#allocation5 + $0xb50] sm:$0xf]  ;;  %v6844_v39 = vor.u32 %v8247_v55, %v6843_v31  ;;  %4604 = vmatpush.bf16.msrb.mxu3 %v7644_v21 }
 0x269   :  { %v8311_v37 = vld [vmem:[#allocation5 + $0xb6c] sm:$0xf0] }
 0x26a   :  { %v7355_v20 = vld [vmem:[#allocation5 + $0xd50] sm:$0xf]  ;;  %v7100_v46 = vor.u32 %v8311_v37, %v7099_v33  ;;  %4566 = vmatpush.bf16.msrb.mxu0 %v6844_v39 }
 0x26b   :  { %v8375_v22 = vld [vmem:[#allocation5 + $0xd6c] sm:$0xf0] }
 0x26c   :  { %v7611_v44 = vld [vmem:[#allocation5 + $0xf50] sm:$0xf]  ;;  %v7356_v52 = vor.u32 %v8375_v22, %v7355_v20  ;;  %4579 = vmatpush.bf16.msrb.mxu1 %v7100_v46 }
 0x26d   :  { %v8439_v48 = vld [vmem:[#allocation5 + $0xf6c] sm:$0xf0] }
 0x26e   :  { %v6811_v49 = vld [vmem:[#allocation5 + $0x910] sm:$0xf]  ;;  %v7612_v57 = vor.u32 %v8439_v48, %v7611_v44  ;;  %4592 = vmatpush.bf16.msrb.mxu2 %v7356_v52  ;;  %v4339_v44 = vpop.f32.mrf.mxu2 }
 0x26f   :  { %v8239_v50 = vld [vmem:[#allocation5 + $0x92c] sm:$0xf0]  ;;  %v4340_v52 = vadd.f32 %v4339_v44, %v4327_v32  ;;  %v8115_v44 = vld [vmem:[#allocation5 + $0x554] sm:$0xf] }
 0x270   :  { %v7067_v53 = vld [vmem:[#allocation5 + $0xb10] sm:$0xf]  ;;  %v6812_v58 = vor.u32 %v8239_v50, %v6811_v49  ;;  %4605 = vmatpush.bf16.msrb.mxu3 %v7612_v57 }
 0x271   :  { %v8303_v28 = vld [vmem:[#allocation5 + $0xb2c] sm:$0xf0] }
 0x272   :  { %v7323_v2 = vld [vmem:[#allocation5 + $0xd10] sm:$0xf]  ;;  %v7068_v6 = vor.u32 %v8303_v28, %v7067_v53  ;;  %4567 = vmatpush.bf16.msrb.mxu0 %v6812_v58  ;;  %v4352_v53 = vpop.f32.mrf.mxu3  ;;  %v4315_v28 = vpop.f32.mrf.mxu0 }
 0x273   :  { %v8367_v3 = vld [vmem:[#allocation5 + $0xd2c] sm:$0xf0]  ;;  %v5789_v28 = vld [vmem:[#allocation5 + $0x130] sm:$0xf0] }
 0x274   :  { %v7579_v27 = vld [vmem:[#allocation5 + $0xf10] sm:$0xf]  ;;  %v7324_v60 = vor.u32 %v8367_v3, %v7323_v2  ;;  %4580 = vmatpush.bf16.msrb.mxu1 %v7068_v6  ;;  %v8003_v6 = vld [vmem:[#allocation5 + $0x1d4] sm:$0xf] }
 0x275   :  { %v8431_v5 = vld [vmem:[#allocation5 + $0xf2c] sm:$0xf0] }
 0x276   :  { %v6779_v59 = vld [vmem:[#allocation5 + $0x8d0] sm:$0xf]  ;;  %v7580_v12 = vor.u32 %v8431_v5, %v7579_v27  ;;  %4593 = vmatpush.bf16.msrb.mxu2 %v7324_v60  ;;  %v4341_v54 = vpop.f32.mrf.mxu2 }
 0x277   :  { %v8231_v7 = vld [vmem:[#allocation5 + $0x8ec] sm:$0xf0] }
 0x278   :  { %v7035_v11 = vld [vmem:[#allocation5 + $0xad0] sm:$0xf]  ;;  %v6780_v14 = vor.u32 %v8231_v7, %v6779_v59  ;;  %4606 = vmatpush.bf16.msrb.mxu3 %v7580_v12  ;;  %v5885_v59 = vld [vmem:[#allocation5 + $0x1f0] sm:$0xf0]  ;;  %v9030_v7 = vadd.f32 %v4352_v53, %v4340_v52  ;;  %v4328_v12 = vpop.f32.mrf.mxu1 }
 0x279   :  { %v8295_v45 = vld [vmem:[#allocation5 + $0xaec] sm:$0xf0]  ;;  %v5888_v26 = vor.u32 %v8003_v6, %v5885_v59  ;;  %v7979_v53 = vld [vmem:[#allocation5 + $0x114] sm:$0xf] }
 0x27a   :  { %v7291_v40 = vld [vmem:[#allocation5 + $0xcd0] sm:$0xf]  ;;  %v7036_v17 = vor.u32 %v8295_v45, %v7035_v11  ;;  %4568 = vmatpush.bf16.msrb.mxu0 %v6780_v14  ;;  %v8067_v11 = vld [vmem:[#allocation5 + $0x3d4] sm:$0xf]  ;;  %v4354_v32 = vpop.f32.mrf.mxu3  ;;  %v5792_v6 = vor.u32 %v7979_v53, %v5789_v28 }
 0x27b   :  { %v8359_v61 = vld [vmem:[#allocation5 + $0xcec] sm:$0xf0]  ;;  %v6141_v45 = vld [vmem:[#allocation5 + $0x3f0] sm:$0xf0] }
 0x27c   :  { %v7547_v41 = vld [vmem:[#allocation5 + $0xed0] sm:$0xf]  ;;  %v7292_v19 = vor.u32 %v8359_v61, %v7291_v40  ;;  %4581 = vmatpush.bf16.msrb.mxu1 %v7036_v17  ;;  %v8131_v14 = vld [vmem:[#allocation5 + $0x5d4] sm:$0xf]  ;;  %v6144_v18 = vor.u32 %v8067_v11, %v6141_v45 }
 0x27d   :  { %v8423_v62 = vld [vmem:[#allocation5 + $0xeec] sm:$0xf0]  ;;  %v8195_v17 = vld [vmem:[#allocation5 + $0x7d4] sm:$0xf] }
 0x27e   :  { %v6747_v42 = vld [vmem:[#allocation5 + $0x890] sm:$0xf]  ;;  %v7548_v24 = vor.u32 %v8423_v62, %v7547_v41  ;;  %4594 = vmatpush.bf16.msrb.mxu2 %v7292_v19  ;;  %v6397_v41 = vld [vmem:[#allocation5 + $0x5f0] sm:$0xf0] }
 0x27f   :  { %v8223_v0 = vld [vmem:[#allocation5 + $0x8ac] sm:$0xf0]  ;;  %v7995_v19 = vld [vmem:[#allocation5 + $0x194] sm:$0xf] }
 0x280   :  { %v7003_v47 = vld [vmem:[#allocation5 + $0xa90] sm:$0xf]  ;;  %v6748_v4 = vor.u32 %v8223_v0, %v6747_v42  ;;  %4607 = vmatpush.bf16.msrb.mxu3 %v7548_v24  ;;  %v6653_v42 = vld [vmem:[#allocation5 + $0x7f0] sm:$0xf0]  ;;  %v6400_v24 = vor.u32 %v8131_v14, %v6397_v41  ;;  %v4378_v54 = vpop.f32.mrf.mxu1 }
 0x281   :  { %v8287_v1 = vld [vmem:[#allocation5 + $0xaac] sm:$0xf0]  ;;  %v8171_v59 = vld [vmem:[#allocation5 + $0x714] sm:$0xf] }
 0x282   :  { %v7259_v63 = vld [vmem:[#allocation5 + $0xc90] sm:$0xf]  ;;  %v7004_v15 = vor.u32 %v8287_v1, %v7003_v47  ;;  %4569 = vmatpush.bf16.msrb.mxu0 %v6748_v4  ;;  %v5853_v47 = vld [vmem:[#allocation5 + $0x1b0] sm:$0xf0]  ;;  %v6656_v4 = vor.u32 %v8195_v17, %v6653_v42 }
 0x283   :  { %v8351_v25 = vld [vmem:[#allocation5 + $0xcac] sm:$0xf0]  ;;  %v7971_v11 = vld [vmem:[#allocation5 + $0xd4] sm:$0xf] }
 0x284   :  { %v7515_v9 = vld [vmem:[#allocation5 + $0xe90] sm:$0xf]  ;;  %v7260_v38 = vor.u32 %v8351_v25, %v7259_v63  ;;  %4582 = vmatpush.bf16.msrb.mxu1 %v7004_v15  ;;  %v8059_v63 = vld [vmem:[#allocation5 + $0x394] sm:$0xf]  ;;  %v5856_v15 = vor.u32 %v7995_v19, %v5853_v47 }
 0x285   :  { %v8415_v10 = vld [vmem:[#allocation5 + $0xeac] sm:$0xf0]  ;;  %v6109_v25 = vld [vmem:[#allocation5 + $0x3b0] sm:$0xf0] }
 0x286   :  { %v6715_v31 = vld [vmem:[#allocation5 + $0x850] sm:$0xf]  ;;  %v7516_v21 = vor.u32 %v8415_v10, %v7515_v9  ;;  %4595 = vmatpush.bf16.msrb.mxu2 %v7260_v38  ;;  %v8123_v9 = vld [vmem:[#allocation5 + $0x594] sm:$0xf]  ;;  %v6112_v38 = vor.u32 %v8059_v63, %v6109_v25 }
 0x287   :  { %v8215_v55 = vld [vmem:[#allocation5 + $0x86c] sm:$0xf0]  ;;  %v6365_v10 = vld [vmem:[#allocation5 + $0x5b0] sm:$0xf0] }
 0x288   :  { %v6971_v33 = vld [vmem:[#allocation5 + $0xa50] sm:$0xf]  ;;  %v6716_v48 = vor.u32 %v8215_v55, %v6715_v31  ;;  %4608 = vmatpush.bf16.msrb.mxu3 %v7516_v21  ;;  %v8187_v31 = vld [vmem:[#allocation5 + $0x794] sm:$0xf]  ;;  %v6368_v21 = vor.u32 %v8123_v9, %v6365_v10 }
 0x289   :  { %v8279_v37 = vld [vmem:[#allocation5 + $0xa6c] sm:$0xf0]  ;;  %v6621_v55 = vld [vmem:[#allocation5 + $0x7b0] sm:$0xf0] }
 0x28a   :  { %v7227_v20 = vld [vmem:[#allocation5 + $0xc50] sm:$0xf]  ;;  %v6972_v57 = vor.u32 %v8279_v37, %v6971_v33  ;;  %4570 = vmatpush.bf16.msrb.mxu0 %v6716_v48  ;;  %v7987_v33 = vld [vmem:[#allocation5 + $0x154] sm:$0xf] }
 0x28b   :  { %v8343_v22 = vld [vmem:[#allocation5 + $0xc6c] sm:$0xf0]  ;;  %v5821_v37 = vld [vmem:[#allocation5 + $0x170] sm:$0xf0] }
 0x28c   :  { %v7483_v39 = vld [vmem:[#allocation5 + $0xe50] sm:$0xf]  ;;  %v7228_v27 = vor.u32 %v8343_v22, %v7227_v20  ;;  %4583 = vmatpush.bf16.msrb.mxu1 %v6972_v57  ;;  %v8051_v20 = vld [vmem:[#allocation5 + $0x354] sm:$0xf] }
 0x28d   :  { %v8407_v46 = vld [vmem:[#allocation5 + $0xe6c] sm:$0xf0]  ;;  %v6077_v22 = vld [vmem:[#allocation5 + $0x370] sm:$0xf0] }
 0x28e   :  { %v6683_v49 = vld [vmem:[#allocation5 + $0x810] sm:$0xf]  ;;  %v7484_v35 = vor.u32 %v8407_v46, %v7483_v39  ;;  %4596 = vmatpush.bf16.msrb.mxu2 %v7228_v27  ;;  %v6624_v39 = vor.u32 %v8187_v31, %v6621_v55  ;;  %v6333_v48 = vld [vmem:[#allocation5 + $0x570] sm:$0xf0]  ;;  %v5824_v46 = vor.u32 %v7987_v33, %v5821_v37  ;;  %v6080_v52 = vor.u32 %v8051_v20, %v6077_v22  ;;  %v4391_v22 = vpop.f32.mrf.mxu2 }
 0x28f   :  { %v8207_v50 = vld [vmem:[#allocation5 + $0x82c] sm:$0xf0]  ;;  %v6336_v57 = vor.u32 %v8115_v44, %v6333_v48  ;;  %v8107_v27 = vld [vmem:[#allocation5 + $0x514] sm:$0xf] }
 0x290   :  { %v6939_v2 = vld [vmem:[#allocation5 + $0xa10] sm:$0xf]  ;;  %v6684_v40 = vor.u32 %v8207_v50, %v6683_v49  ;;  %4609 = vmatpush.bf16.msrb.mxu3 %v7484_v35  ;;  %v8179_v49 = vld [vmem:[#allocation5 + $0x754] sm:$0xf] }
 0x291   :  { %v8271_v3 = vld [vmem:[#allocation5 + $0xa2c] sm:$0xf0]  ;;  %v6589_v50 = vld [vmem:[#allocation5 + $0x770] sm:$0xf0] }
 0x292   :  { %v7195_v58 = vld [vmem:[#allocation5 + $0xc10] sm:$0xf]  ;;  %v6940_v62 = vor.u32 %v8271_v3, %v6939_v2  ;;  %4571 = vmatpush.bf16.msrb.mxu0 %v6684_v40  ;;  %v8043_v2 = vld [vmem:[#allocation5 + $0x314] sm:$0xf] }
 0x293   :  { %v8335_v5 = vld [vmem:[#allocation5 + $0xc2c] sm:$0xf0]  ;;  %v6045_v3 = vld [vmem:[#allocation5 + $0x330] sm:$0xf0] }
 0x294   :  { %v7451_v60 = vld [vmem:[#allocation5 + $0xe10] sm:$0xf]  ;;  %v7196_v0 = vor.u32 %v8335_v5, %v7195_v58  ;;  %4584 = vmatpush.bf16.msrb.mxu1 %v6940_v62  ;;  %v6592_v58 = vor.u32 %v8179_v49, %v6589_v50  ;;  %v6301_v5 = vld [vmem:[#allocation5 + $0x530] sm:$0xf0]  ;;  %v4404_v50 = vpop.f32.mrf.mxu3 }
 0x295   :  { %v8399_v61 = vld [vmem:[#allocation5 + $0xe2c] sm:$0xf0]  ;;  %4572 = vmatmul.bf16.vlgmr.msrb.gmra.mxu0 %v8956_v43  ;;  %v6557_v35 = vld [vmem:[#allocation5 + $0x730] sm:$0xf0]  ;;  %v6304_v12 = vor.u32 %v8107_v27, %v6301_v5 }
 0x296   :  { %v7452_v1 = vor.u32 %v8399_v61, %v7451_v60  ;;  %4616 = vmatpush.bf16.msra.mxu0 %v5888_v26  ;;  %4597 = vmatpush.bf16.msrb.mxu2 %v7196_v0  ;;  %v6048_v60 = vor.u32 %v8043_v2, %v6045_v3  ;;  %v5757_v45 = vld [vmem:[#allocation5 + $0xf0] sm:$0xf0]  ;;  %v6560_v14 = vor.u32 %v8171_v59, %v6557_v35  ;;  %v4365_v26 = vpop.f32.mrf.mxu0 }
 0x297   :  { %4585 = vmatmul.bf16.vlgmr.msrb.gmra.mxu1 %v8976_v36  ;;  %v8035_v40 = vld [vmem:[#allocation5 + $0x2d4] sm:$0xf]  ;;  %v5760_v17 = vor.u32 %v7971_v11, %v5757_v45 }
 0x298   :  { %4629 = vmatpush.bf16.msra.mxu1 %v6144_v18  ;;  %4610 = vmatpush.bf16.msrb.mxu3 %v7452_v1  ;;  %v6013_v61 = vld [vmem:[#allocation5 + $0x2f0] sm:$0xf0]  ;;  %v4366_v18 = vadd.f32 %v4365_v26, %v9030_v7 }
 0x299   :  { %4598 = vmatmul.bf16.vlgmr.msrb.gmra.mxu2 %v8946_v51  ;;  %v8099_v41 = vld [vmem:[#allocation5 + $0x4d4] sm:$0xf]  ;;  %v6016_v19 = vor.u32 %v8035_v40, %v6013_v61 }
 0x29a   :  { %4642 = vmatpush.bf16.msra.mxu2 %v6400_v24  ;;  %4617 = vmatpush.bf16.msra.mxu0 %v5856_v15  ;;  %v6269_v62 = vld [vmem:[#allocation5 + $0x4f0] sm:$0xf0]  ;;  %v4379_v32 = vadd.f32 %v4378_v54, %v4366_v18 }
 0x29b   :  { %4611 = vmatmul.bf16.vlgmr.msrb.gmra.mxu3 %v8966_v16  ;;  %v8163_v42 = vld [vmem:[#allocation5 + $0x6d4] sm:$0xf]  ;;  %v6272_v24 = vor.u32 %v8099_v41, %v6269_v62 }
 0x29c   :  { %4655 = vmatpush.bf16.msra.mxu3 %v6656_v4  ;;  %4630 = vmatpush.bf16.msra.mxu1 %v6112_v38  ;;  %v6525_v0 = vld [vmem:[#allocation5 + $0x6f0] sm:$0xf0]  ;;  %v4392_v49 = vadd.f32 %v4391_v22, %v4379_v32 }
 0x29d   :  { %v7963_v47 = vld [vmem:[#allocation5 + $0x94] sm:$0xf]  ;;  %v6528_v4 = vor.u32 %v8163_v42, %v6525_v0 }
 0x29e   :  { %4643 = vmatpush.bf16.msra.mxu2 %v6368_v21  ;;  %4618 = vmatpush.bf16.msra.mxu0 %v5824_v46  ;;  %v5725_v1 = vld [vmem:[#allocation5 + $0xb0] sm:$0xf0]  ;;  %v4367_v2 = vpop.f32.mrf.mxu0 }
 0x29f   :  { %v8027_v63 = vld [vmem:[#allocation5 + $0x294] sm:$0xf]  ;;  %v5728_v15 = vor.u32 %v7963_v47, %v5725_v1 }
 0x2a0   :  { %4656 = vmatpush.bf16.msra.mxu3 %v6624_v39  ;;  %4631 = vmatpush.bf16.msra.mxu1 %v6080_v52  ;;  %v5981_v25 = vld [vmem:[#allocation5 + $0x2b0] sm:$0xf0] }
 0x2a1   :  { %v8091_v9 = vld [vmem:[#allocation5 + $0x494] sm:$0xf]  ;;  %v5984_v38 = vor.u32 %v8027_v63, %v5981_v25 }
 0x2a2   :  { %4644 = vmatpush.bf16.msra.mxu2 %v6336_v57  ;;  %4619 = vmatpush.bf16.msra.mxu0 %v5792_v6  ;;  %v6237_v10 = vld [vmem:[#allocation5 + $0x4b0] sm:$0xf0]  ;;  %v9037_v6 = vadd.f32 %v4404_v50, %v4392_v49 }
 0x2a3   :  { %v8155_v31 = vld [vmem:[#allocation5 + $0x694] sm:$0xf]  ;;  %v6240_v37 = vor.u32 %v8091_v9, %v6237_v10  ;;  %v4393_v10 = vpop.f32.mrf.mxu2 }
 0x2a4   :  { %4657 = vmatpush.bf16.msra.mxu3 %v6592_v58  ;;  %4632 = vmatpush.bf16.msra.mxu1 %v6048_v60  ;;  %v6493_v55 = vld [vmem:[#allocation5 + $0x6b0] sm:$0xf0] }
 0x2a5   :  { %v7955_v7 = vld [vmem:[#allocation5 + $0x54] sm:$0xf]  ;;  %v6496_v39 = vor.u32 %v8155_v31, %v6493_v55  ;;  %v4406_v55 = vpop.f32.mrf.mxu3 }
 0x2a6   :  { %4645 = vmatpush.bf16.msra.mxu2 %v6304_v12  ;;  %4620 = vmatpush.bf16.msra.mxu0 %v5760_v17  ;;  %v5693_v33 = vld [vmem:[#allocation5 + $0x70] sm:$0xf0] }
 0x2a7   :  { %v8019_v21 = vld [vmem:[#allocation5 + $0x254] sm:$0xf]  ;;  %v5696_v52 = vor.u32 %v7955_v7, %v5693_v33 }
 0x2a8   :  { %4658 = vmatpush.bf16.msra.mxu3 %v6560_v14  ;;  %4633 = vmatpush.bf16.msra.mxu1 %v6016_v19  ;;  %v5949_v20 = vld [vmem:[#allocation5 + $0x270] sm:$0xf0]  ;;  %v4380_v14 = vpop.f32.mrf.mxu1 }
 0x2a9   :  { %v8083_v44 = vld [vmem:[#allocation5 + $0x454] sm:$0xf]  ;;  %v5952_v3 = vor.u32 %v8019_v21, %v5949_v20  ;;  %v1316_v14 = vperm.slane %v9027_v8, 3 }
 0x2aa   :  { %4646 = vmatpush.bf16.msra.mxu2 %v6272_v24  ;;  %v6205_v48 = vld [vmem:[#allocation5 + $0x470] sm:$0xf0]  ;;  %4621 = vmatpush.bf16.msra.mxu0 %v5728_v15 }
 0x2ab   :  { %v8147_v46 = vld [vmem:[#allocation5 + $0x654] sm:$0xf]  ;;  %v6208_v59 = vor.u32 %v8083_v44, %v6205_v48 }
 0x2ac   :  { %4659 = vmatpush.bf16.msra.mxu3 %v6528_v4  ;;  %v6461_v53 = vld [vmem:[#allocation5 + $0x670] sm:$0xf0]  ;;  %4634 = vmatpush.bf16.msra.mxu1 %v5984_v38 }
 0x2ad   :  { %v7947_v28 = vld [vmem:[#allocation5 + $0x14] sm:$0xf]  ;;  %v6464_v45 = vor.u32 %v8147_v46, %v6461_v53 }
 0x2ae   :  { %v5661_v57 = vld [vmem:[#allocation5 + $0x30] sm:$0xf0]  ;;  %4647 = vmatpush.bf16.msra.mxu2 %v6240_v37  ;;  %4622 = vmatpush.bf16.msra.mxu0 %v5696_v52 }
 0x2af   :  { %v8011_v58 = vld [vmem:[#allocation5 + $0x214] sm:$0xf]  ;;  %v5664_v41 = vor.u32 %v7947_v28, %v5661_v57 }
 0x2b0   :  { %v5917_v27 = vld [vmem:[#allocation5 + $0x230] sm:$0xf0]  ;;  %4660 = vmatpush.bf16.msra.mxu3 %v6496_v39  ;;  %4635 = vmatpush.bf16.msra.mxu1 %v5952_v3 }
 0x2b1   :  { %v8075_v5 = vld [vmem:[#allocation5 + $0x414] sm:$0xf]  ;;  %v5920_v42 = vor.u32 %v8011_v58, %v5917_v27 }
 0x2b2   :  { %v6173_v35 = vld [vmem:[#allocation5 + $0x430] sm:$0xf0]  ;;  %4648 = vmatpush.bf16.msra.mxu2 %v6208_v59  ;;  %4623 = vmatpush.bf16.msra.mxu0 %v5664_v41 }
 0x2b3   :  { %v8259_v60 = vld [vmem:[#allocation5 + $0x9d4] sm:$0xf]  ;;  %v6176_v47 = vor.u32 %v8075_v5, %v6173_v35 }
 0x2b4   :  { %v6909_v11 = vld [vmem:[#allocation5 + $0x9f0] sm:$0xf0]  ;;  %4661 = vmatpush.bf16.msra.mxu3 %v6464_v45  ;;  %4636 = vmatpush.bf16.msra.mxu1 %v5920_v42 }
 0x2b5   :  { %v8139_v12 = vld [vmem:[#allocation5 + $0x614] sm:$0xf]  ;;  %v6912_v0 = vor.u32 %v8259_v60, %v6909_v11  ;;  %4624 = vmatmul.bf16.vlgmr.msra.gmra.mxu0 %v8904_v29 }
 0x2b6   :  { %v8323_v40 = vld [vmem:[#allocation5 + $0xbd4] sm:$0xf]  ;;  %4649 = vmatpush.bf16.msra.mxu2 %v6176_v47 }
 0x2b7   :  { %v7165_v61 = vld [vmem:[#allocation5 + $0xbf0] sm:$0xf0]  ;;  %4668 = vmatpush.bf16.msrb.mxu0 %v6912_v0  ;;  %4637 = vmatmul.bf16.vlgmr.msra.gmra.mxu1 %v8936_v56 }
 0x2b8   :  { %v6429_v62 = vld [vmem:[#allocation5 + $0x630] sm:$0xf0]  ;;  %v7168_v1 = vor.u32 %v8323_v40, %v7165_v61 }
 0x2b9   :  { %v8387_v26 = vld [vmem:[#allocation5 + $0xdd4] sm:$0xf]  ;;  %v6432_v25 = vor.u32 %v8139_v12, %v6429_v62  ;;  %4650 = vmatmul.bf16.vlgmr.msra.gmra.mxu2 %v8894_v13 }
 0x2ba   :  { %v7421_v17 = vld [vmem:[#allocation5 + $0xdf0] sm:$0xf0]  ;;  %4681 = vmatpush.bf16.msrb.mxu1 %v7168_v1  ;;  %v4417_v1 = vpop.f32.mrf.mxu0 }
 0x2bb   :  { %v8451_v18 = vld [vmem:[#allocation5 + $0xfd4] sm:$0xf]  ;;  %v7424_v54 = vor.u32 %v8387_v26, %v7421_v17  ;;  %4662 = vmatpush.bf16.msra.mxu3 %v6432_v25 }
 0x2bc   :  { %v7677_v19 = vld [vmem:[#allocation5 + $0xff0] sm:$0xf0] }
 0x2bd   :  { %v8251_v24 = vld [vmem:[#allocation5 + $0x994] sm:$0xf]  ;;  %v7680_v32 = vor.u32 %v8451_v18, %v7677_v19  ;;  %4694 = vmatpush.bf16.msrb.mxu2 %v7424_v54  ;;  %v4418_v54 = vadd.f32 %v4417_v1, %v1316_v14 }
 0x2be   :  { %v6877_v63 = vld [vmem:[#allocation5 + $0x9b0] sm:$0xf0]  ;;  %4663 = vmatmul.bf16.vlgmr.msra.gmra.mxu3 %v8914_v23 }
 0x2bf   :  { %v8315_v4 = vld [vmem:[#allocation5 + $0xb94] sm:$0xf]  ;;  %v6880_v38 = vor.u32 %v8251_v24, %v6877_v63  ;;  %4707 = vmatpush.bf16.msrb.mxu3 %v7680_v32 }
 0x2c0   :  { %v7133_v9 = vld [vmem:[#allocation5 + $0xbb0] sm:$0xf0] }
 0x2c1   :  { %v8379_v15 = vld [vmem:[#allocation5 + $0xd94] sm:$0xf]  ;;  %v7136_v37 = vor.u32 %v8315_v4, %v7133_v9  ;;  %4669 = vmatpush.bf16.msrb.mxu0 %v6880_v38 }
 0x2c2   :  { %v7389_v31 = vld [vmem:[#allocation5 + $0xdb0] sm:$0xf0] }
 0x2c3   :  { %v8443_v7 = vld [vmem:[#allocation5 + $0xf94] sm:$0xf]  ;;  %v7392_v22 = vor.u32 %v8379_v15, %v7389_v31  ;;  %4682 = vmatpush.bf16.msrb.mxu1 %v7136_v37  ;;  %v4430_v31 = vpop.f32.mrf.mxu1 }
 0x2c4   :  { %v7645_v33 = vld [vmem:[#allocation5 + $0xfb0] sm:$0xf0] }
 0x2c5   :  { %v8243_v21 = vld [vmem:[#allocation5 + $0x954] sm:$0xf]  ;;  %v7648_v48 = vor.u32 %v8443_v7, %v7645_v33  ;;  %4695 = vmatpush.bf16.msrb.mxu2 %v7392_v22  ;;  %v4431_v33 = vadd.f32 %v4430_v31, %v4418_v54 }
 0x2c6   :  { %v6845_v20 = vld [vmem:[#allocation5 + $0x970] sm:$0xf0] }
 0x2c7   :  { %v8307_v39 = vld [vmem:[#allocation5 + $0xb54] sm:$0xf]  ;;  %v6848_v50 = vor.u32 %v8243_v21, %v6845_v20  ;;  %4708 = vmatpush.bf16.msrb.mxu3 %v7648_v48 }
 0x2c8   :  { %v7101_v44 = vld [vmem:[#allocation5 + $0xb70] sm:$0xf0] }
 0x2c9   :  { %v8371_v46 = vld [vmem:[#allocation5 + $0xd54] sm:$0xf]  ;;  %v7104_v28 = vor.u32 %v8307_v39, %v7101_v44  ;;  %4670 = vmatpush.bf16.msrb.mxu0 %v6848_v50 }
 0x2ca   :  { %v7357_v49 = vld [vmem:[#allocation5 + $0xd70] sm:$0xf0] }
 0x2cb   :  { %v8435_v52 = vld [vmem:[#allocation5 + $0xf54] sm:$0xf]  ;;  %v7360_v3 = vor.u32 %v8371_v46, %v7357_v49  ;;  %4683 = vmatpush.bf16.msrb.mxu1 %v7104_v28 }
 0x2cc   :  { %v7613_v53 = vld [vmem:[#allocation5 + $0xf70] sm:$0xf0] }
 0x2cd   :  { %v8235_v57 = vld [vmem:[#allocation5 + $0x914] sm:$0xf]  ;;  %v7616_v5 = vor.u32 %v8435_v52, %v7613_v53  ;;  %4696 = vmatpush.bf16.msrb.mxu2 %v7360_v3  ;;  %v4443_v52 = vpop.f32.mrf.mxu2 }
 0x2ce   :  { %v6813_v2 = vld [vmem:[#allocation5 + $0x930] sm:$0xf0]  ;;  %v4444_v3 = vadd.f32 %v4443_v52, %v4431_v33  ;;  %v6339_v52 = vld [vmem:[#allocation5 + $0x558] sm:$0xf] }
 0x2cf   :  { %v8299_v58 = vld [vmem:[#allocation5 + $0xb14] sm:$0xf]  ;;  %v6816_v60 = vor.u32 %v8235_v57, %v6813_v2  ;;  %4709 = vmatpush.bf16.msrb.mxu3 %v7616_v5 }
 0x2d0   :  { %v7069_v27 = vld [vmem:[#allocation5 + $0xb30] sm:$0xf0] }
 0x2d1   :  { %v8363_v59 = vld [vmem:[#allocation5 + $0xd14] sm:$0xf]  ;;  %v7072_v12 = vor.u32 %v8299_v58, %v7069_v27  ;;  %4671 = vmatpush.bf16.msrb.mxu0 %v6816_v60  ;;  %v4456_v58 = vpop.f32.mrf.mxu3  ;;  %v4419_v27 = vpop.f32.mrf.mxu0 }
 0x2d2   :  { %v7325_v35 = vld [vmem:[#allocation5 + $0xd30] sm:$0xf0]  ;;  %v7984_v27 = vld [vmem:[#allocation5 + $0x134] sm:$0xf0] }
 0x2d3   :  { %v8427_v11 = vld [vmem:[#allocation5 + $0xf14] sm:$0xf]  ;;  %v7328_v41 = vor.u32 %v8363_v59, %v7325_v35  ;;  %4684 = vmatpush.bf16.msrb.mxu1 %v7072_v12  ;;  %v5891_v12 = vld [vmem:[#allocation5 + $0x1d8] sm:$0xf] }
 0x2d4   :  { %v7581_v45 = vld [vmem:[#allocation5 + $0xf30] sm:$0xf0] }
 0x2d5   :  { %v8227_v40 = vld [vmem:[#allocation5 + $0x8d4] sm:$0xf]  ;;  %v7584_v17 = vor.u32 %v8427_v11, %v7581_v45  ;;  %4697 = vmatpush.bf16.msrb.mxu2 %v7328_v41  ;;  %v4445_v31 = vpop.f32.mrf.mxu2 }
 0x2d6   :  { %v6781_v61 = vld [vmem:[#allocation5 + $0x8f0] sm:$0xf0] }
 0x2d7   :  { %v8291_v62 = vld [vmem:[#allocation5 + $0xad4] sm:$0xf]  ;;  %v6784_v18 = vor.u32 %v8227_v40, %v6781_v61  ;;  %4710 = vmatpush.bf16.msrb.mxu3 %v7584_v17  ;;  %v8008_v40 = vld [vmem:[#allocation5 + $0x1f4] sm:$0xf0]  ;;  %v9044_v61 = vadd.f32 %v4456_v58, %v4444_v3  ;;  %v4432_v17 = vpop.f32.mrf.mxu1 }
 0x2d8   :  { %v7037_v26 = vld [vmem:[#allocation5 + $0xaf0] sm:$0xf0]  ;;  %v5892_v1 = vor.u32 %v8008_v40, %v5891_v12  ;;  %v5795_v58 = vld [vmem:[#allocation5 + $0x118] sm:$0xf] }
 0x2d9   :  { %v8355_v42 = vld [vmem:[#allocation5 + $0xcd4] sm:$0xf]  ;;  %v7040_v24 = vor.u32 %v8291_v62, %v7037_v26  ;;  %4672 = vmatpush.bf16.msrb.mxu0 %v6784_v18  ;;  %v6147_v62 = vld [vmem:[#allocation5 + $0x3d8] sm:$0xf]  ;;  %v4458_v33 = vpop.f32.mrf.mxu3  ;;  %v5796_v12 = vor.u32 %v7984_v27, %v5795_v58 }
 0x2da   :  { %v7293_v0 = vld [vmem:[#allocation5 + $0xcf0] sm:$0xf0]  ;;  %v8072_v26 = vld [vmem:[#allocation5 + $0x3f4] sm:$0xf0] }
 0x2db   :  { %v8419_v19 = vld [vmem:[#allocation5 + $0xed4] sm:$0xf]  ;;  %v7296_v8 = vor.u32 %v8355_v42, %v7293_v0  ;;  %4685 = vmatpush.bf16.msrb.mxu1 %v7040_v24  ;;  %v6403_v18 = vld [vmem:[#allocation5 + $0x5d8] sm:$0xf]  ;;  %v6148_v54 = vor.u32 %v8072_v26, %v6147_v62 }
 0x2dc   :  { %v7549_v47 = vld [vmem:[#allocation5 + $0xef0] sm:$0xf0]  ;;  %v6659_v24 = vld [vmem:[#allocation5 + $0x7d8] sm:$0xf] }
 0x2dd   :  { %v8219_v63 = vld [vmem:[#allocation5 + $0x894] sm:$0xf]  ;;  %v7552_v10 = vor.u32 %v8419_v19, %v7549_v47  ;;  %4698 = vmatpush.bf16.msrb.mxu2 %v7296_v8  ;;  %v8136_v19 = vld [vmem:[#allocation5 + $0x5f4] sm:$0xf0] }
 0x2de   :  { %v6749_v25 = vld [vmem:[#allocation5 + $0x8b0] sm:$0xf0]  ;;  %v5859_v8 = vld [vmem:[#allocation5 + $0x198] sm:$0xf] }
 0x2df   :  { %v8283_v4 = vld [vmem:[#allocation5 + $0xa94] sm:$0xf]  ;;  %v6752_v55 = vor.u32 %v8219_v63, %v6749_v25  ;;  %4711 = vmatpush.bf16.msrb.mxu3 %v7552_v10  ;;  %v8200_v63 = vld [vmem:[#allocation5 + $0x7f4] sm:$0xf0]  ;;  %v6404_v10 = vor.u32 %v8136_v19, %v6403_v18  ;;  %v4482_v31 = vpop.f32.mrf.mxu1 }
 0x2e0   :  { %v7005_v9 = vld [vmem:[#allocation5 + $0xab0] sm:$0xf0]  ;;  %v6563_v40 = vld [vmem:[#allocation5 + $0x718] sm:$0xf] }
 0x2e1   :  { %v8347_v32 = vld [vmem:[#allocation5 + $0xc94] sm:$0xf]  ;;  %v7008_v37 = vor.u32 %v8283_v4, %v7005_v9  ;;  %4673 = vmatpush.bf16.msrb.mxu0 %v6752_v55  ;;  %v8000_v4 = vld [vmem:[#allocation5 + $0x1b4] sm:$0xf0]  ;;  %v6660_v55 = vor.u32 %v8200_v63, %v6659_v24 }
 0x2e2   :  { %v7261_v15 = vld [vmem:[#allocation5 + $0xcb0] sm:$0xf0]  ;;  %v5763_v62 = vld [vmem:[#allocation5 + $0xd8] sm:$0xf] }
 0x2e3   :  { %v8411_v38 = vld [vmem:[#allocation5 + $0xe94] sm:$0xf]  ;;  %v7264_v22 = vor.u32 %v8347_v32, %v7261_v15  ;;  %4686 = vmatpush.bf16.msrb.mxu1 %v7008_v37  ;;  %v6115_v32 = vld [vmem:[#allocation5 + $0x398] sm:$0xf]  ;;  %v5860_v37 = vor.u32 %v8000_v4, %v5859_v8 }
 0x2e4   :  { %v7517_v7 = vld [vmem:[#allocation5 + $0xeb0] sm:$0xf0]  ;;  %v8064_v15 = vld [vmem:[#allocation5 + $0x3b4] sm:$0xf0] }
 0x2e5   :  { %v8211_v21 = vld [vmem:[#allocation5 + $0x854] sm:$0xf]  ;;  %v7520_v48 = vor.u32 %v8411_v38, %v7517_v7  ;;  %4699 = vmatpush.bf16.msrb.mxu2 %v7264_v22  ;;  %v6371_v38 = vld [vmem:[#allocation5 + $0x598] sm:$0xf]  ;;  %v6116_v22 = vor.u32 %v8064_v15, %v6115_v32 }
 0x2e6   :  { %v6717_v20 = vld [vmem:[#allocation5 + $0x870] sm:$0xf0]  ;;  %v8128_v7 = vld [vmem:[#allocation5 + $0x5b4] sm:$0xf0] }
 0x2e7   :  { %v8275_v39 = vld [vmem:[#allocation5 + $0xa54] sm:$0xf]  ;;  %v6720_v53 = vor.u32 %v8211_v21, %v6717_v20  ;;  %4712 = vmatpush.bf16.msrb.mxu3 %v7520_v48  ;;  %v6627_v21 = vld [vmem:[#allocation5 + $0x798] sm:$0xf]  ;;  %v6372_v48 = vor.u32 %v8128_v7, %v6371_v38 }
 0x2e8   :  { %v6973_v44 = vld [vmem:[#allocation5 + $0xa70] sm:$0xf0]  ;;  %v8192_v20 = vld [vmem:[#allocation5 + $0x7b4] sm:$0xf0] }
 0x2e9   :  { %v8339_v46 = vld [vmem:[#allocation5 + $0xc54] sm:$0xf]  ;;  %v6976_v5 = vor.u32 %v8275_v39, %v6973_v44  ;;  %4674 = vmatpush.bf16.msrb.mxu0 %v6720_v53  ;;  %v5827_v39 = vld [vmem:[#allocation5 + $0x158] sm:$0xf] }
 0x2ea   :  { %v7229_v49 = vld [vmem:[#allocation5 + $0xc70] sm:$0xf0]  ;;  %v7992_v44 = vld [vmem:[#allocation5 + $0x174] sm:$0xf0] }
 0x2eb   :  { %v8403_v50 = vld [vmem:[#allocation5 + $0xe54] sm:$0xf]  ;;  %v7232_v11 = vor.u32 %v8339_v46, %v7229_v49  ;;  %4687 = vmatpush.bf16.msrb.mxu1 %v6976_v5  ;;  %v6083_v46 = vld [vmem:[#allocation5 + $0x358] sm:$0xf] }
 0x2ec   :  { %v7485_v28 = vld [vmem:[#allocation5 + $0xe70] sm:$0xf0]  ;;  %v8056_v49 = vld [vmem:[#allocation5 + $0x374] sm:$0xf0] }
 0x2ed   :  { %v8203_v57 = vld [vmem:[#allocation5 + $0x814] sm:$0xf]  ;;  %v7488_v14 = vor.u32 %v8403_v50, %v7485_v28  ;;  %4700 = vmatpush.bf16.msrb.mxu2 %v7232_v11  ;;  %v6628_v50 = vor.u32 %v8192_v20, %v6627_v21  ;;  %v8120_v53 = vld [vmem:[#allocation5 + $0x574] sm:$0xf0]  ;;  %v5828_v28 = vor.u32 %v7992_v44, %v5827_v39  ;;  %v6084_v3 = vor.u32 %v8056_v49, %v6083_v46  ;;  %v4495_v49 = vpop.f32.mrf.mxu2 }
 0x2ee   :  { %v6685_v2 = vld [vmem:[#allocation5 + $0x830] sm:$0xf0]  ;;  %v6340_v5 = vor.u32 %v8120_v53, %v6339_v52  ;;  %v6307_v11 = vld [vmem:[#allocation5 + $0x518] sm:$0xf] }
 0x2ef   :  { %v8267_v59 = vld [vmem:[#allocation5 + $0xa14] sm:$0xf]  ;;  %v6688_v42 = vor.u32 %v8203_v57, %v6685_v2  ;;  %4713 = vmatpush.bf16.msrb.mxu3 %v7488_v14  ;;  %v6595_v57 = vld [vmem:[#allocation5 + $0x758] sm:$0xf] }
 0x2f0   :  { %v6941_v35 = vld [vmem:[#allocation5 + $0xa30] sm:$0xf0]  ;;  %v8184_v2 = vld [vmem:[#allocation5 + $0x774] sm:$0xf0] }
 0x2f1   :  { %v8331_v60 = vld [vmem:[#allocation5 + $0xc14] sm:$0xf]  ;;  %v6944_v47 = vor.u32 %v8267_v59, %v6941_v35  ;;  %4675 = vmatpush.bf16.msrb.mxu0 %v6688_v42  ;;  %v6051_v59 = vld [vmem:[#allocation5 + $0x318] sm:$0xf] }
 0x2f2   :  { %v7197_v45 = vld [vmem:[#allocation5 + $0xc30] sm:$0xf0]  ;;  %v8048_v35 = vld [vmem:[#allocation5 + $0x334] sm:$0xf0] }
 0x2f3   :  { %v8395_v41 = vld [vmem:[#allocation5 + $0xe14] sm:$0xf]  ;;  %v7200_v25 = vor.u32 %v8331_v60, %v7197_v45  ;;  %4688 = vmatpush.bf16.msrb.mxu1 %v6944_v47  ;;  %v6596_v60 = vor.u32 %v8184_v2, %v6595_v57  ;;  %v8112_v45 = vld [vmem:[#allocation5 + $0x534] sm:$0xf0]  ;;  %v4508_v2 = vpop.f32.mrf.mxu3 }
 0x2f4   :  { %v7453_v0 = vld [vmem:[#allocation5 + $0xe30] sm:$0xf0]  ;;  %4676 = vmatmul.bf16.vlgmr.msrb.gmra.mxu0 %v8956_v43  ;;  %v8176_v14 = vld [vmem:[#allocation5 + $0x734] sm:$0xf0]  ;;  %v6308_v17 = vor.u32 %v8112_v45, %v6307_v11 }
 0x2f5   :  { %v7456_v9 = vor.u32 %v8395_v41, %v7453_v0  ;;  %4720 = vmatpush.bf16.msra.mxu0 %v5892_v1  ;;  %4701 = vmatpush.bf16.msrb.mxu2 %v7200_v25  ;;  %v6052_v41 = vor.u32 %v8048_v35, %v6051_v59  ;;  %v7976_v26 = vld [vmem:[#allocation5 + $0xf4] sm:$0xf0]  ;;  %v6564_v18 = vor.u32 %v8176_v14, %v6563_v40  ;;  %v4469_v1 = vpop.f32.mrf.mxu0 }
 0x2f6   :  { %4689 = vmatmul.bf16.vlgmr.msrb.gmra.mxu1 %v8976_v36  ;;  %v6019_v42 = vld [vmem:[#allocation5 + $0x2d8] sm:$0xf]  ;;  %v5764_v24 = vor.u32 %v7976_v26, %v5763_v62 }
 0x2f7   :  { %4733 = vmatpush.bf16.msra.mxu1 %v6148_v54  ;;  %4714 = vmatpush.bf16.msrb.mxu3 %v7456_v9  ;;  %v8040_v0 = vld [vmem:[#allocation5 + $0x2f4] sm:$0xf0]  ;;  %v4470_v54 = vadd.f32 %v4469_v1, %v9044_v61 }
 0x2f8   :  { %4702 = vmatmul.bf16.vlgmr.msrb.gmra.mxu2 %v8946_v51  ;;  %v6275_v19 = vld [vmem:[#allocation5 + $0x4d8] sm:$0xf]  ;;  %v6020_v8 = vor.u32 %v8040_v0, %v6019_v42 }
 0x2f9   :  { %4746 = vmatpush.bf16.msra.mxu2 %v6404_v10  ;;  %4721 = vmatpush.bf16.msra.mxu0 %v5860_v37  ;;  %v8104_v47 = vld [vmem:[#allocation5 + $0x4f4] sm:$0xf0]  ;;  %v4483_v33 = vadd.f32 %v4482_v31, %v4470_v54 }
 0x2fa   :  { %4715 = vmatmul.bf16.vlgmr.msrb.gmra.mxu3 %v8966_v16  ;;  %v6531_v63 = vld [vmem:[#allocation5 + $0x6d8] sm:$0xf]  ;;  %v6276_v10 = vor.u32 %v8104_v47, %v6275_v19 }
 0x2fb   :  { %4759 = vmatpush.bf16.msra.mxu3 %v6660_v55  ;;  %4734 = vmatpush.bf16.msra.mxu1 %v6116_v22  ;;  %v8168_v25 = vld [vmem:[#allocation5 + $0x6f4] sm:$0xf0]  ;;  %v4496_v57 = vadd.f32 %v4495_v49, %v4483_v33 }
 0x2fc   :  { %v5731_v4 = vld [vmem:[#allocation5 + $0x98] sm:$0xf]  ;;  %v6532_v55 = vor.u32 %v8168_v25, %v6531_v63 }
 0x2fd   :  { %4747 = vmatpush.bf16.msra.mxu2 %v6372_v48  ;;  %4722 = vmatpush.bf16.msra.mxu0 %v5828_v28  ;;  %v7968_v9 = vld [vmem:[#allocation5 + $0xb4] sm:$0xf0]  ;;  %v4471_v59 = vpop.f32.mrf.mxu0 }
 0x2fe   :  { %v5987_v32 = vld [vmem:[#allocation5 + $0x298] sm:$0xf]  ;;  %v5732_v37 = vor.u32 %v7968_v9, %v5731_v4 }
 0x2ff   :  { %4760 = vmatpush.bf16.msra.mxu3 %v6628_v50  ;;  %4735 = vmatpush.bf16.msra.mxu1 %v6084_v3  ;;  %v8032_v15 = vld [vmem:[#allocation5 + $0x2b4] sm:$0xf0] }
 0x300   :  { %v6243_v38 = vld [vmem:[#allocation5 + $0x498] sm:$0xf]  ;;  %v5988_v22 = vor.u32 %v8032_v15, %v5987_v32 }
 0x301   :  { %4748 = vmatpush.bf16.msra.mxu2 %v6340_v5  ;;  %4723 = vmatpush.bf16.msra.mxu0 %v5796_v12  ;;  %v8096_v7 = vld [vmem:[#allocation5 + $0x4b4] sm:$0xf0]  ;;  %v9051_v12 = vadd.f32 %v4508_v2, %v4496_v57 }
 0x302   :  { %v6499_v21 = vld [vmem:[#allocation5 + $0x698] sm:$0xf]  ;;  %v6244_v44 = vor.u32 %v8096_v7, %v6243_v38  ;;  %v4497_v7 = vpop.f32.mrf.mxu2 }
 0x303   :  { %4761 = vmatpush.bf16.msra.mxu3 %v6596_v60  ;;  %4736 = vmatpush.bf16.msra.mxu1 %v6052_v41  ;;  %v8160_v20 = vld [vmem:[#allocation5 + $0x6b4] sm:$0xf0] }
 0x304   :  { %v5699_v61 = vld [vmem:[#allocation5 + $0x58] sm:$0xf]  ;;  %v6500_v50 = vor.u32 %v8160_v20, %v6499_v21  ;;  %v4510_v20 = vpop.f32.mrf.mxu3 }
 0x305   :  { %4749 = vmatpush.bf16.msra.mxu2 %v6308_v17  ;;  %4724 = vmatpush.bf16.msra.mxu0 %v5764_v24  ;;  %v7960_v39 = vld [vmem:[#allocation5 + $0x74] sm:$0xf0] }
 0x306   :  { %v5955_v48 = vld [vmem:[#allocation5 + $0x258] sm:$0xf]  ;;  %v5700_v3 = vor.u32 %v7960_v39, %v5699_v61 }
 0x307   :  { %4762 = vmatpush.bf16.msra.mxu3 %v6564_v18  ;;  %4737 = vmatpush.bf16.msra.mxu1 %v6020_v8  ;;  %v8024_v46 = vld [vmem:[#allocation5 + $0x274] sm:$0xf0]  ;;  %v4484_v18 = vpop.f32.mrf.mxu1 }
 0x308   :  { %v6211_v52 = vld [vmem:[#allocation5 + $0x458] sm:$0xf]  ;;  %v5956_v35 = vor.u32 %v8024_v46, %v5955_v48  ;;  %v9057_v18 = vld [vmem:[#allocation7] sm:$0xff] }
 0x309   :  { %4750 = vmatpush.bf16.msra.mxu2 %v6276_v10  ;;  %v8088_v53 = vld [vmem:[#allocation5 + $0x474] sm:$0xf0]  ;;  %4725 = vmatpush.bf16.msra.mxu0 %v5732_v37 }
 0x30a   :  { %v6467_v28 = vld [vmem:[#allocation5 + $0x658] sm:$0xf]  ;;  %v6212_v40 = vor.u32 %v8088_v53, %v6211_v52 }
 0x30b   :  { %4763 = vmatpush.bf16.msra.mxu3 %v6532_v55  ;;  %v8152_v58 = vld [vmem:[#allocation5 + $0x674] sm:$0xf0]  ;;  %4738 = vmatpush.bf16.msra.mxu1 %v5988_v22 }
 0x30c   :  { %v5667_v27 = vld [vmem:[#allocation5 + $0x18] sm:$0xf]  ;;  %v6468_v26 = vor.u32 %v8152_v58, %v6467_v28 }
 0x30d   :  { %v7952_v5 = vld [vmem:[#allocation5 + $0x34] sm:$0xf0]  ;;  %4751 = vmatpush.bf16.msra.mxu2 %v6244_v44  ;;  %4726 = vmatpush.bf16.msra.mxu0 %v5700_v3 }
 0x30e   :  { %v5923_v60 = vld [vmem:[#allocation5 + $0x218] sm:$0xf]  ;;  %v5668_v19 = vor.u32 %v7952_v5, %v5667_v27 }
 0x30f   :  { %v8016_v11 = vld [vmem:[#allocation5 + $0x234] sm:$0xf0]  ;;  %4764 = vmatpush.bf16.msra.mxu3 %v6500_v50  ;;  %4739 = vmatpush.bf16.msra.mxu1 %v5956_v35 }
 0x310   :  { %v6179_v45 = vld [vmem:[#allocation5 + $0x418] sm:$0xf]  ;;  %v5924_v63 = vor.u32 %v8016_v11, %v5923_v60 }
 0x311   :  { %v8080_v14 = vld [vmem:[#allocation5 + $0x434] sm:$0xf0]  ;;  %4752 = vmatpush.bf16.msra.mxu2 %v6212_v40  ;;  %4727 = vmatpush.bf16.msra.mxu0 %v5668_v19  ;;  %v1317_v19 = vperm.slane %v9057_v18, 4 }
 0x312   :  { %v6915_v41 = vld [vmem:[#allocation5 + $0x9d8] sm:$0xf]  ;;  %v6180_v4 = vor.u32 %v8080_v14, %v6179_v45 }
 0x313   :  { %v8264_v62 = vld [vmem:[#allocation5 + $0x9f4] sm:$0xf0]  ;;  %4765 = vmatpush.bf16.msra.mxu3 %v6468_v26  ;;  %4740 = vmatpush.bf16.msra.mxu1 %v5924_v63 }
 0x314   :  { %v6435_v17 = vld [vmem:[#allocation5 + $0x618] sm:$0xf]  ;;  %v6916_v25 = vor.u32 %v8264_v62, %v6915_v41  ;;  %4728 = vmatmul.bf16.vlgmr.msra.gmra.mxu0 %v8904_v29 }
 0x315   :  { %v7171_v42 = vld [vmem:[#allocation5 + $0xbd8] sm:$0xf]  ;;  %4753 = vmatpush.bf16.msra.mxu2 %v6180_v4 }
 0x316   :  { %v8328_v0 = vld [vmem:[#allocation5 + $0xbf4] sm:$0xf0]  ;;  %4772 = vmatpush.bf16.msrb.mxu0 %v6916_v25  ;;  %4741 = vmatmul.bf16.vlgmr.msra.gmra.mxu1 %v8936_v56 }
 0x317   :  { %v8144_v47 = vld [vmem:[#allocation5 + $0x634] sm:$0xf0]  ;;  %v7172_v9 = vor.u32 %v8328_v0, %v7171_v42 }
 0x318   :  { %v7427_v1 = vld [vmem:[#allocation5 + $0xdd8] sm:$0xf]  ;;  %v6436_v15 = vor.u32 %v8144_v47, %v6435_v17  ;;  %4754 = vmatmul.bf16.vlgmr.msra.gmra.mxu2 %v8894_v13 }
 0x319   :  { %v8392_v24 = vld [vmem:[#allocation5 + $0xdf4] sm:$0xf0]  ;;  %4785 = vmatpush.bf16.msrb.mxu1 %v7172_v9 }
 0x31a   :  { %v7683_v54 = vld [vmem:[#allocation5 + $0xfd8] sm:$0xf]  ;;  %v7428_v31 = vor.u32 %v8392_v24, %v7427_v1  ;;  %4766 = vmatpush.bf16.msra.mxu3 %v6436_v15 }
 0x31b   :  { %v8456_v8 = vld [vmem:[#allocation5 + $0xff4] sm:$0xf0] }
 0x31c   :  { %v6883_v10 = vld [vmem:[#allocation5 + $0x998] sm:$0xf]  ;;  %v7684_v33 = vor.u32 %v8456_v8, %v7683_v54  ;;  %4798 = vmatpush.bf16.msrb.mxu2 %v7428_v31 }
 0x31d   :  { %v8256_v32 = vld [vmem:[#allocation5 + $0x9b4] sm:$0xf0]  ;;  %4767 = vmatmul.bf16.vlgmr.msra.gmra.mxu3 %v8914_v23 }
 0x31e   :  { %v7139_v55 = vld [vmem:[#allocation5 + $0xb98] sm:$0xf]  ;;  %v6884_v22 = vor.u32 %v8256_v32, %v6883_v10  ;;  %4811 = vmatpush.bf16.msrb.mxu3 %v7684_v33  ;;  %v4521_v10 = vpop.f32.mrf.mxu0 }
 0x31f   :  { %v8320_v38 = vld [vmem:[#allocation5 + $0xbb4] sm:$0xf0] }
 0x320   :  { %v7395_v37 = vld [vmem:[#allocation5 + $0xd98] sm:$0xf]  ;;  %v7140_v44 = vor.u32 %v8320_v38, %v7139_v55  ;;  %4773 = vmatpush.bf16.msrb.mxu0 %v6884_v22  ;;  %v4522_v55 = vadd.f32 %v4521_v10, %v1317_v19  ;;  %v4534_v22 = vpop.f32.mrf.mxu1  ;;  %v5893_v19 = vld [vmem:[#allocation5 + $0x1f8] sm:$0xf0] }
 0x321   :  { %v8384_v21 = vld [vmem:[#allocation5 + $0xdb4] sm:$0xf0]  ;;  %v6405_v10 = vld [vmem:[#allocation5 + $0x5f8] sm:$0xf0] }
 0x322   :  { %v7651_v61 = vld [vmem:[#allocation5 + $0xf98] sm:$0xf]  ;;  %v7396_v49 = vor.u32 %v8384_v21, %v7395_v37  ;;  %4786 = vmatpush.bf16.msrb.mxu1 %v7140_v44 }
 0x323   :  { %v8448_v39 = vld [vmem:[#allocation5 + $0xfb4] sm:$0xf0] }
 0x324   :  { %v6851_v48 = vld [vmem:[#allocation5 + $0x958] sm:$0xf]  ;;  %v7652_v53 = vor.u32 %v8448_v39, %v7651_v61  ;;  %4799 = vmatpush.bf16.msrb.mxu2 %v7396_v49 }
 0x325   :  { %v8248_v46 = vld [vmem:[#allocation5 + $0x974] sm:$0xf0] }
 0x326   :  { %v7107_v50 = vld [vmem:[#allocation5 + $0xb58] sm:$0xf]  ;;  %v6852_v2 = vor.u32 %v8248_v46, %v6851_v48  ;;  %4812 = vmatpush.bf16.msrb.mxu3 %v7652_v53  ;;  %v4535_v48 = vadd.f32 %v4534_v22, %v4522_v55  ;;  %v6661_v55 = vld [vmem:[#allocation5 + $0x7f8] sm:$0xf0] }
 0x327   :  { %v8312_v52 = vld [vmem:[#allocation5 + $0xb74] sm:$0xf0]  ;;  %v8060_v22 = vld [vmem:[#allocation5 + $0x39c] sm:$0xf] }
 0x328   :  { %v7363_v28 = vld [vmem:[#allocation5 + $0xd58] sm:$0xf]  ;;  %v7108_v27 = vor.u32 %v8312_v52, %v7107_v50  ;;  %4774 = vmatpush.bf16.msrb.mxu0 %v6852_v2 }
 0x329   :  { %v8376_v57 = vld [vmem:[#allocation5 + $0xd74] sm:$0xf0] }
 0x32a   :  { %v7619_v3 = vld [vmem:[#allocation5 + $0xf58] sm:$0xf]  ;;  %v7364_v35 = vor.u32 %v8376_v57, %v7363_v28  ;;  %4787 = vmatpush.bf16.msrb.mxu1 %v7108_v27  ;;  %v4547_v27 = vpop.f32.mrf.mxu2 }
 0x32b   :  { %v8440_v58 = vld [vmem:[#allocation5 + $0xf74] sm:$0xf0] }
 0x32c   :  { %v6819_v5 = vld [vmem:[#allocation5 + $0x918] sm:$0xf]  ;;  %v7620_v45 = vor.u32 %v8440_v58, %v7619_v3  ;;  %4800 = vmatpush.bf16.msrb.mxu2 %v7364_v35 }
 0x32d   :  { %v8240_v59 = vld [vmem:[#allocation5 + $0x934] sm:$0xf0] }
 0x32e   :  { %v7075_v60 = vld [vmem:[#allocation5 + $0xb18] sm:$0xf]  ;;  %v6820_v41 = vor.u32 %v8240_v59, %v6819_v5  ;;  %4813 = vmatpush.bf16.msrb.mxu3 %v7620_v45  ;;  %v4560_v45 = vpop.f32.mrf.mxu3 }
 0x32f   :  { %v8304_v11 = vld [vmem:[#allocation5 + $0xb34] sm:$0xf0] }
 0x330   :  { %v7331_v40 = vld [vmem:[#allocation5 + $0xd18] sm:$0xf]  ;;  %v7076_v17 = vor.u32 %v8304_v11, %v7075_v60  ;;  %4775 = vmatpush.bf16.msrb.mxu0 %v6820_v41  ;;  %v4548_v11 = vadd.f32 %v4547_v27, %v4535_v48  ;;  %v8124_v48 = vld [vmem:[#allocation5 + $0x59c] sm:$0xf] }
 0x331   :  { %v8368_v14 = vld [vmem:[#allocation5 + $0xd34] sm:$0xf0]  ;;  %v6085_v27 = vld [vmem:[#allocation5 + $0x378] sm:$0xf0] }
 0x332   :  { %v7587_v62 = vld [vmem:[#allocation5 + $0xf18] sm:$0xf]  ;;  %v7332_v47 = vor.u32 %v8368_v14, %v7331_v40  ;;  %4788 = vmatpush.bf16.msrb.mxu1 %v7076_v17  ;;  %v4523_v40 = vpop.f32.mrf.mxu0 }
 0x333   :  { %v8432_v26 = vld [vmem:[#allocation5 + $0xf34] sm:$0xf0] }
 0x334   :  { %v6787_v42 = vld [vmem:[#allocation5 + $0x8d8] sm:$0xf]  ;;  %v7588_v63 = vor.u32 %v8432_v26, %v7587_v62  ;;  %4801 = vmatpush.bf16.msrb.mxu2 %v7332_v47  ;;  %v9060_v47 = vadd.f32 %v4560_v45, %v4548_v11  ;;  %v8180_v11 = vld [vmem:[#allocation5 + $0x75c] sm:$0xf] }
 0x335   :  { %v8232_v0 = vld [vmem:[#allocation5 + $0x8f4] sm:$0xf0]  ;;  %v6597_v45 = vld [vmem:[#allocation5 + $0x778] sm:$0xf0] }
 0x336   :  { %v7043_v1 = vld [vmem:[#allocation5 + $0xad8] sm:$0xf]  ;;  %v6788_v8 = vor.u32 %v8232_v0, %v6787_v42  ;;  %4814 = vmatpush.bf16.msrb.mxu3 %v7588_v63  ;;  %v8004_v0 = vld [vmem:[#allocation5 + $0x1dc] sm:$0xf] }
 0x337   :  { %v8296_v24 = vld [vmem:[#allocation5 + $0xaf4] sm:$0xf0]  ;;  %v8068_v63 = vld [vmem:[#allocation5 + $0x3dc] sm:$0xf] }
 0x338   :  { %v7299_v25 = vld [vmem:[#allocation5 + $0xcd8] sm:$0xf]  ;;  %v7044_v32 = vor.u32 %v8296_v24, %v7043_v1  ;;  %4776 = vmatpush.bf16.msrb.mxu0 %v6788_v8 }
 0x339   :  { %v8360_v54 = vld [vmem:[#allocation5 + $0xcf4] sm:$0xf0] }
 0x33a   :  { %v7555_v4 = vld [vmem:[#allocation5 + $0xed8] sm:$0xf]  ;;  %v7300_v38 = vor.u32 %v8360_v54, %v7299_v25  ;;  %4789 = vmatpush.bf16.msrb.mxu1 %v7044_v32  ;;  %v6149_v25 = vld [vmem:[#allocation5 + $0x3f8] sm:$0xf0]  ;;  %v4536_v54 = vpop.f32.mrf.mxu1 }
 0x33b   :  { %v8424_v9 = vld [vmem:[#allocation5 + $0xef4] sm:$0xf0]  ;;  %v7972_v54 = vld [vmem:[#allocation5 + $0xdc] sm:$0xf] }
 0x33c   :  { %v6755_v15 = vld [vmem:[#allocation5 + $0x898] sm:$0xf]  ;;  %v7556_v37 = vor.u32 %v8424_v9, %v7555_v4  ;;  %4802 = vmatpush.bf16.msrb.mxu2 %v7300_v38  ;;  %v8132_v9 = vld [vmem:[#allocation5 + $0x5dc] sm:$0xf] }
 0x33d   :  { %v8224_v31 = vld [vmem:[#allocation5 + $0x8b4] sm:$0xf0] }
 0x33e   :  { %v7011_v7 = vld [vmem:[#allocation5 + $0xa98] sm:$0xf]  ;;  %v6756_v61 = vor.u32 %v8224_v31, %v6755_v15  ;;  %4815 = vmatpush.bf16.msrb.mxu3 %v7556_v37  ;;  %v5896_v15 = vor.u32 %v8004_v0, %v5893_v19  ;;  %v8196_v31 = vld [vmem:[#allocation5 + $0x7dc] sm:$0xf] }
 0x33f   :  { %v8288_v33 = vld [vmem:[#allocation5 + $0xab4] sm:$0xf0]  ;;  %v5861_v37 = vld [vmem:[#allocation5 + $0x1b8] sm:$0xf0] }
 0x340   :  { %v7267_v21 = vld [vmem:[#allocation5 + $0xc98] sm:$0xf]  ;;  %v7012_v46 = vor.u32 %v8288_v33, %v7011_v7  ;;  %4777 = vmatpush.bf16.msrb.mxu0 %v6756_v61  ;;  %v6152_v7 = vor.u32 %v8068_v63, %v6149_v25  ;;  %v7996_v33 = vld [vmem:[#allocation5 + $0x19c] sm:$0xf] }
 0x341   :  { %v8352_v20 = vld [vmem:[#allocation5 + $0xcb4] sm:$0xf0]  ;;  %v6117_v61 = vld [vmem:[#allocation5 + $0x3b8] sm:$0xf0] }
 0x342   :  { %v7523_v39 = vld [vmem:[#allocation5 + $0xe98] sm:$0xf]  ;;  %v7268_v52 = vor.u32 %v8352_v20, %v7267_v21  ;;  %4790 = vmatpush.bf16.msrb.mxu1 %v7012_v46  ;;  %v6408_v20 = vor.u32 %v8132_v9, %v6405_v10  ;;  %v6373_v46 = vld [vmem:[#allocation5 + $0x5b8] sm:$0xf0] }
 0x343   :  { %v8416_v44 = vld [vmem:[#allocation5 + $0xeb4] sm:$0xf0]  ;;  %v8108_v0 = vld [vmem:[#allocation5 + $0x51c] sm:$0xf] }
 0x344   :  { %v6723_v49 = vld [vmem:[#allocation5 + $0x858] sm:$0xf]  ;;  %v7524_v57 = vor.u32 %v8416_v44, %v7523_v39  ;;  %4803 = vmatpush.bf16.msrb.mxu2 %v7268_v52  ;;  %v4549_v39 = vpop.f32.mrf.mxu2  ;;  %v6664_v44 = vor.u32 %v8196_v31, %v6661_v55  ;;  %v8188_v52 = vld [vmem:[#allocation5 + $0x79c] sm:$0xf]  ;;  %v4573_v55 = vpop.f32.mrf.mxu0 }
 0x345   :  { %v8216_v50 = vld [vmem:[#allocation5 + $0x874] sm:$0xf0]  ;;  %v6309_v19 = vld [vmem:[#allocation5 + $0x538] sm:$0xf0] }
 0x346   :  { %v6979_v53 = vld [vmem:[#allocation5 + $0xa58] sm:$0xf]  ;;  %v6724_v5 = vor.u32 %v8216_v50, %v6723_v49  ;;  %4816 = vmatpush.bf16.msrb.mxu3 %v7524_v57  ;;  %v4562_v49 = vpop.f32.mrf.mxu3  ;;  %v5864_v50 = vor.u32 %v7996_v33, %v5861_v37  ;;  %v7988_v57 = vld [vmem:[#allocation5 + $0x15c] sm:$0xf]  ;;  %v4574_v37 = vadd.f32 %v4573_v55, %v9060_v47 }
 0x347   :  { %v8280_v28 = vld [vmem:[#allocation5 + $0xa74] sm:$0xf0]  ;;  %v6565_v63 = vld [vmem:[#allocation5 + $0x738] sm:$0xf0] }
 0x348   :  { %v7235_v2 = vld [vmem:[#allocation5 + $0xc58] sm:$0xf]  ;;  %v6980_v14 = vor.u32 %v8280_v28, %v6979_v53  ;;  %4778 = vmatpush.bf16.msrb.mxu0 %v6724_v5  ;;  %v6629_v53 = vld [vmem:[#allocation5 + $0x7b8] sm:$0xf0]  ;;  %v6120_v28 = vor.u32 %v8060_v22, %v6117_v61 }
 0x349   :  { %v8344_v3 = vld [vmem:[#allocation5 + $0xc74] sm:$0xf0]  ;;  %v6632_v5 = vor.u32 %v8188_v52, %v6629_v53  ;;  %v8036_v9 = vld [vmem:[#allocation5 + $0x2dc] sm:$0xf] }
 0x34a   :  { %v7491_v58 = vld [vmem:[#allocation5 + $0xe58] sm:$0xf]  ;;  %v7236_v17 = vor.u32 %v8344_v3, %v7235_v2  ;;  %4791 = vmatpush.bf16.msrb.mxu1 %v6980_v14  ;;  %v5829_v2 = vld [vmem:[#allocation5 + $0x178] sm:$0xf0]  ;;  %v6376_v3 = vor.u32 %v8124_v48, %v6373_v46  ;;  %v4586_v48 = vpop.f32.mrf.mxu1 }
 0x34b   :  { %v8408_v59 = vld [vmem:[#allocation5 + $0xe74] sm:$0xf0]  ;;  %v7980_v14 = vld [vmem:[#allocation5 + $0x11c] sm:$0xf]  ;;  %v4587_v52 = vadd.f32 %v4586_v48, %v4574_v37 }
 0x34c   :  { %v6691_v35 = vld [vmem:[#allocation5 + $0x818] sm:$0xf]  ;;  %v7492_v1 = vor.u32 %v8408_v59, %v7491_v58  ;;  %4804 = vmatpush.bf16.msrb.mxu2 %v7236_v17  ;;  %v8052_v58 = vld [vmem:[#allocation5 + $0x35c] sm:$0xf] }
 0x34d   :  { %v8208_v60 = vld [vmem:[#allocation5 + $0x834] sm:$0xf0]  ;;  %v8116_v59 = vld [vmem:[#allocation5 + $0x55c] sm:$0xf]  ;;  %v6088_v40 = vor.u32 %v8052_v58, %v6085_v27 }
 0x34e   :  { %v6947_v41 = vld [vmem:[#allocation5 + $0xa18] sm:$0xf]  ;;  %v6692_v8 = vor.u32 %v8208_v60, %v6691_v35  ;;  %4817 = vmatpush.bf16.msrb.mxu3 %v7492_v1  ;;  %v6341_v35 = vld [vmem:[#allocation5 + $0x578] sm:$0xf0]  ;;  %v5832_v60 = vor.u32 %v7988_v57, %v5829_v2 }
 0x34f   :  { %v8272_v62 = vld [vmem:[#allocation5 + $0xa34] sm:$0xf0]  ;;  %v6053_v17 = vld [vmem:[#allocation5 + $0x338] sm:$0xf0] }
 0x350   :  { %v7203_v26 = vld [vmem:[#allocation5 + $0xc18] sm:$0xf]  ;;  %v6948_v32 = vor.u32 %v8272_v62, %v6947_v41  ;;  %4779 = vmatpush.bf16.msrb.mxu0 %v6692_v8  ;;  %v5797_v41 = vld [vmem:[#allocation5 + $0x138] sm:$0xf0]  ;;  %v6344_v62 = vor.u32 %v8116_v59, %v6341_v35  ;;  %v4599_v59 = vpop.f32.mrf.mxu2 }
 0x351   :  { %v8336_v42 = vld [vmem:[#allocation5 + $0xc34] sm:$0xf0]  ;;  %v5800_v1 = vor.u32 %v7980_v14, %v5797_v41  ;;  %v5765_v8 = vld [vmem:[#allocation5 + $0xf8] sm:$0xf0]  ;;  %v4612_v14 = vpop.f32.mrf.mxu3 }
 0x352   :  { %v7459_v24 = vld [vmem:[#allocation5 + $0xe18] sm:$0xf]  ;;  %v7204_v38 = vor.u32 %v8336_v42, %v7203_v26  ;;  %4792 = vmatpush.bf16.msrb.mxu1 %v6948_v32  ;;  %v8044_v26 = vld [vmem:[#allocation5 + $0x31c] sm:$0xf]  ;;  %v6600_v42 = vor.u32 %v8180_v11, %v6597_v45 }
 0x353   :  { %v8400_v4 = vld [vmem:[#allocation5 + $0xe34] sm:$0xf0]  ;;  %4780 = vmatmul.bf16.vlgmr.msrb.gmra.mxu0 %v8956_v43  ;;  %v6056_v25 = vor.u32 %v8044_v26, %v6053_v17  ;;  %v6021_v10 = vld [vmem:[#allocation5 + $0x2f8] sm:$0xf0] }
 0x354   :  { %v7460_v21 = vor.u32 %v8400_v4, %v7459_v24  ;;  %4824 = vmatpush.bf16.msra.mxu0 %v5896_v15  ;;  %4805 = vmatpush.bf16.msrb.mxu2 %v7204_v38  ;;  %v8172_v24 = vld [vmem:[#allocation5 + $0x71c] sm:$0xf]  ;;  %v6312_v4 = vor.u32 %v8108_v0, %v6309_v19  ;;  %v5768_v38 = vor.u32 %v7972_v54, %v5765_v8 }
 0x355   :  { %4793 = vmatmul.bf16.vlgmr.msrb.gmra.mxu1 %v8976_v36  ;;  %v6568_v32 = vor.u32 %v8172_v24, %v6565_v63  ;;  %v8100_v15 = vld [vmem:[#allocation5 + $0x4dc] sm:$0xf] }
 0x356   :  { %4837 = vmatpush.bf16.msra.mxu1 %v6152_v7  ;;  %4818 = vmatpush.bf16.msrb.mxu3 %v7460_v21  ;;  %v6277_v31 = vld [vmem:[#allocation5 + $0x4f8] sm:$0xf0]  ;;  %v6024_v21 = vor.u32 %v8036_v9, %v6021_v10 }
 0x357   :  { %4806 = vmatmul.bf16.vlgmr.msrb.gmra.mxu2 %v8946_v51  ;;  %v8164_v7 = vld [vmem:[#allocation5 + $0x6dc] sm:$0xf]  ;;  %v6280_v61 = vor.u32 %v8100_v15, %v6277_v31  ;;  %v4588_v31 = vpop.f32.mrf.mxu1 }
 0x358   :  { %4850 = vmatpush.bf16.msra.mxu2 %v6408_v20  ;;  %4825 = vmatpush.bf16.msra.mxu0 %v5864_v50  ;;  %v6533_v33 = vld [vmem:[#allocation5 + $0x6f8] sm:$0xf0] }
 0x359   :  { %4819 = vmatmul.bf16.vlgmr.msrb.gmra.mxu3 %v8966_v16  ;;  %v7964_v20 = vld [vmem:[#allocation5 + $0x9c] sm:$0xf]  ;;  %v6536_v46 = vor.u32 %v8164_v7, %v6533_v33 }
 0x35a   :  { %4863 = vmatpush.bf16.msra.mxu3 %v6664_v44  ;;  %4838 = vmatpush.bf16.msra.mxu1 %v6120_v28  ;;  %v5733_v22 = vld [vmem:[#allocation5 + $0xb8] sm:$0xf0] }
 0x35b   :  { %v8028_v39 = vld [vmem:[#allocation5 + $0x29c] sm:$0xf]  ;;  %v5736_v53 = vor.u32 %v7964_v20, %v5733_v22 }
 0x35c   :  { %4851 = vmatpush.bf16.msra.mxu2 %v6376_v3  ;;  %4826 = vmatpush.bf16.msra.mxu0 %v5832_v60  ;;  %v5989_v44 = vld [vmem:[#allocation5 + $0x2b8] sm:$0xf0] }
 0x35d   :  { %v8092_v49 = vld [vmem:[#allocation5 + $0x49c] sm:$0xf]  ;;  %v5992_v2 = vor.u32 %v8028_v39, %v5989_v44 }
 0x35e   :  { %4864 = vmatpush.bf16.msra.mxu3 %v6632_v5  ;;  %4839 = vmatpush.bf16.msra.mxu1 %v6088_v40  ;;  %v6245_v50 = vld [vmem:[#allocation5 + $0x4b8] sm:$0xf0]  ;;  %v4600_v40 = vadd.f32 %v4599_v59, %v4587_v52 }
 0x35f   :  { %v8156_v28 = vld [vmem:[#allocation5 + $0x69c] sm:$0xf]  ;;  %v6248_v58 = vor.u32 %v8092_v49, %v6245_v50 }
 0x360   :  { %4852 = vmatpush.bf16.msra.mxu2 %v6344_v62  ;;  %4827 = vmatpush.bf16.msra.mxu0 %v5800_v1  ;;  %v6501_v57 = vld [vmem:[#allocation5 + $0x6b8] sm:$0xf0]  ;;  %v9067_v63 = vadd.f32 %v4612_v14, %v4600_v40 }
 0x361   :  { %v7956_v47 = vld [vmem:[#allocation5 + $0x5c] sm:$0xf]  ;;  %v6504_v35 = vor.u32 %v8156_v28, %v6501_v57 }
 0x362   :  { %4865 = vmatpush.bf16.msra.mxu3 %v6600_v42  ;;  %4840 = vmatpush.bf16.msra.mxu1 %v6056_v25  ;;  %v5701_v3 = vld [vmem:[#allocation5 + $0x78] sm:$0xf0]  ;;  %v4575_v42 = vpop.f32.mrf.mxu0 }
 0x363   :  { %v8020_v27 = vld [vmem:[#allocation5 + $0x25c] sm:$0xf]  ;;  %v5704_v41 = vor.u32 %v7956_v47, %v5701_v3  ;;  %v4614_v47 = vpop.f32.mrf.mxu3 }
 0x364   :  { %4853 = vmatpush.bf16.msra.mxu2 %v6312_v4  ;;  %4828 = vmatpush.bf16.msra.mxu0 %v5768_v38  ;;  %v5957_v5 = vld [vmem:[#allocation5 + $0x278] sm:$0xf0] }
 0x365   :  { %v8084_v60 = vld [vmem:[#allocation5 + $0x45c] sm:$0xf]  ;;  %v5960_v0 = vor.u32 %v8020_v27, %v5957_v5 }
 0x366   :  { %4866 = vmatpush.bf16.msra.mxu3 %v6568_v32  ;;  %4841 = vmatpush.bf16.msra.mxu1 %v6024_v21  ;;  %v6213_v11 = vld [vmem:[#allocation5 + $0x478] sm:$0xf0] }
 0x367   :  { %v8148_v45 = vld [vmem:[#allocation5 + $0x65c] sm:$0xf]  ;;  %v6216_v25 = vor.u32 %v8084_v60, %v6213_v11 }
 0x368   :  { %4854 = vmatpush.bf16.msra.mxu2 %v6280_v61  ;;  %4829 = vmatpush.bf16.msra.mxu0 %v5736_v53  ;;  %v6469_v62 = vld [vmem:[#allocation5 + $0x678] sm:$0xf0]  ;;  %v4601_v53 = vpop.f32.mrf.mxu2 }
 0x369   :  { %v7948_v26 = vld [vmem:[#allocation5 + $0x1c] sm:$0xf]  ;;  %v6472_v9 = vor.u32 %v8148_v45, %v6469_v62 }
 0x36a   :  { %4867 = vmatpush.bf16.msra.mxu3 %v6536_v46  ;;  %v5669_v17 = vld [vmem:[#allocation5 + $0x38] sm:$0xf0]  ;;  %4842 = vmatpush.bf16.msra.mxu1 %v5992_v2 }
 0x36b   :  { %v8012_v19 = vld [vmem:[#allocation5 + $0x21c] sm:$0xf]  ;;  %v5672_v55 = vor.u32 %v7948_v26, %v5669_v17 }
 0x36c   :  { %v5925_v1 = vld [vmem:[#allocation5 + $0x238] sm:$0xf0]  ;;  %4855 = vmatpush.bf16.msra.mxu2 %v6248_v58  ;;  %4830 = vmatpush.bf16.msra.mxu0 %v5704_v41 }
 0x36d   :  { %v8076_v24 = vld [vmem:[#allocation5 + $0x41c] sm:$0xf]  ;;  %v5928_v37 = vor.u32 %v8012_v19, %v5925_v1 }
 0x36e   :  { %v6181_v54 = vld [vmem:[#allocation5 + $0x438] sm:$0xf0]  ;;  %4868 = vmatpush.bf16.msra.mxu3 %v6504_v35  ;;  %4843 = vmatpush.bf16.msra.mxu1 %v5960_v0 }
 0x36f   :  { %v8260_v8 = vld [vmem:[#allocation5 + $0x9dc] sm:$0xf]  ;;  %v6184_v61 = vor.u32 %v8076_v24, %v6181_v54 }
 0x370   :  { %v6917_v4 = vld [vmem:[#allocation5 + $0x9f8] sm:$0xf0]  ;;  %4856 = vmatpush.bf16.msra.mxu2 %v6216_v25  ;;  %4831 = vmatpush.bf16.msra.mxu0 %v5672_v55 }
 0x371   :  { %v8140_v10 = vld [vmem:[#allocation5 + $0x61c] sm:$0xf]  ;;  %v6920_v21 = vor.u32 %v8260_v8, %v6917_v4 }
 0x372   :  { %v8324_v32 = vld [vmem:[#allocation5 + $0xbdc] sm:$0xf]  ;;  %4869 = vmatpush.bf16.msra.mxu3 %v6472_v9  ;;  %4844 = vmatpush.bf16.msra.mxu1 %v5928_v37 }
 0x373   :  { %v7173_v15 = vld [vmem:[#allocation5 + $0xbf8] sm:$0xf0]  ;;  %4832 = vmatmul.bf16.vlgmr.msra.gmra.mxu0 %v8904_v29 }
 0x374   :  { %v6437_v38 = vld [vmem:[#allocation5 + $0x638] sm:$0xf0]  ;;  %v7176_v39 = vor.u32 %v8324_v32, %v7173_v15  ;;  %4876 = vmatpush.bf16.msrb.mxu0 %v6920_v21  ;;  %4857 = vmatpush.bf16.msra.mxu2 %v6184_v61  ;;  %v1318_v15 = vperm.slane %v9057_v18, 5 }
 0x375   :  { %v8388_v7 = vld [vmem:[#allocation5 + $0xddc] sm:$0xf]  ;;  %v6440_v46 = vor.u32 %v8140_v10, %v6437_v38  ;;  %4845 = vmatmul.bf16.vlgmr.msra.gmra.mxu1 %v8936_v56 }
 0x376   :  { %v7429_v33 = vld [vmem:[#allocation5 + $0xdf8] sm:$0xf0]  ;;  %4889 = vmatpush.bf16.msrb.mxu1 %v7176_v39 }
 0x377   :  { %v8452_v20 = vld [vmem:[#allocation5 + $0xfdc] sm:$0xf]  ;;  %v7432_v49 = vor.u32 %v8388_v7, %v7429_v33  ;;  %4870 = vmatpush.bf16.msra.mxu3 %v6440_v46  ;;  %4858 = vmatmul.bf16.vlgmr.msra.gmra.mxu2 %v8894_v13 }
 0x378   :  { %v7685_v22 = vld [vmem:[#allocation5 + $0xff8] sm:$0xf0] }
 0x379   :  { %v8252_v44 = vld [vmem:[#allocation5 + $0x99c] sm:$0xf]  ;;  %v7688_v28 = vor.u32 %v8452_v20, %v7685_v22  ;;  %4902 = vmatpush.bf16.msrb.mxu2 %v7432_v49  ;;  %v4625_v22 = vpop.f32.mrf.mxu0 }
 0x37a   :  { %v6885_v48 = vld [vmem:[#allocation5 + $0x9b8] sm:$0xf0]  ;;  %4871 = vmatmul.bf16.vlgmr.msra.gmra.mxu3 %v8914_v23 }
 0x37b   :  { %v8316_v50 = vld [vmem:[#allocation5 + $0xb9c] sm:$0xf]  ;;  %v6888_v3 = vor.u32 %v8252_v44, %v6885_v48  ;;  %4915 = vmatpush.bf16.msrb.mxu3 %v7688_v28  ;;  %v4626_v48 = vadd.f32 %v4625_v22, %v1318_v15 }
 0x37c   :  { %v7141_v52 = vld [vmem:[#allocation5 + $0xbb8] sm:$0xf0] }
 0x37d   :  { %v8380_v57 = vld [vmem:[#allocation5 + $0xd9c] sm:$0xf]  ;;  %v7144_v5 = vor.u32 %v8316_v50, %v7141_v52  ;;  %4877 = vmatpush.bf16.msrb.mxu0 %v6888_v3 }
 0x37e   :  { %v7397_v2 = vld [vmem:[#allocation5 + $0xdb8] sm:$0xf0] }
 0x37f   :  { %v8444_v58 = vld [vmem:[#allocation5 + $0xf9c] sm:$0xf]  ;;  %v7400_v60 = vor.u32 %v8380_v57, %v7397_v2  ;;  %4890 = vmatpush.bf16.msrb.mxu1 %v7144_v5  ;;  %v4638_v57 = vpop.f32.mrf.mxu1 }
 0x380   :  { %v7653_v27 = vld [vmem:[#allocation5 + $0xfb8] sm:$0xf0] }
 0x381   :  { %v8244_v59 = vld [vmem:[#allocation5 + $0x95c] sm:$0xf]  ;;  %v7656_v40 = vor.u32 %v8444_v58, %v7653_v27  ;;  %4903 = vmatpush.bf16.msrb.mxu2 %v7400_v60  ;;  %v4639_v58 = vadd.f32 %v4638_v57, %v4626_v48 }
 0x382   :  { %v6853_v35 = vld [vmem:[#allocation5 + $0x978] sm:$0xf0] }
 0x383   :  { %v8308_v11 = vld [vmem:[#allocation5 + $0xb5c] sm:$0xf]  ;;  %v6856_v62 = vor.u32 %v8244_v59, %v6853_v35  ;;  %4916 = vmatpush.bf16.msrb.mxu3 %v7656_v40 }
 0x384   :  { %v7109_v45 = vld [vmem:[#allocation5 + $0xb78] sm:$0xf0] }
 0x385   :  { %v8372_v14 = vld [vmem:[#allocation5 + $0xd5c] sm:$0xf]  ;;  %v7112_v42 = vor.u32 %v8308_v11, %v7109_v45  ;;  %4878 = vmatpush.bf16.msrb.mxu0 %v6856_v62 }
 0x386   :  { %v7365_v41 = vld [vmem:[#allocation5 + $0xd78] sm:$0xf0] }
 0x387   :  { %v8436_v26 = vld [vmem:[#allocation5 + $0xf5c] sm:$0xf]  ;;  %v7368_v1 = vor.u32 %v8372_v14, %v7365_v41  ;;  %4891 = vmatpush.bf16.msrb.mxu1 %v7112_v42  ;;  %v4651_v41 = vpop.f32.mrf.mxu2 }
 0x388   :  { %v7621_v17 = vld [vmem:[#allocation5 + $0xf78] sm:$0xf0]  ;;  %v4652_v42 = vadd.f32 %v4651_v41, %v4639_v58 }
 0x389   :  { %v8236_v0 = vld [vmem:[#allocation5 + $0x91c] sm:$0xf]  ;;  %v7624_v29 = vor.u32 %v8436_v26, %v7621_v17  ;;  %4904 = vmatpush.bf16.msrb.mxu2 %v7368_v1 }
 0x38a   :  { %v6821_v19 = vld [vmem:[#allocation5 + $0x938] sm:$0xf0] }
 0x38b   :  { %v8300_v24 = vld [vmem:[#allocation5 + $0xb1c] sm:$0xf]  ;;  %v6824_v13 = vor.u32 %v8236_v0, %v6821_v19  ;;  %4917 = vmatpush.bf16.msrb.mxu3 %v7624_v29  ;;  %v4664_v0 = vpop.f32.mrf.mxu3  ;;  %v4627_v19 = vpop.f32.mrf.mxu0 }
 0x38c   :  { %v7077_v25 = vld [vmem:[#allocation5 + $0xb38] sm:$0xf0] }
 0x38d   :  { %v8364_v54 = vld [vmem:[#allocation5 + $0xd1c] sm:$0xf]  ;;  %v7080_v10 = vor.u32 %v8300_v24, %v7077_v25  ;;  %4879 = vmatpush.bf16.msrb.mxu0 %v6824_v13  ;;  %v4665_v13 = vadd.f32 %v4664_v0, %v4652_v42 }
 0x38e   :  { %v7333_v8 = vld [vmem:[#allocation5 + $0xd38] sm:$0xf0] }
 0x38f   :  { %v8428_v4 = vld [vmem:[#allocation5 + $0xf1c] sm:$0xf]  ;;  %v7336_v31 = vor.u32 %v8364_v54, %v7333_v8  ;;  %4892 = vmatpush.bf16.msrb.mxu1 %v7080_v10 }
 0x390   :  { %v7589_v9 = vld [vmem:[#allocation5 + $0xf38] sm:$0xf0] }
 0x391   :  { %v8228_v32 = vld [vmem:[#allocation5 + $0x8dc] sm:$0xf]  ;;  %v7592_v38 = vor.u32 %v8428_v4, %v7589_v9  ;;  %4905 = vmatpush.bf16.msrb.mxu2 %v7336_v31 }
 0x392   :  { %v6789_v23 = vld [vmem:[#allocation5 + $0x8f8] sm:$0xf0] }
 0x393   :  { %v8292_v55 = vld [vmem:[#allocation5 + $0xadc] sm:$0xf]  ;;  %v6792_v37 = vor.u32 %v8228_v32, %v6789_v23  ;;  %4918 = vmatpush.bf16.msrb.mxu3 %v7592_v38  ;;  %v4640_v32 = vpop.f32.mrf.mxu1 }
 0x394   :  { %v7045_v56 = vld [vmem:[#allocation5 + $0xaf8] sm:$0xf0] }
 0x395   :  { %v8356_v7 = vld [vmem:[#allocation5 + $0xcdc] sm:$0xf]  ;;  %v7048_v61 = vor.u32 %v8292_v55, %v7045_v56  ;;  %4880 = vmatpush.bf16.msrb.mxu0 %v6792_v37  ;;  %v4677_v37 = vpop.f32.mrf.mxu0 }
 0x396   :  { %v7301_v33 = vld [vmem:[#allocation5 + $0xcf8] sm:$0xf0] }
 0x397   :  { %v8420_v21 = vld [vmem:[#allocation5 + $0xedc] sm:$0xf]  ;;  %v7304_v46 = vor.u32 %v8356_v7, %v7301_v33  ;;  %4893 = vmatpush.bf16.msrb.mxu1 %v7048_v61  ;;  %v4653_v7 = vpop.f32.mrf.mxu2  ;;  %v4666_v33 = vpop.f32.mrf.mxu3 }
 0x398   :  { %v7557_v20 = vld [vmem:[#allocation5 + $0xef8] sm:$0xf0] }
 0x399   :  { %v8220_v39 = vld [vmem:[#allocation5 + $0x89c] sm:$0xf]  ;;  %v7560_v52 = vor.u32 %v8420_v21, %v7557_v20  ;;  %4906 = vmatpush.bf16.msrb.mxu2 %v7304_v46  ;;  %v4678_v21 = vadd.f32 %v4677_v37, %v4665_v13  ;;  %v8480_v13 = vld [vmem:[#allocation8 + $0xb8] sm:$0xff] }
 0x39a   :  { %v6757_v44 = vld [vmem:[#allocation5 + $0x8b8] sm:$0xf0] }
 0x39b   :  { %v8284_v49 = vld [vmem:[#allocation5 + $0xa9c] sm:$0xf]  ;;  %v6760_v2 = vor.u32 %v8220_v39, %v6757_v44  ;;  %4919 = vmatpush.bf16.msrb.mxu3 %v7560_v52  ;;  %v4690_v20 = vpop.f32.mrf.mxu1 }
 0x39c   :  { %v7013_v50 = vld [vmem:[#allocation5 + $0xab8] sm:$0xf0]  ;;  %v4691_v22 = vadd.f32 %v4690_v20, %v4678_v21 }
 0x39d   :  { %v8348_v53 = vld [vmem:[#allocation5 + $0xc9c] sm:$0xf]  ;;  %v7016_v27 = vor.u32 %v8284_v49, %v7013_v50  ;;  %4881 = vmatpush.bf16.msrb.mxu0 %v6760_v2  ;;  %v4679_v48 = vpop.f32.mrf.mxu0 }
 0x39e   :  { %v7269_v28 = vld [vmem:[#allocation5 + $0xcb8] sm:$0xf0] }
 0x39f   :  { %v8412_v47 = vld [vmem:[#allocation5 + $0xe9c] sm:$0xf]  ;;  %v7272_v35 = vor.u32 %v8348_v53, %v7269_v28  ;;  %4894 = vmatpush.bf16.msrb.mxu1 %v7016_v27  ;;  %v4703_v61 = vpop.f32.mrf.mxu2  ;;  %v4716_v44 = vpop.f32.mrf.mxu3 }
 0x3a0   :  { %v7525_v3 = vld [vmem:[#allocation5 + $0xeb8] sm:$0xf0]  ;;  %v4704_v39 = vadd.f32 %v4703_v61, %v4691_v22  ;;  %v4946_v22 = vmul.f32 %v9021_v30, %v9021_v30 }
 0x3a1   :  { %v8212_v5 = vld [vmem:[#allocation5 + $0x85c] sm:$0xf]  ;;  %v7528_v45 = vor.u32 %v8412_v47, %v7525_v3  ;;  %4907 = vmatpush.bf16.msrb.mxu2 %v7272_v35 }
 0x3a2   :  { %v6725_v59 = vld [vmem:[#allocation5 + $0x878] sm:$0xf0]  ;;  %v9078_v46 = vadd.f32 %v4716_v44, %v4704_v39  ;;  %v4945_v39 = vmul.f32 %v9011_v34, %v9011_v34  ;;  %v4947_v44 = vmul.f32 %v9037_v6, %v9037_v6 }
 0x3a3   :  { %v8276_v60 = vld [vmem:[#allocation5 + $0xa5c] sm:$0xf]  ;;  %v6728_v62 = vor.u32 %v8212_v5, %v6725_v59  ;;  %4920 = vmatpush.bf16.msrb.mxu3 %v7528_v45  ;;  %v4692_v49 = vpop.f32.mrf.mxu1 }
 0x3a4   :  { %v6981_v11 = vld [vmem:[#allocation5 + $0xa78] sm:$0xf0] }
 0x3a5   :  { %v8340_v40 = vld [vmem:[#allocation5 + $0xc5c] sm:$0xf]  ;;  %v6984_v1 = vor.u32 %v8276_v60, %v6981_v11  ;;  %4882 = vmatpush.bf16.msrb.mxu0 %v6728_v62 }
 0x3a6   :  { %v7237_v14 = vld [vmem:[#allocation5 + $0xc78] sm:$0xf0] }
 0x3a7   :  { %v8404_v26 = vld [vmem:[#allocation5 + $0xe5c] sm:$0xf]  ;;  %v7240_v29 = vor.u32 %v8340_v40, %v7237_v14  ;;  %4895 = vmatpush.bf16.msrb.mxu1 %v6984_v1  ;;  %v4705_v50 = vpop.f32.mrf.mxu2  ;;  %v4718_v52 = vpop.f32.mrf.mxu3  ;;  %v1320_v1 = vperm.slane %v9057_v18, 7 }
 0x3a8   :  { %v7493_v17 = vld [vmem:[#allocation5 + $0xe78] sm:$0xf0] }
 0x3a9   :  { %v8204_v24 = vld [vmem:[#allocation5 + $0x81c] sm:$0xf]  ;;  %v7496_v4 = vor.u32 %v8404_v26, %v7493_v17  ;;  %4908 = vmatpush.bf16.msrb.mxu2 %v7240_v29 }
 0x3aa   :  { %v6693_v25 = vld [vmem:[#allocation5 + $0x838] sm:$0xf0] }
 0x3ab   :  { %v8268_v54 = vld [vmem:[#allocation5 + $0xa1c] sm:$0xf]  ;;  %v6696_v23 = vor.u32 %v8204_v24, %v6693_v25  ;;  %4921 = vmatpush.bf16.msrb.mxu3 %v7496_v4  ;;  %v8488_v4 = vld [vmem:[#allocation8 + $0xf8] sm:$0xff] }
 0x3ac   :  { %v6949_v8 = vld [vmem:[#allocation5 + $0xa38] sm:$0xf0] }
 0x3ad   :  { %v8332_v9 = vld [vmem:[#allocation5 + $0xc1c] sm:$0xf]  ;;  %v6952_v55 = vor.u32 %v8268_v54, %v6949_v8  ;;  %4883 = vmatpush.bf16.msrb.mxu0 %v6696_v23  ;;  %v8464_v54 = vld [vmem:[#allocation8 + $0x38] sm:$0xff] }
 0x3ae   :  { %v7205_v10 = vld [vmem:[#allocation5 + $0xc38] sm:$0xf0]  ;;  %v8472_v8 = vld [vmem:[#allocation8 + $0x78] sm:$0xff] }
 0x3af   :  { %v8396_v15 = vld [vmem:[#allocation5 + $0xe1c] sm:$0xf]  ;;  %v7208_v56 = vor.u32 %v8332_v9, %v7205_v10  ;;  %4896 = vmatpush.bf16.msrb.mxu1 %v6952_v55  ;;  %v4768_v2 = vpop.f32.mrf.mxu3 }
 0x3b0   :  { %v7461_v31 = vld [vmem:[#allocation5 + $0xe38] sm:$0xf0]  ;;  %4884 = vmatmul.bf16.vlgmr.msrb.gmra.mxu0 %v8956_v43  ;;  %v1319_v43 = vperm.slane %v9057_v18, 6 }
 0x3b1   :  { %v7464_v38 = vor.u32 %v8396_v15, %v7461_v31  ;;  %4909 = vmatpush.bf16.msrb.mxu2 %v7208_v56  ;;  %5517 = vmatpush.bf16.msra.mxu0 %v8464_v54  ;;  %v8463_v10 = vld [vmem:[#allocation8 + $0x30] sm:$0xff] }
 0x3b2   :  { %4897 = vmatmul.bf16.vlgmr.msrb.gmra.mxu1 %v8976_v36  ;;  %v4729_v36 = vpop.f32.mrf.mxu0  ;;  %v8471_v32 = vld [vmem:[#allocation8 + $0x70] sm:$0xff] }
 0x3b3   :  { %4922 = vmatpush.bf16.msrb.mxu3 %v7464_v38  ;;  %v4730_v53 = vadd.f32 %v4729_v36, %v1319_v43  ;;  %5530 = vmatpush.bf16.msra.mxu1 %v8472_v8  ;;  %v8479_v23 = vld [vmem:[#allocation8 + $0xb0] sm:$0xff]  ;;  %v4928_v38 = vadd.f32 %v9021_v30, %v9011_v34  ;;  %v4953_v36 = vadd.f32 %v4946_v22, %v4945_v39  ;;  %v8473_v22 = vld [vmem:[#allocation8 + $0x80] sm:$0xff] }
 0x3b4   :  { %4910 = vmatmul.bf16.vlgmr.msrb.gmra.mxu2 %v8946_v51  ;;  %v4742_v51 = vpop.f32.mrf.mxu1  ;;  %v8487_v15 = vld [vmem:[#allocation8 + $0xf0] sm:$0xff]  ;;  %v8481_v39 = vld [vmem:[#allocation8 + $0xc0] sm:$0xff] }
 0x3b5   :  { %v4743_v28 = vadd.f32 %v4742_v51, %v4730_v53  ;;  %5543 = vmatpush.bf16.msra.mxu2 %v8480_v13  ;;  %5518 = vmatpush.bf16.msra.mxu0 %v8463_v10  ;;  %v4929_v37 = vadd.f32 %v4928_v38, %v9037_v6  ;;  %v4948_v53 = vmul.f32 %v9051_v12, %v9051_v12  ;;  %v8460_v13 = vld [vmem:[#allocation8 + $0x18] sm:$0xff]  ;;  %v8466_v38 = vld [vmem:[#allocation8 + $0x48] sm:$0xff] }
 0x3b6   :  { %4923 = vmatmul.bf16.vlgmr.msrb.gmra.mxu3 %v8966_v16  ;;  %v4755_v16 = vpop.f32.mrf.mxu2  ;;  %v8484_v10 = vld [vmem:[#allocation8 + $0xd8] sm:$0xff] }
 0x3b7   :  { %v4756_v57 = vadd.f32 %v4755_v16, %v4743_v28  ;;  %v4770_v5 = vpop.f32.mrf.mxu3  ;;  %5556 = vmatpush.bf16.msra.mxu3 %v8488_v4  ;;  %5531 = vmatpush.bf16.msra.mxu1 %v8471_v32  ;;  %v4930_v61 = vadd.f32 %v4929_v37, %v9051_v12  ;;  %v8468_v4 = vld [vmem:[#allocation8 + $0x58] sm:$0xff] }
 0x3b8   :  { %v4950_v5 = vmul.f32 %v9078_v46, %v9078_v46 }
 0x3b9   :  { %v4769_v3 = vadd.f32 %v4768_v2, %v4756_v57  ;;  %5544 = vmatpush.bf16.msra.mxu2 %v8479_v23  ;;  %v4931_v48 = vadd.f32 %v4930_v61, %v9067_v63  ;;  %v4954_v2 = vadd.f32 %v4953_v36, %v4947_v44  ;;  %v8459_v23 = vld [vmem:[#allocation8 + $0x10] sm:$0xff]  ;;  %v8496_v44 = vld [vmem:[#allocation8 + $0x138] sm:$0xff] }
 0x3ba   :  { %v4731_v47 = vpop.f32.mrf.mxu0  ;;  %v8495_v36 = vld [vmem:[#allocation8 + $0x130] sm:$0xff] }
 0x3bb   :  { %5557 = vmatpush.bf16.msra.mxu3 %v8487_v15  ;;  %v4932_v57 = vadd.f32 %v4931_v48, %v9078_v46  ;;  %v4949_v47 = vmul.f32 %v9067_v63, %v9067_v63  ;;  %v8467_v15 = vld [vmem:[#allocation8 + $0x50] sm:$0xff]  ;;  %v8504_v48 = vld [vmem:[#allocation8 + $0x178] sm:$0xff] }
 0x3bc   :  { %v4744_v58 = vpop.f32.mrf.mxu1 }
 0x3be   :  { %v4757_v27 = vpop.f32.mrf.mxu2 }
 0x3bf   :  { %v4955_v27 = vadd.f32 %v4954_v2, %v4948_v53  ;;  %v8503_v53 = vld [vmem:[#allocation8 + $0x170] sm:$0xff]  ;;  %v8502_v2 = vld [vmem:[#allocation8 + $0x168] sm:$0xff] }
 0x3d0   :  { %v4781_v59 = vpop.f32.mrf.mxu0 }
 0x3d1   :  { %v4782_v31 = vadd.f32 %v4781_v59, %v4769_v3 }
 0x3d2   :  { %v4794_v35 = vpop.f32.mrf.mxu1 }
 0x3d3   :  { %v4795_v18 = vadd.f32 %v4794_v35, %v4782_v31  ;;  %v4956_v35 = vadd.f32 %v4955_v27, %v4949_v47  ;;  %v8475_v31 = vld [vmem:[#allocation8 + $0x90] sm:$0xff]  ;;  %v8518_v27 = vld [vmem:[#allocation8 + $0x1e8] sm:$0xff] }
 0x3d8   :  { %v4783_v45 = vpop.f32.mrf.mxu0 }
 0x3da   :  { %v4807_v60 = vpop.f32.mrf.mxu2  ;;  %v4796_v40 = vpop.f32.mrf.mxu1 }
 0x3db   :  { %v4808_v21 = vadd.f32 %v4807_v60, %v4795_v18 }
 0x3dc   :  { %v4820_v11 = vpop.f32.mrf.mxu3 }
 0x3dd   :  { %v9093_v49 = vadd.f32 %v4820_v11, %v4808_v21  ;;  %v8457_v21 = vld [vmem:[#allocation8] sm:$0xff] }
 0x3df   :  { %v4933_v58 = vadd.f32 %v4932_v57, %v9093_v49  ;;  %v4951_v60 = vmul.f32 %v9093_v49, %v9093_v49  ;;  %v8494_v57 = vld [vmem:[#allocation8 + $0x128] sm:$0xff] }
 0x3e2   :  { %v4809_v14 = vpop.f32.mrf.mxu2 }
 0x3e3   :  { %v4957_v14 = vadd.f32 %v4956_v35, %v4950_v5 }
 0x3e4   :  { %v4822_v41 = vpop.f32.mrf.mxu3 }
 0x3e5   :  { %v4958_v41 = vadd.f32 %v4957_v14, %v4951_v60  ;;  %v8493_v60 = vld [vmem:[#allocation8 + $0x120] sm:$0xff] }
 0x3f0   :  { %v4833_v62 = vpop.f32.mrf.mxu0 }
 0x3f1   :  { %v4834_v29 = vadd.f32 %v4833_v62, %v1320_v1  ;;  %v8469_v1 = vld [vmem:[#allocation8 + $0x60] sm:$0xff] }
 0x3f2   :  { %v4846_v26 = vpop.f32.mrf.mxu1 }
 0x3f3   :  { %v4847_v9 = vadd.f32 %v4846_v26, %v4834_v29  ;;  %v8462_v26 = vld [vmem:[#allocation8 + $0x28] sm:$0xff]  ;;  %v8702_v29 = vmov 1024.0  }
 0x3f4   :  { %5519 = vmatpush.bf16.msra.mxu0 %v8462_v26  ;;  %8534 = vrcp.f32 %v8702_v29  ;;  %v8500_v26 = vld [vmem:[#allocation8 + $0x158] sm:$0xff]  ;;  %v8490_v29 = vld [vmem:[#allocation8 + $0x108] sm:$0xff] }
 0x3f8   :  { %v4835_v0 = vpop.f32.mrf.mxu0 }
 0x3f9   :  { %v8486_v0 = vld [vmem:[#allocation8 + $0xe8] sm:$0xff] }
 0x3fa   :  { %v4859_v17 = vpop.f32.mrf.mxu2  ;;  %v4848_v19 = vpop.f32.mrf.mxu1  ;;  %5558 = vmatpush.bf16.msra.mxu3 %v8486_v0  ;;  %v8491_v0 = vld [vmem:[#allocation8 + $0x110] sm:$0xff] }
 0x3fb   :  { %v4860_v55 = vadd.f32 %v4859_v17, %v4847_v9  ;;  %v8470_v17 = vld [vmem:[#allocation8 + $0x68] sm:$0xff]  ;;  %v8461_v19 = vld [vmem:[#allocation8 + $0x20] sm:$0xff]  ;;  %v8535_v54 = vpop.eup %8534  ;;  %v8476_v9 = vld [vmem:[#allocation8 + $0x98] sm:$0xff] }
 0x3fc   :  { %5532 = vmatpush.bf16.msra.mxu1 %v8470_v17  ;;  %5520 = vmatpush.bf16.msra.mxu0 %v8461_v19  ;;  %v4938_v8 = vmul.f32 1024.0, %v8535_v54  ;;  %vm4942_vm7 = vweird.f32 %v8535_v54  ;;  %v8508_v17 = vld [vmem:[#allocation8 + $0x198] sm:$0xff]  ;;  %v8499_v19 = vld [vmem:[#allocation8 + $0x150] sm:$0xff] }
 0x3fd   :  { %v4872_v42 = vpop.f32.mrf.mxu3 }
 0x3fe   :  { %v4873_v7 = vadd.f32 %v4872_v42, %v4860_v55  ;;  %v8478_v42 = vld [vmem:[#allocation8 + $0xa8] sm:$0xff]  ;;  %v4939_v32 = vsub.f32 1.0, %v4938_v8  ;;  %v8483_v55 = vld [vmem:[#allocation8 + $0xd0] sm:$0xff] }
 0x3ff   :  { %5545 = vmatpush.bf16.msra.mxu2 %v8478_v42  ;;  %v8516_v42 = vld [vmem:[#allocation8 + $0x1d8] sm:$0xff] }
 0x400   :  { %5533 = vmatpush.bf16.msra.mxu1 %v8469_v1  ;;  %5521 = vmatpush.bf16.msra.mxu0 %v8460_v13  ;;  %v4940_v18 = vmul.f32 %v8535_v54, %v4939_v32  ;;  %v8507_v1 = vld [vmem:[#allocation8 + $0x190] sm:$0xff]  ;;  %v8506_v13 = vld [vmem:[#allocation8 + $0x188] sm:$0xff]  ;;  %v8497_v32 = vld [vmem:[#allocation8 + $0x140] sm:$0xff] }
 0x402   :  { %v4861_v24 = vpop.f32.mrf.mxu2  ;;  %v4941_v37 = vadd.f32 %v8535_v54, %v4940_v18 }
 0x403   :  { %v8477_v24 = vld [vmem:[#allocation8 + $0xa0] sm:$0xff] }
 0x404   :  { %5546 = vmatpush.bf16.msra.mxu2 %v8477_v24  ;;  %5534 = vmatpush.bf16.msra.mxu1 %v8468_v4  ;;  %v8515_v24 = vld [vmem:[#allocation8 + $0x1d0] sm:$0xff]  ;;  %v8514_v4 = vld [vmem:[#allocation8 + $0x1c8] sm:$0xff] }
 0x405   :  { %v4874_v25 = vpop.f32.mrf.mxu3  ;;  %5522 = vmatpush.bf16.msra.mxu0 %v8459_v23 }
 0x406   :  { %v8485_v25 = vld [vmem:[#allocation8 + $0xe0] sm:$0xff] }
 0x407   :  { %5559 = vmatpush.bf16.msra.mxu3 %v8485_v25 }
 0x408   :  { %5547 = vmatpush.bf16.msra.mxu2 %v8476_v9  ;;  %5535 = vmatpush.bf16.msra.mxu1 %v8467_v15  ;;  %v8505_v15 = vld [vmem:[#allocation8 + $0x180] sm:$0xff] }
 0x40b   :  { %5560 = vmatpush.bf16.msra.mxu3 %v8484_v10  ;;  %v8489_v10 = vld [vmem:[#allocation8 + $0x100] sm:$0xff] }
 0x40c   :  { %5548 = vmatpush.bf16.msra.mxu2 %v8475_v31  ;;  %5536 = vmatpush.bf16.msra.mxu1 %v8466_v38  ;;  %v8513_v31 = vld [vmem:[#allocation8 + $0x1c0] sm:$0xff] }
 0x40f   :  { %5561 = vmatpush.bf16.msra.mxu3 %v8483_v55 }
 0x42d   :  { %v4885_v56 = vpop.f32.mrf.mxu0 }
 0x42e   :  { %v4886_v20 = vadd.f32 %v4885_v56, %v4873_v7  ;;  %v8458_v56 = vld [vmem:[#allocation8 + $0x8] sm:$0xff] }
 0x42f   :  { %v4898_v33 = vpop.f32.mrf.mxu1  ;;  %v8474_v7 = vld [vmem:[#allocation8 + $0x88] sm:$0xff]  ;;  %5523 = vmatpush.bf16.msra.mxu0 %v8458_v56 }
 0x430   :  { %v4899_v50 = vadd.f32 %v4898_v33, %v4886_v20  ;;  %v8482_v33 = vld [vmem:[#allocation8 + $0xc8] sm:$0xff]  ;;  %5549 = vmatpush.bf16.msra.mxu2 %v8474_v7  ;;  %v8465_v20 = vld [vmem:[#allocation8 + $0x40] sm:$0xff] }
 0x431   :  { %5562 = vmatpush.bf16.msra.mxu3 %v8482_v33  ;;  %5537 = vmatpush.bf16.msra.mxu1 %v8465_v20 }
 0x433   :  { %5524 = vmatpush.bf16.msra.mxu0 %v8457_v21 }
 0x434   :  { %5550 = vmatpush.bf16.msra.mxu2 %v8473_v22 }
 0x435   :  { %v4887_v43 = vpop.f32.mrf.mxu0  ;;  %5563 = vmatpush.bf16.msra.mxu3 %v8481_v39  ;;  %5582 = vmatpush.bf16.msrb.mxu1 %v8504_v48 }
 0x436   :  { %v4943_v43 = vsel %vm4942_vm7, %v8535_v54, %v4941_v37  ;;  %v8498_v54 = vld [vmem:[#allocation8 + $0x148] sm:$0xff] }
 0x437   :  { %v4911_v52 = vpop.f32.mrf.mxu2  ;;  %v4900_v16 = vpop.f32.mrf.mxu1  ;;  %5569 = vmatpush.bf16.msrb.mxu0 %v8496_v44 }
 0x438   :  { %v4912_v51 = vadd.f32 %v4911_v52, %v4899_v50  ;;  %v8512_v50 = vld [vmem:[#allocation8 + $0x1b8] sm:$0xff] }
 0x439   :  { %v4924_v28 = vpop.f32.mrf.mxu3  ;;  %v8520_v52 = vld [vmem:[#allocation8 + $0x1f8] sm:$0xff]  ;;  %5595 = vmatpush.bf16.msrb.mxu2 %v8512_v50  ;;  %5583 = vmatpush.bf16.msrb.mxu1 %v8503_v53 }
 0x43a   :  { %v9100_v3 = vadd.f32 %v4924_v28, %v4912_v51  ;;  %5608 = vmatpush.bf16.msrb.mxu3 %v8520_v52  ;;  %v8511_v51 = vld [vmem:[#allocation8 + $0x1b0] sm:$0xff] }
 0x43b   :  { %v8519_v28 = vld [vmem:[#allocation8 + $0x1f0] sm:$0xff]  ;;  %5570 = vmatpush.bf16.msrb.mxu0 %v8495_v36 }
 0x43c   :  { %v4934_v59 = vadd.f32 %v4933_v58, %v9100_v3  ;;  %v4952_v40 = vmul.f32 %v9100_v3, %v9100_v3  ;;  %v8510_v58 = vld [vmem:[#allocation8 + $0x1a8] sm:$0xff] }
 0x43d   :  { %5596 = vmatpush.bf16.msrb.mxu2 %v8511_v51  ;;  %5584 = vmatpush.bf16.msrb.mxu1 %v8502_v2 }
 0x43e   :  { %4935 = vadd.xlane.f32.xlu0 %v4934_v59  ;;  %v4959_v62 = vadd.f32 %v4958_v41, %v4952_v40  ;;  %5609 = vmatpush.bf16.msrb.mxu3 %v8519_v28  ;;  %v8517_v40 = vld [vmem:[#allocation8 + $0x1e0] sm:$0xff] }
 0x43f   :  { %v4913_v11 = vpop.f32.mrf.mxu2  ;;  %5571 = vmatpush.bf16.msrb.mxu0 %v8494_v57 }
 0x440   :  { %v8501_v11 = vld [vmem:[#allocation8 + $0x160] sm:$0xff] }
 0x441   :  { %v4926_v45 = vpop.f32.mrf.mxu3  ;;  %5597 = vmatpush.bf16.msrb.mxu2 %v8510_v58  ;;  %5585 = vmatpush.bf16.msrb.mxu1 %v8501_v11 }
 0x442   :  { %5610 = vmatpush.bf16.msrb.mxu3 %v8518_v27  ;;  %v8509_v45 = vld [vmem:[#allocation8 + $0x1a0] sm:$0xff] }
 0x443   :  { %5572 = vmatpush.bf16.msrb.mxu0 %v8493_v60 }
 0x445   :  { %5598 = vmatpush.bf16.msrb.mxu2 %v8509_v45  ;;  %5586 = vmatpush.bf16.msrb.mxu1 %v8500_v26 }
 0x446   :  { %4960 = vadd.xlane.f32.xlu0 %v4959_v62  ;;  %v8492_v62 = vld [vmem:[#allocation8 + $0x118] sm:$0xff]  ;;  %5611 = vmatpush.bf16.msrb.mxu3 %v8517_v40 }
 0x447   :  { %5573 = vmatpush.bf16.msrb.mxu0 %v8492_v62 }
 0x449   :  { %5599 = vmatpush.bf16.msrb.mxu2 %v8508_v17  ;;  %5587 = vmatpush.bf16.msrb.mxu1 %v8499_v19 }
 0x44a   :  { %5612 = vmatpush.bf16.msrb.mxu3 %v8516_v42 }
 0x44b   :  { %5574 = vmatpush.bf16.msrb.mxu0 %v8491_v0 }
 0x44d   :  { %5600 = vmatpush.bf16.msrb.mxu2 %v8507_v1  ;;  %5588 = vmatpush.bf16.msrb.mxu1 %v8498_v54 }
 0x44e   :  { %5613 = vmatpush.bf16.msrb.mxu3 %v8515_v24 }
 0x44f   :  { %5575 = vmatpush.bf16.msrb.mxu0 %v8490_v29 }
 0x451   :  { %5601 = vmatpush.bf16.msrb.mxu2 %v8506_v13  ;;  %5589 = vmatpush.bf16.msrb.mxu1 %v8497_v32 }
 0x452   :  { %5614 = vmatpush.bf16.msrb.mxu3 %v8514_v4 }
 0x453   :  { %5576 = vmatpush.bf16.msrb.mxu0 %v8489_v10 }
 0x455   :  { %5602 = vmatpush.bf16.msrb.mxu2 %v8505_v15 }
 0x456   :  { %5615 = vmatpush.bf16.msrb.mxu3 %v8513_v31 }
 0x4b1   :  { %v4936_v61 = vpop.xlane.xlu0 %4935 }
 0x4b2   :  { %v9110_v16 = vmul.f32 %v4943_v43, %v4936_v61 }
 0x4b4   :  { %v4963_v5 = vmul.f32 %v9110_v16, %v9110_v16  ;;  %v4966_v56 = vsub.f32 %v9011_v34, %v9110_v16  ;;  %v4967_v38 = vsub.f32 %v9021_v30, %v9110_v16  ;;  %v4968_v7 = vsub.f32 %v9037_v6, %v9110_v16 }
 0x4b5   :  { %v4969_v33 = vsub.f32 %v9051_v12, %v9110_v16  ;;  %v4970_v34 = vsub.f32 %v9067_v63, %v9110_v16  ;;  %v4971_v30 = vsub.f32 %v9078_v46, %v9110_v16  ;;  %v4972_v6 = vsub.f32 %v9093_v49, %v9110_v16 }
 0x4b6   :  { %v4973_v12 = vsub.f32 %v9100_v3, %v9110_v16 }
 0x4b9   :  { %v4961_v47 = vpop.xlane.xlu0 %4960 }
 0x4ba   :  { %v4962_v59 = vmul.f32 %v4961_v47, %v4943_v43  ;;  %v8533_v47 = vld [vmem:[#allocation10] ss:$0 sm:$0xff] }
 0x4bc   :  { %v4964_v35 = vsub.f32 %v4962_v59, %v4963_v5 }
 0x4be   :  { %v4965_v14 = vmax.f32 %v4964_v35, 0.0 }
 0x4c0   :  { %v4974_v41 = vadd.f32 1e-05, %v4965_v14 }
 0x4c2   :  { %8536 = vrsqrt.f32 %v4974_v41  ;;  %vm4981_vm9 = vweird.f32 %v4974_v41 }
 0x4c8   :  { %v8537_v25 = vpop.eup %8536 }
 0x4c9   :  { %v4976_v8 = vmul.f32 %v8537_v25, %v4974_v41  ;;  %vm4982_vm8 = vweird.f32 %v8537_v25 }
 0x4ca   :  { %vm4983_vm10 = vmor %vm4981_vm9, %vm4982_vm8 }
 0x4cb   :  { %v4977_v9 = vmul.f32 %v8537_v25, %v4976_v8 }
 0x4cd   :  { %v4978_v23 = vmul.f32 0.5, %v4977_v9 }
 0x4cf   :  { %v4979_v55 = vsub.f32 1.5, %v4978_v23 }
 0x4d1   :  { %v4980_v18 = vmul.f32 %v8537_v25, %v4979_v55 }
 0x4d3   :  { %v4984_v37 = vsel %vm4983_vm10, %v8537_v25, %v4980_v18 }
 0x4d4   :  { %v4985_v21 = vmul.f32 %v4984_v37, %v4966_v56  ;;  %v4986_v20 = vmul.f32 %v4984_v37, %v4967_v38  ;;  %v4987_v22 = vmul.f32 %v4984_v37, %v4968_v7  ;;  %v4988_v61 = vmul.f32 %v4984_v37, %v4969_v33 }
 0x4d5   :  { %v4989_v52 = vmul.f32 %v4984_v37, %v4970_v34  ;;  %v4990_v43 = vmul.f32 %v4984_v37, %v4971_v30  ;;  %v4991_v36 = vmul.f32 %v4984_v37, %v4972_v6  ;;  %v4992_v53 = vmul.f32 %v4984_v37, %v4973_v12 }
 0x4d6   :  { %v4993_v39 = vpack.c.bf16 %v4985_v21, %v4985_v21  ;;  %v4994_v44 = vpack.c.bf16 %v4986_v20, %v4986_v20  ;;  %v4995_v48 = vpack.c.bf16 %v4987_v22, %v4987_v22  ;;  %v4996_v50 = vpack.c.bf16 %v4988_v61, %v4988_v61 }
 0x4d7   :  { %v4997_v51 = vpack.c.bf16 %v4989_v52, %v4989_v52  ;;  %v4998_v28 = vpack.c.bf16 %v4990_v43, %v4990_v43  ;;  %v4999_v57 = vpack.c.bf16 %v4991_v36, %v4991_v36  ;;  %v5000_v2 = vpack.c.bf16 %v4992_v53, %v4992_v53 }
 0x4d8   :  { %5525 = vmatmul.bf16.vlgmr.msra.gmra.mxu0 %v4993_v39  ;;  %5538 = vmatmul.bf16.vlgmr.msra.gmra.mxu1 %v4994_v44 }
 0x4d9   :  { %5551 = vmatmul.bf16.vlgmr.msra.gmra.mxu2 %v4995_v48  ;;  %5564 = vmatmul.bf16.vlgmr.msra.gmra.mxu3 %v4996_v50 }
 0x4e8   :  { %5577 = vmatmul.bf16.vlgmr.msrb.gmra.mxu0 %v4997_v51  ;;  %5590 = vmatmul.bf16.vlgmr.msrb.gmra.mxu1 %v4998_v28 }
 0x4e9   :  { %5603 = vmatmul.bf16.vlgmr.msrb.gmra.mxu2 %v4999_v57  ;;  %5616 = vmatmul.bf16.vlgmr.msrb.gmra.mxu3 %v5000_v2 }
 0x555   :  { %v5526_v63 = vpop.f32.mrf.mxu0  ;;  %v5539_v46 = vpop.f32.mrf.mxu1 }
 0x556   :  { %v5527_v58 = vadd.f32 %v8533_v47, %v5526_v63 }
 0x558   :  { %v5540_v16 = vadd.f32 %v5539_v46, %v5527_v58 }
 0x55c   :  { %v5552_v49 = vpop.f32.mrf.mxu2  ;;  %v5565_v27 = vpop.f32.mrf.mxu3 }
 0x55d   :  { %v5528_v5 = vpop.f32.mrf.mxu0  ;;  %v5541_v3 = vpop.f32.mrf.mxu1  ;;  %v5553_v59 = vadd.f32 %v5552_v49, %v5540_v16 }
 0x55f   :  { %v5566_v11 = vadd.f32 %v5565_v27, %v5553_v59 }
 0x564   :  { %v5554_v35 = vpop.f32.mrf.mxu2  ;;  %v5567_v60 = vpop.f32.mrf.mxu3 }
 0x565   :  { %v5578_v45 = vpop.f32.mrf.mxu0  ;;  %v5591_v40 = vpop.f32.mrf.mxu1 }
 0x566   :  { %v5579_v14 = vadd.f32 %v5578_v45, %v5566_v11 }
 0x568   :  { %v5592_v41 = vadd.f32 %v5591_v40, %v5579_v14 }
 0x56c   :  { %v5604_v62 = vpop.f32.mrf.mxu2  ;;  %v5617_v26 = vpop.f32.mrf.mxu3 }
 0x56d   :  { %v5605_v17 = vadd.f32 %v5604_v62, %v5592_v41  ;;  %v5580_v42 = vpop.f32.mrf.mxu0  ;;  %v5593_v0 = vpop.f32.mrf.mxu1 }
 0x56f   :  { %v5618_v19 = vadd.f32 %v5617_v26, %v5605_v17 }
 0x571   :  { %5621 = vst [vmem:[#allocation11] sm:$0xff] %v5618_v19 }
 0x572   :  { %5632 = dma.vmem_to_hbm [thread:$0]  %s5628_s4, 128, %s5630_s22, [#allocation4]  }
 0x574   :  { %v5606_v1 = vpop.f32.mrf.mxu2  ;;  %v5619_v24 = vpop.f32.mrf.mxu3 }
 0x575   :  { %8690 = dma.done.wait [#allocation4], 128  }
 0x576   :  { %8691 = vsyncadd [#allocation4], 4294967168 }
 0x577   :  { %5637 = vsyncpa [#allocation3], 1 }
 0x578   :  { %5638 = vsyncpa [#allocation6], 1 }
 0x579   :  { %5639 = vsyncpa [#allocation9], 1 }
 0x57a   :  { %5640 = vsyncpa [#allocation4], 1 }

</bundles_post_ra>
